<compile_context>
chip_gen: v7x
topology: tpu7x:2x2x1
jax: 0.10.0
libtpu: 0.0.40
codegen_flags: <defaults>
</compile_context>

<pallas_src>
import functools
import math

import jax
import jax.numpy as jnp
from jax.experimental import pallas as pl
from jax.experimental.pallas import tpu as pltpu


# ---------------------------------------------------------------------------
# Small helpers
# ---------------------------------------------------------------------------
def _round_up(x, m):
    return ((x + m - 1) // m) * m


def _choose_block_rows(total, unit, target=512, min_grid=4):
    """Row-block size: multiple of `unit`, aims for `target` rows, but keeps
    at least `min_grid` grid steps when the problem is large enough."""
    total_pad = _round_up(max(total, 1), unit)
    bm = min(_round_up(target, unit), total_pad)
    if total_pad // unit >= min_grid:
        bm = min(bm, _round_up(-(-total_pad // min_grid), unit))
    return max(unit, bm)


def _full_spec(a):
    # whole-array block, same for every grid step (helper avoids late-binding
    # closures inside loops)
    return pl.BlockSpec(a.shape, lambda i: (0,) * a.ndim)


def _layer_norm(y, g, b, eps):
    mu = jnp.mean(y, axis=-1, keepdims=True)
    yc = y - mu
    var = jnp.mean(yc * yc, axis=-1, keepdims=True)
    return yc * jax.lax.rsqrt(var + eps) * g + b


# ---------------------------------------------------------------------------
# Generic row-tiled linear (final mixed output projection)
# ---------------------------------------------------------------------------
def _linear_kernel(x_ref, w_ref, b_ref, o_ref):
    o_ref[...] = (jnp.dot(x_ref[...], w_ref[...],
                          preferred_element_type=jnp.float32) + b_ref[...]
                  ).astype(o_ref.dtype)


def linear(x2d, w, b, target_rows=512, min_pallas_rows=64):
    M, K = x2d.shape
    N = w.shape[1]
    if M < min_pallas_rows:
        # Review item: below this size the per-call overhead exceeds compute.
        return jnp.dot(x2d, w, preferred_element_type=jnp.float32) + b
    bm = _choose_block_rows(M, 8, target=target_rows)
    M_pad = _round_up(M, bm)
    xp = x2d if M_pad == M else jnp.pad(x2d, ((0, M_pad - M), (0, 0)))
    out = pl.pallas_call(
        _linear_kernel,
        out_shape=jax.ShapeDtypeStruct((M_pad, N), jnp.float32),
        grid=(M_pad // bm,),
        in_specs=[pl.BlockSpec((bm, K), lambda i: (i, 0)),
                  _full_spec(w), _full_spec(b)],
        out_specs=pl.BlockSpec((bm, N), lambda i: (i, 0)),
        compiler_params=pltpu.CompilerParams(dimension_semantics=("parallel",)),
    )(xp, w, b)
    return out[:M] if M_pad != M else out


# ---------------------------------------------------------------------------
# Fused embedding kernel: traffic proj + fourier proj + temporal-fusion MLP
# + adaptive embedding -> one lane-dense (rows, model_dim) store.
# ---------------------------------------------------------------------------
def _embed_kernel(traffic_ref, fourier_ref, tod_ref, dow_ref, adp_ref,
                  tw_ref, tb_ref, fw_ref, fb_ref, w1_ref, b1_ref, w2_ref, b2_ref,
                  o_ref, *, te):
    # traffic projection has K == 1 -> plain broadcast multiply
    traffic_e = traffic_ref[...] * tw_ref[...] + tb_ref[...]
    fourier_e = (jnp.dot(fourier_ref[...], fw_ref[...],
                         preferred_element_type=jnp.float32) + fb_ref[...])
    # temporal-fusion MLP on concat(tod, dow): split first-layer weight rows
    # instead of an in-kernel lane concat of the inputs.
    w1 = w1_ref[...]
    h1 = (jnp.dot(tod_ref[...], w1[:te, :], preferred_element_type=jnp.float32)
          + jnp.dot(dow_ref[...], w1[te:, :], preferred_element_type=jnp.float32)
          + b1_ref[...])
    h1 = jnp.maximum(h1, 0.0)
    tfused = jnp.dot(h1, w2_ref[...], preferred_element_type=jnp.float32) + b2_ref[...]
    # One store of the full model_dim slab (review: avoid masked partial stores).
    o_ref[...] = jnp.concatenate([traffic_e, fourier_e, tfused, adp_ref[...]],
                                 axis=-1)


def embedding_fusion(traffic, fourier, tod_emb, dow_emb, adp, params):
    M = traffic.shape[0]
    bm = _choose_block_rows(M, 8, target=1024)
    M_pad = _round_up(M, bm)

    def padr(a):
        return a if M_pad == M else jnp.pad(a, ((0, M_pad - M), (0, 0)))

    ie = params["traffic_w"].shape[1]
    fe = params["fourier_w"].shape[1]
    te = params["tod_embedding"].shape[1]
    de = params["dow_embedding"].shape[1]
    out_dim = ie + fe + te + de + adp.shape[1]

    ins = [padr(traffic), padr(fourier), padr(tod_emb), padr(dow_emb), padr(adp)]
    weights = [params["traffic_w"], params["traffic_b"],
               params["fourier_w"], params["fourier_b"],
               params["tf_w1"], params["tf_b1"],
               params["tf_w2"], params["tf_b2"]]

    def row_spec(width):
        return pl.BlockSpec((bm, width), lambda i: (i, 0))

    out = pl.pallas_call(
        functools.partial(_embed_kernel, te=te),
        out_shape=jax.ShapeDtypeStruct((M_pad, out_dim), jnp.float32),
        grid=(M_pad // bm,),
        in_specs=[row_spec(a.shape[1]) for a in ins] + [_full_spec(w) for w in weights],
        out_specs=pl.BlockSpec((bm, out_dim), lambda i: (i, 0)),
        compiler_params=pltpu.CompilerParams(dimension_semantics=("parallel",)),
    )(*ins, *weights)
    return out[:M] if M_pad != M else out


# ---------------------------------------------------------------------------
# Fused GRU stack: all layers in one pallas_call; input-gate matmul hoisted
# out of the recurrence into a VMEM scratch; recurrence stays in f32.
# Layout (T, BN, D); grid over blocks of the BN axis.
# ---------------------------------------------------------------------------
def _gru_stack_kernel(*refs, T, H, num_layers, unroll):
    x_ref = refs[0]
    o_ref = refs[1 + 4 * num_layers]
    act_ref = refs[2 + 4 * num_layers]          # (T, bt, H) inter-layer activation
    gx_ref = refs[3 + 4 * num_layers]           # (T*bt, 3H) hoisted input gates
    bt = o_ref.shape[1]

    for layer in range(num_layers):
        wih_ref, bih_ref, whh_ref, bhh_ref = refs[1 + 4 * layer: 5 + 4 * layer]
        in_ref = x_ref if layer == 0 else act_ref
        out_ref = o_ref if layer == num_layers - 1 else act_ref
        din = in_ref.shape[-1]

        # Hoisted, h-independent input-gate matmul over ALL timesteps at once
        # (one large-M matmul off the serial critical path).
        x_all = in_ref[...].reshape(T * bt, din)
        gx_ref[...] = (jnp.dot(x_all, wih_ref[...],
                               preferred_element_type=jnp.float32) + bih_ref[...])

        whh = whh_ref[...]
        bhh = bhh_ref[...]

        def step(t, h, _whh=whh, _bhh=bhh, _out=out_ref):
            start = pl.multiple_of(t * bt, 8)
            g_x = gx_ref[pl.ds(start, bt), :]
            g_h = jnp.dot(h, _whh, preferred_element_type=jnp.float32) + _bhh
            r = jax.nn.sigmoid(g_x[:, :H] + g_h[:, :H])
            z = jax.nn.sigmoid(g_x[:, H:2 * H] + g_h[:, H:2 * H])
            n = jnp.tanh(g_x[:, 2 * H:] + r * g_h[:, 2 * H:])
            h_new = (1.0 - z) * n + z * h
            _out[t] = h_new
            return h_new

        jax.lax.fori_loop(0, T, step, jnp.zeros((bt, H), jnp.float32),
                          unroll=unroll)


def _gru_stack_call(x_tbd, layers, H, bt):
    T, BN, D = x_tbd.shape                      # BN already padded to multiple of bt
    num_layers = len(layers)
    unroll = T <= 16                            # review: guard full unroll

    inputs = [x_tbd]
    in_specs = [pl.BlockSpec((T, bt, D), lambda i: (0, i, 0))]
    for p in layers:
        for name in ("wih", "bih", "whh", "bhh"):
            a = p[name]
            inputs.append(a)
            in_specs.append(_full_spec(a))

    return pl.pallas_call(
        functools.partial(_gru_stack_kernel, T=T, H=H,
                          num_layers=num_layers, unroll=unroll),
        out_shape=jax.ShapeDtypeStruct((T, BN, H), jnp.float32),
        grid=(BN // bt,),
        in_specs=in_specs,
        out_specs=pl.BlockSpec((T, bt, H), lambda i: (0, i, 0)),
        scratch_shapes=[pltpu.VMEM((T, bt, H), jnp.float32),
                        pltpu.VMEM((T * bt, 3 * H), jnp.float32)],
        compiler_params=pltpu.CompilerParams(dimension_semantics=("parallel",)),
    )(*inputs)


def gru_module(x, layers, H, bn_target=256):
    # x: (B, T, N, D) -> (B, T, N, H); GRU over time per (batch, node) sequence.
    B, T, N, D = x.shape
    BN = B * N
    xt = jnp.transpose(x, (1, 0, 2, 3)).reshape(T, BN, D)
    bt = _choose_block_rows(BN, 8, target=bn_target)
    BN_pad = _round_up(BN, bt)
    if BN_pad != BN:
        xt = jnp.pad(xt, ((0, 0), (0, BN_pad - BN), (0, 0)))
    out = _gru_stack_call(xt, layers, H, bt)
    out = out[:, :BN].reshape(T, B, N, H)
    return jnp.transpose(out, (1, 0, 2, 3))


# ---------------------------------------------------------------------------
# Fused transformer encoder layer (post-LN), one pallas_call per layer.
# The block holds several length-L groups; QKV / out-proj / FFN / LN run on
# the merged (rows, H) slab, attention uses a block-diagonal group mask so
# every matmul is 2D large-M.
# ---------------------------------------------------------------------------
def _tx_layer_kernel(x_ref, gr_ref, gc_ref, wqkv_ref, bqkv_ref, wo_ref, bo_ref,
                     ln1g_ref, ln1b_ref, w1_ref, b1_ref, w2_ref, b2_ref,
                     ln2g_ref, ln2b_ref, o_ref, *, num_heads, eps):
    R, H = x_ref.shape
    hd = H // num_heads
    scale = 1.0 / math.sqrt(hd)

    x = x_ref[...]                                               # (R, H) f32
    qkv = (jnp.dot(x.astype(jnp.bfloat16), wqkv_ref[...],
                   preferred_element_type=jnp.float32) + bqkv_ref[...])
    # cast once per block (review: no per-head / per-group recasts)
    q = (qkv[:, :H] * scale).astype(jnp.bfloat16)
    k = qkv[:, H:2 * H].astype(jnp.bfloat16)
    v = qkv[:, 2 * H:].astype(jnp.bfloat16)

    # block-diagonal group mask (same for every block; group ids precomputed)
    mask = gr_ref[...] == gc_ref[...]                            # (R, R) bool

    heads = []
    for h in range(num_heads):
        sl = slice(h * hd, (h + 1) * hd)
        s = jax.lax.dot_general(q[:, sl], k[:, sl], (((1,), (1,)), ((), ())),
                                preferred_element_type=jnp.float32)   # (R, R)
        s = jnp.where(mask, s, -1e30)
        s = s - jnp.max(s, axis=-1, keepdims=True)
        probs = jnp.exp(s)
        inv = pl.reciprocal(jnp.sum(probs, axis=-1, keepdims=True), approx=True)
        oh = jnp.dot(probs.astype(jnp.bfloat16), v[:, sl],
                     preferred_element_type=jnp.float32) * inv        # (R, hd)
        heads.append(oh)

    # single (R,H)@(H,H) output projection instead of per-head K=hd matmuls
    attn = (jnp.dot(jnp.concatenate(heads, axis=-1).astype(jnp.bfloat16),
                    wo_ref[...], preferred_element_type=jnp.float32) + bo_ref[...])

    y = _layer_norm(x + attn, ln1g_ref[...], ln1b_ref[...], eps)

    f = jnp.maximum(jnp.dot(y.astype(jnp.bfloat16), w1_ref[...],
                            preferred_element_type=jnp.float32) + b1_ref[...], 0.0)
    f = jnp.dot(f.astype(jnp.bfloat16), w2_ref[...],
                preferred_element_type=jnp.float32) + b2_ref[...]
    o_ref[...] = _layer_norm(y + f, ln2g_ref[...], ln2b_ref[...], eps)


def _tx_layer_call(y, gid_row, gid_col, p, num_heads, bm, eps=1e-5):
    R, H = y.shape
    return pl.pallas_call(
        functools.partial(_tx_layer_kernel, num_heads=num_heads, eps=eps),
        out_shape=jax.ShapeDtypeStruct((R, H), jnp.float32),
        grid=(R // bm,),
        in_specs=[pl.BlockSpec((bm, H), lambda i: (i, 0)),
                  _full_spec(gid_row), _full_spec(gid_col),
                  _full_spec(p["wqkv"]), _full_spec(p["bqkv"]),
                  _full_spec(p["wo"]), _full_spec(p["bo"]),
                  _full_spec(p["ln1_g"]), _full_spec(p["ln1_b"]),
                  _full_spec(p["w1"]), _full_spec(p["b1"]),
                  _full_spec(p["w2"]), _full_spec(p["b2"]),
                  _full_spec(p["ln2_g"]), _full_spec(p["ln2_b"])],
        out_specs=pl.BlockSpec((bm, H), lambda i: (i, 0)),
        compiler_params=pltpu.CompilerParams(dimension_semantics=("parallel",)),
    )(y, gid_row, gid_col, p["wqkv"], p["bqkv"], p["wo"], p["bo"],
      p["ln1_g"], p["ln1_b"], p["w1"], p["b1"], p["w2"], p["b2"],
      p["ln2_g"], p["ln2_b"])


def transformer_module(x, layers, dim, num_heads):
    # x: (B, T, N, H); dim=1 -> attend over time, dim=2 -> attend over nodes.
    B, T, N, H = x.shape
    if dim == 1:
        xt = jnp.transpose(x, (0, 2, 1, 3))      # (B, N, T, H): groups (B,N), L=T
        G, L = B * N, T
    else:
        xt = x                                   # (B, T, N, H): groups (B,T), L=N
        G, L = B * T, N

    y = xt.reshape(G * L, H)
    unit = (L * 8) // math.gcd(L, 8)             # block rows: multiple of L and 8
    bm = _choose_block_rows(G * L, unit, target=512)
    R_pad = _round_up(G * L, bm)
    if R_pad != G * L:
        y = jnp.pad(y, ((0, R_pad - G * L), (0, 0)))

    gid = jnp.arange(bm, dtype=jnp.int32) // L
    gid_row = gid.reshape(bm, 1)
    gid_col = gid.reshape(1, bm)

    for p in layers:
        y = _tx_layer_call(y, gid_row, gid_col, p, num_heads, bm)

    y = y[:G * L].reshape(xt.shape)
    if dim == 1:
        y = jnp.transpose(y, (0, 2, 1, 3))
    return y


# ---------------------------------------------------------------------------
# Full forward pass
# ---------------------------------------------------------------------------
def gru_transformer_forward(x, params, cfg):
    B, T, N, _ = x.shape
    H = cfg["gru_hidden_dim"]
    nh = cfg["num_heads"]
    nhar = cfg["num_harmonics"]
    M = B * T * N

    traffic = x[..., 0:1].reshape(M, 1)
    fourier = x[..., 3:3 + 2 * nhar].reshape(M, 2 * nhar)

    # embedding-table gathers (plain-JAX glue); indices clamped for safety
    tod_idx = jnp.clip((x[..., 1] * cfg["steps_per_day"]).astype(jnp.int32),
                       0, cfg["steps_per_day"] - 1)
    tod_emb = jnp.take(params["tod_embedding"], tod_idx, axis=0).reshape(M, -1)
    dow_idx = jnp.clip(x[..., 2].astype(jnp.int32), 0, 6)
    dow_emb = jnp.take(params["dow_embedding"], dow_idx, axis=0).reshape(M, -1)

    adp = jnp.broadcast_to(params["adaptive_embedding"][None],
                           (B, T, N, cfg["adaptive_embedding_dim"])).reshape(M, -1)

    z = embedding_fusion(traffic, fourier, tod_emb, dow_emb, adp, params)
    z = z.reshape(B, T, N, -1)                                  # (B, T, N, model_dim)

    z = gru_module(z, params["gru_layers"], H)                  # (B, T, N, H)
    z = transformer_module(z, params["t_layers"], dim=1, num_heads=nh)
    z = transformer_module(z, params["s_layers"], dim=2, num_heads=nh)

    # mixed output projection
    out = jnp.transpose(z, (0, 2, 1, 3)).reshape(B * N, T * H)
    out = linear(out, params["out_w"], params["out_b"])
    out = out.reshape(B, N, cfg["out_steps"], cfg["output_dim"])
    return jnp.transpose(out, (0, 2, 1, 3))                     # (B, out_steps, N, 1)


# ---------------------------------------------------------------------------
# Deterministic parameter init
# ---------------------------------------------------------------------------
def _glorot(key, shape, dtype=jnp.float32):
    fan_in, fan_out = shape[0], shape[-1]
    lim = math.sqrt(6.0 / (fan_in + fan_out))
    return jax.random.uniform(key, shape, jnp.float32, -lim, lim).astype(dtype)


def init_params(key, cfg):
    keys = iter(jax.random.split(key, 256))
    nk = lambda: next(keys)
    H = cfg["gru_hidden_dim"]
    ie, te, de, fe, ae = (cfg["input_embedding_dim"], cfg["tod_embedding_dim"],
                          cfg["dow_embedding_dim"], cfg["fourier_embedding_dim"],
                          cfg["adaptive_embedding_dim"])
    ff = cfg["feed_forward_dim"]
    model_dim = ie + te + de + fe + ae
    p = {
        "traffic_w": _glorot(nk(), (1, ie)),
        "traffic_b": jnp.zeros((1, ie), jnp.float32),
        "fourier_w": _glorot(nk(), (2 * cfg["num_harmonics"], fe)),
        "fourier_b": jnp.zeros((1, fe), jnp.float32),
        "tod_embedding": 0.02 * jax.random.normal(nk(), (cfg["steps_per_day"], te), jnp.float32),
        "dow_embedding": 0.02 * jax.random.normal(nk(), (7, de), jnp.float32),
        "tf_w1": _glorot(nk(), (te + de, te + de)),
        "tf_b1": jnp.zeros((1, te + de), jnp.float32),
        "tf_w2": _glorot(nk(), (te + de, te + de)),
        "tf_b2": jnp.zeros((1, te + de), jnp.float32),
        "adaptive_embedding": _glorot(nk(), (cfg["in_steps"], cfg["num_nodes"], ae)),
        "out_w": _glorot(nk(), (cfg["in_steps"] * H, cfg["out_steps"] * cfg["output_dim"])),
        "out_b": jnp.zeros((1, cfg["out_steps"] * cfg["output_dim"]), jnp.float32),
    }
    gru_layers = []
    d_in = model_dim
    for _ in range(cfg["gru_num_layers"]):
        gru_layers.append({
            # GRU weights kept in f32 (correctness: no bf16 drift over time)
            "wih": _glorot(nk(), (d_in, 3 * H)),
            "whh": _glorot(nk(), (H, 3 * H)),
            "bih": jnp.zeros((1, 3 * H), jnp.float32),
            "bhh": jnp.zeros((1, 3 * H), jnp.float32),
        })
        d_in = H
    p["gru_layers"] = gru_layers

    def mk_tx_layer():
        return {
            "wqkv": _glorot(nk(), (H, 3 * H), dtype=jnp.bfloat16),
            "bqkv": jnp.zeros((1, 3 * H), jnp.float32),
            "wo": _glorot(nk(), (H, H), dtype=jnp.bfloat16),     # bf16 (review item)
            "bo": jnp.zeros((1, H), jnp.float32),
            "ln1_g": jnp.ones((1, H), jnp.float32), "ln1_b": jnp.zeros((1, H), jnp.float32),
            "ln2_g": jnp.ones((1, H), jnp.float32), "ln2_b": jnp.zeros((1, H), jnp.float32),
            "w1": _glorot(nk(), (H, ff), dtype=jnp.bfloat16),
            "b1": jnp.zeros((1, ff), jnp.float32),
            "w2": _glorot(nk(), (ff, H), dtype=jnp.bfloat16),
            "b2": jnp.zeros((1, H), jnp.float32),
        }
    p["t_layers"] = [mk_tx_layer() for _ in range(cfg["num_layers"])]
    p["s_layers"] = [mk_tx_layer() for _ in range(cfg["num_layers"])]
    return p


# ---------------------------------------------------------------------------
if __name__ == "__main__":
    cfg = dict(
        num_nodes=4, in_steps=8, out_steps=8, steps_per_day=288,
        output_dim=1, input_embedding_dim=8, tod_embedding_dim=8,
        dow_embedding_dim=8, fourier_embedding_dim=8,
        adaptive_embedding_dim=8, gru_hidden_dim=32, gru_num_layers=2,
        feed_forward_dim=64, num_heads=4, num_layers=2, num_harmonics=2,
    )
    B, T, N = 2, cfg["in_steps"], cfg["num_nodes"]

    key = jax.random.PRNGKey(0)
    k_traffic, k_tod, k_dow, k_fourier, k_params = jax.random.split(key, 5)

    traffic = jax.random.normal(k_traffic, (B, T, N, 1), jnp.float32)
    tod = jax.random.uniform(k_tod, (B, T, N, 1), jnp.float32, 0.0, 0.999)
    dow = jax.random.randint(k_dow, (B, T, N, 1), 0, 7).astype(jnp.float32)
    fourier = jax.random.normal(k_fourier, (B, T, N, 2 * cfg["num_harmonics"]), jnp.float32)
    x = jnp.concatenate([traffic, tod, dow, fourier], axis=-1)    # (2, 8, 4, 7)

    params = init_params(k_params, cfg)

    fwd = jax.jit(lambda xx, pp: gru_transformer_forward(xx, pp, cfg))
    out = jax.block_until_ready(fwd(x, params))

    assert out.shape == (B, cfg["out_steps"], N, cfg["output_dim"])
    assert bool(jnp.all(jnp.isfinite(out)))
    print("KERNEL_OK")
</pallas_src>

<mosaic_0001>
module attributes {stable_mosaic.version = 11 : i64} {
  func.func @_embed_kernel(%arg0: i32, %arg1: memref<16x1xf32, #tpu.memory_space<vmem>>, %arg2: memref<16x4xf32, #tpu.memory_space<vmem>>, %arg3: memref<16x8xf32, #tpu.memory_space<vmem>>, %arg4: memref<16x8xf32, #tpu.memory_space<vmem>>, %arg5: memref<16x8xf32, #tpu.memory_space<vmem>>, %arg6: memref<1x8xf32, #tpu.memory_space<vmem>>, %arg7: memref<1x8xf32, #tpu.memory_space<vmem>>, %arg8: memref<4x8xf32, #tpu.memory_space<vmem>>, %arg9: memref<1x8xf32, #tpu.memory_space<vmem>>, %arg10: memref<16x16xf32, #tpu.memory_space<vmem>>, %arg11: memref<1x16xf32, #tpu.memory_space<vmem>>, %arg12: memref<16x16xf32, #tpu.memory_space<vmem>>, %arg13: memref<1x16xf32, #tpu.memory_space<vmem>>, %arg14: memref<16x40xf32, #tpu.memory_space<vmem>>) attributes {dimension_semantics = [#tpu.dimension_semantics<parallel>], iteration_bounds = array<i64: 4>, scalar_prefetch = 0 : i64, scratch_operands = 0 : i64, tpu.core_type = #tpu.core_type<tc>, window_params = [{transform_indices = @transform_0, window_bounds = array<i64: 16, 1>}, {transform_indices = @transform_1, window_bounds = array<i64: 16, 4>}, {transform_indices = @transform_2, window_bounds = array<i64: 16, 8>}, {transform_indices = @transform_3, window_bounds = array<i64: 16, 8>}, {transform_indices = @transform_4, window_bounds = array<i64: 16, 8>}, {pipeline_mode = #tpu.pipeline_mode<synchronous>, transform_indices = @transform_5, window_bounds = array<i64: 1, 8>}, {pipeline_mode = #tpu.pipeline_mode<synchronous>, transform_indices = @transform_6, window_bounds = array<i64: 1, 8>}, {pipeline_mode = #tpu.pipeline_mode<synchronous>, transform_indices = @transform_7, window_bounds = array<i64: 4, 8>}, {pipeline_mode = #tpu.pipeline_mode<synchronous>, transform_indices = @transform_8, window_bounds = array<i64: 1, 8>}, {pipeline_mode = #tpu.pipeline_mode<synchronous>, transform_indices = @transform_9, window_bounds = array<i64: 16, 16>}, {pipeline_mode = #tpu.pipeline_mode<synchronous>, transform_indices = @transform_10, window_bounds = array<i64: 1, 16>}, {pipeline_mode = #tpu.pipeline_mode<synchronous>, transform_indices = @transform_11, window_bounds = array<i64: 16, 16>}, {pipeline_mode = #tpu.pipeline_mode<synchronous>, transform_indices = @transform_12, window_bounds = array<i64: 1, 16>}, {transform_indices = @transform_13, window_bounds = array<i64: 16, 40>}]} {
    %c0 = arith.constant 0 : index
    %c0_0 = arith.constant 0 : index
    %0 = vector.load %arg1[%c0, %c0_0] : memref<16x1xf32, #tpu.memory_space<vmem>>, vector<16x1xf32>
    %c0_1 = arith.constant 0 : index
    %c0_2 = arith.constant 0 : index
    %1 = vector.load %arg6[%c0_1, %c0_2] : memref<1x8xf32, #tpu.memory_space<vmem>>, vector<1x8xf32>
    %2 = vector.broadcast %0 : vector<16x1xf32> to vector<16x8xf32>
    %3 = vector.broadcast %1 : vector<1x8xf32> to vector<16x8xf32>
    %4 = arith.mulf %2, %3 : vector<16x8xf32>
    %c0_3 = arith.constant 0 : index
    %c0_4 = arith.constant 0 : index
    %5 = vector.load %arg7[%c0_3, %c0_4] : memref<1x8xf32, #tpu.memory_space<vmem>>, vector<1x8xf32>
    %6 = vector.broadcast %5 : vector<1x8xf32> to vector<16x8xf32>
    %7 = arith.addf %4, %6 : vector<16x8xf32>
    %c0_5 = arith.constant 0 : index
    %c0_6 = arith.constant 0 : index
    %8 = vector.load %arg2[%c0_5, %c0_6] : memref<16x4xf32, #tpu.memory_space<vmem>>, vector<16x4xf32>
    %c0_7 = arith.constant 0 : index
    %c0_8 = arith.constant 0 : index
    %9 = vector.load %arg8[%c0_7, %c0_8] : memref<4x8xf32, #tpu.memory_space<vmem>>, vector<4x8xf32>
    %cst = arith.constant dense<0.000000e+00> : vector<16x8xf32>
    %10 = tpu.matmul %8, %9, %cst {dimension_numbers = #tpu.dot_dimension_numbers<[1], [0], [0], [1], [0, 0, 1, 1], [], []>} : vector<16x4xf32>, vector<4x8xf32>, vector<16x8xf32> -> vector<16x8xf32>
    %c0_9 = arith.constant 0 : index
    %c0_10 = arith.constant 0 : index
    %11 = vector.load %arg9[%c0_9, %c0_10] : memref<1x8xf32, #tpu.memory_space<vmem>>, vector<1x8xf32>
    %12 = vector.broadcast %11 : vector<1x8xf32> to vector<16x8xf32>
    %13 = arith.addf %10, %12 : vector<16x8xf32>
    %c0_11 = arith.constant 0 : index
    %c0_12 = arith.constant 0 : index
    %14 = vector.load %arg10[%c0_11, %c0_12] : memref<16x16xf32, #tpu.memory_space<vmem>>, vector<16x16xf32>
    %c0_13 = arith.constant 0 : index
    %c0_14 = arith.constant 0 : index
    %15 = vector.load %arg3[%c0_13, %c0_14] : memref<16x8xf32, #tpu.memory_space<vmem>>, vector<16x8xf32>
    %16 = vector.extract_strided_slice %14 {offsets = [0, 0], sizes = [8, 16], strides = [1, 1]} : vector<16x16xf32> to vector<8x16xf32>
    %cst_15 = arith.constant dense<0.000000e+00> : vector<16x16xf32>
    %17 = tpu.matmul %15, %16, %cst_15 {dimension_numbers = #tpu.dot_dimension_numbers<[1], [0], [0], [1], [0, 0, 1, 1], [], []>} : vector<16x8xf32>, vector<8x16xf32>, vector<16x16xf32> -> vector<16x16xf32>
    %c0_16 = arith.constant 0 : index
    %c0_17 = arith.constant 0 : index
    %18 = vector.load %arg4[%c0_16, %c0_17] : memref<16x8xf32, #tpu.memory_space<vmem>>, vector<16x8xf32>
    %19 = vector.extract_strided_slice %14 {offsets = [8, 0], sizes = [8, 16], strides = [1, 1]} : vector<16x16xf32> to vector<8x16xf32>
    %cst_18 = arith.constant dense<0.000000e+00> : vector<16x16xf32>
    %20 = tpu.matmul %18, %19, %cst_18 {dimension_numbers = #tpu.dot_dimension_numbers<[1], [0], [0], [1], [0, 0, 1, 1], [], []>} : vector<16x8xf32>, vector<8x16xf32>, vector<16x16xf32> -> vector<16x16xf32>
    %21 = arith.addf %17, %20 : vector<16x16xf32>
    %c0_19 = arith.constant 0 : index
    %c0_20 = arith.constant 0 : index
    %22 = vector.load %arg11[%c0_19, %c0_20] : memref<1x16xf32, #tpu.memory_space<vmem>>, vector<1x16xf32>
    %23 = vector.broadcast %22 : vector<1x16xf32> to vector<16x16xf32>
    %24 = arith.addf %21, %23 : vector<16x16xf32>
    %cst_21 = arith.constant 0.000000e+00 : f32
    %25 = vector.broadcast %cst_21 : f32 to vector<16x16xf32>
    %26 = arith.maximumf %24, %25 : vector<16x16xf32>
    %c0_22 = arith.constant 0 : index
    %c0_23 = arith.constant 0 : index
    %27 = vector.load %arg12[%c0_22, %c0_23] : memref<16x16xf32, #tpu.memory_space<vmem>>, vector<16x16xf32>
    %cst_24 = arith.constant dense<0.000000e+00> : vector<16x16xf32>
    %28 = tpu.matmul %26, %27, %cst_24 {dimension_numbers = #tpu.dot_dimension_numbers<[1], [0], [0], [1], [0, 0, 1, 1], [], []>} : vector<16x16xf32>, vector<16x16xf32>, vector<16x16xf32> -> vector<16x16xf32>
    %c0_25 = arith.constant 0 : index
    %c0_26 = arith.constant 0 : index
    %29 = vector.load %arg13[%c0_25, %c0_26] : memref<1x16xf32, #tpu.memory_space<vmem>>, vector<1x16xf32>
    %30 = vector.broadcast %29 : vector<1x16xf32> to vector<16x16xf32>
    %31 = arith.addf %28, %30 : vector<16x16xf32>
    %c0_27 = arith.constant 0 : index
    %c0_28 = arith.constant 0 : index
    %32 = vector.load %arg5[%c0_27, %c0_28] : memref<16x8xf32, #tpu.memory_space<vmem>>, vector<16x8xf32>
    %33 = tpu.concatenate %7, %13, %31, %32 in 1 : vector<16x8xf32>, vector<16x8xf32>, vector<16x16xf32>, vector<16x8xf32> -> vector<16x40xf32>
    %c0_29 = arith.constant 0 : index
    %c0_30 = arith.constant 0 : index
    %34 = vector.load %arg14[%c0_29, %c0_30] : memref<16x40xf32, #tpu.memory_space<vmem>>, vector<16x40xf32>
    tpu.vector_store %arg14[%c0_29, %c0_30], %33 {strides = array<i32>} : memref<16x40xf32, #tpu.memory_space<vmem>>, vector<16x40xf32>,
    return
  }
  func.func @transform_0(%arg0: i32) -> (i32, i32) {
    %c0_i32 = arith.constant 0 : i32
    %c0_i32_0 = arith.constant 0 : i32
    return %arg0, %c0_i32 : i32, i32
  }
  func.func @transform_1(%arg0: i32) -> (i32, i32) {
    %c0_i32 = arith.constant 0 : i32
    %c0_i32_0 = arith.constant 0 : i32
    return %arg0, %c0_i32 : i32, i32
  }
  func.func @transform_2(%arg0: i32) -> (i32, i32) {
    %c0_i32 = arith.constant 0 : i32
    %c0_i32_0 = arith.constant 0 : i32
    return %arg0, %c0_i32 : i32, i32
  }
  func.func @transform_3(%arg0: i32) -> (i32, i32) {
    %c0_i32 = arith.constant 0 : i32
    %c0_i32_0 = arith.constant 0 : i32
    return %arg0, %c0_i32 : i32, i32
  }
  func.func @transform_4(%arg0: i32) -> (i32, i32) {
    %c0_i32 = arith.constant 0 : i32
    %c0_i32_0 = arith.constant 0 : i32
    return %arg0, %c0_i32 : i32, i32
  }
  func.func @transform_5(%arg0: i32) -> (i32, i32) {
    %c0_i32 = arith.constant 0 : i32
    %c0_i32_0 = arith.constant 0 : i32
    %c0_i32_1 = arith.constant 0 : i32
    return %c0_i32, %c0_i32_0 : i32, i32
  }
  func.func @transform_6(%arg0: i32) -> (i32, i32) {
    %c0_i32 = arith.constant 0 : i32
    %c0_i32_0 = arith.constant 0 : i32
    %c0_i32_1 = arith.constant 0 : i32
    return %c0_i32, %c0_i32_0 : i32, i32
  }
  func.func @transform_7(%arg0: i32) -> (i32, i32) {
    %c0_i32 = arith.constant 0 : i32
    %c0_i32_0 = arith.constant 0 : i32
    %c0_i32_1 = arith.constant 0 : i32
    return %c0_i32, %c0_i32_0 : i32, i32
  }
  func.func @transform_8(%arg0: i32) -> (i32, i32) {
    %c0_i32 = arith.constant 0 : i32
    %c0_i32_0 = arith.constant 0 : i32
    %c0_i32_1 = arith.constant 0 : i32
    return %c0_i32, %c0_i32_0 : i32, i32
  }
  func.func @transform_9(%arg0: i32) -> (i32, i32) {
    %c0_i32 = arith.constant 0 : i32
    %c0_i32_0 = arith.constant 0 : i32
    %c0_i32_1 = arith.constant 0 : i32
    return %c0_i32, %c0_i32_0 : i32, i32
  }
  func.func @transform_10(%arg0: i32) -> (i32, i32) {
    %c0_i32 = arith.constant 0 : i32
    %c0_i32_0 = arith.constant 0 : i32
    %c0_i32_1 = arith.constant 0 : i32
    return %c0_i32, %c0_i32_0 : i32, i32
  }
  func.func @transform_11(%arg0: i32) -> (i32, i32) {
    %c0_i32 = arith.constant 0 : i32
    %c0_i32_0 = arith.constant 0 : i32
    %c0_i32_1 = arith.constant 0 : i32
    return %c0_i32, %c0_i32_0 : i32, i32
  }
  func.func @transform_12(%arg0: i32) -> (i32, i32) {
    %c0_i32 = arith.constant 0 : i32
    %c0_i32_0 = arith.constant 0 : i32
    %c0_i32_1 = arith.constant 0 : i32
    return %c0_i32, %c0_i32_0 : i32, i32
  }
  func.func @transform_13(%arg0: i32) -> (i32, i32) {
    %c0_i32 = arith.constant 0 : i32
    %c0_i32_0 = arith.constant 0 : i32
    return %arg0, %c0_i32 : i32, i32
  }
}

module attributes {stable_mosaic.version = 11 : i64} {
  func.func @_gru_stack_kernel(%arg0: i32, %arg1: memref<8x8x40xf32, #tpu.memory_space<vmem>>, %arg2: memref<40x96xf32, #tpu.memory_space<vmem>>, %arg3: memref<1x96xf32, #tpu.memory_space<vmem>>, %arg4: memref<32x96xf32, #tpu.memory_space<vmem>>, %arg5: memref<1x96xf32, #tpu.memory_space<vmem>>, %arg6: memref<32x96xf32, #tpu.memory_space<vmem>>, %arg7: memref<1x96xf32, #tpu.memory_space<vmem>>, %arg8: memref<32x96xf32, #tpu.memory_space<vmem>>, %arg9: memref<1x96xf32, #tpu.memory_space<vmem>>, %arg10: memref<8x8x32xf32, #tpu.memory_space<vmem>>, %arg11: memref<8x8x32xf32, #tpu.memory_space<vmem>>, %arg12: memref<64x96xf32, #tpu.memory_space<vmem>>) attributes {dimension_semantics = [#tpu.dimension_semantics<parallel>], iteration_bounds = array<i64: 1>, scalar_prefetch = 0 : i64, scratch_operands = 2 : i64, tpu.core_type = #tpu.core_type<tc>, window_params = [{transform_indices = @transform_0, window_bounds = array<i64: 8, 8, 40>}, {pipeline_mode = #tpu.pipeline_mode<synchronous>, transform_indices = @transform_1, window_bounds = array<i64: 40, 96>}, {pipeline_mode = #tpu.pipeline_mode<synchronous>, transform_indices = @transform_2, window_bounds = array<i64: 1, 96>}, {pipeline_mode = #tpu.pipeline_mode<synchronous>, transform_indices = @transform_3, window_bounds = array<i64: 32, 96>}, {pipeline_mode = #tpu.pipeline_mode<synchronous>, transform_indices = @transform_4, window_bounds = array<i64: 1, 96>}, {pipeline_mode = #tpu.pipeline_mode<synchronous>, transform_indices = @transform_5, window_bounds = array<i64: 32, 96>}, {pipeline_mode = #tpu.pipeline_mode<synchronous>, transform_indices = @transform_6, window_bounds = array<i64: 1, 96>}, {pipeline_mode = #tpu.pipeline_mode<synchronous>, transform_indices = @transform_7, window_bounds = array<i64: 32, 96>}, {pipeline_mode = #tpu.pipeline_mode<synchronous>, transform_indices = @transform_8, window_bounds = array<i64: 1, 96>}, {transform_indices = @transform_9, window_bounds = array<i64: 8, 8, 32>}]} {
    %c0 = arith.constant 0 : index
    %c0_0 = arith.constant 0 : index
    %c0_1 = arith.constant 0 : index
    %0 = vector.load %arg1[%c0, %c0_0, %c0_1] : memref<8x8x40xf32, #tpu.memory_space<vmem>>, vector<8x8x40xf32>
    %1 = vector.shape_cast %0 : vector<8x8x40xf32> to vector<64x40xf32>
    %c0_2 = arith.constant 0 : index
    %c0_3 = arith.constant 0 : index
    %2 = vector.load %arg2[%c0_2, %c0_3] : memref<40x96xf32, #tpu.memory_space<vmem>>, vector<40x96xf32>
    %cst = arith.constant dense<0.000000e+00> : vector<64x96xf32>
    %3 = tpu.matmul %1, %2, %cst {dimension_numbers = #tpu.dot_dimension_numbers<[1], [0], [0], [1], [0, 0, 1, 1], [], []>} : vector<64x40xf32>, vector<40x96xf32>, vector<64x96xf32> -> vector<64x96xf32>
    %c0_4 = arith.constant 0 : index
    %c0_5 = arith.constant 0 : index
    %4 = vector.load %arg3[%c0_4, %c0_5] : memref<1x96xf32, #tpu.memory_space<vmem>>, vector<1x96xf32>
    %5 = vector.broadcast %4 : vector<1x96xf32> to vector<64x96xf32>
    %6 = arith.addf %3, %5 : vector<64x96xf32>
    %c0_6 = arith.constant 0 : index
    %c0_7 = arith.constant 0 : index
    %7 = vector.load %arg12[%c0_6, %c0_7] : memref<64x96xf32, #tpu.memory_space<vmem>>, vector<64x96xf32>
    tpu.vector_store %arg12[%c0_6, %c0_7], %6 {strides = array<i32>} : memref<64x96xf32, #tpu.memory_space<vmem>>, vector<64x96xf32>,
    %c0_8 = arith.constant 0 : index
    %c0_9 = arith.constant 0 : index
    %8 = vector.load %arg4[%c0_8, %c0_9] : memref<32x96xf32, #tpu.memory_space<vmem>>, vector<32x96xf32>
    %c0_10 = arith.constant 0 : index
    %c0_11 = arith.constant 0 : index
    %9 = vector.load %arg5[%c0_10, %c0_11] : memref<1x96xf32, #tpu.memory_space<vmem>>, vector<1x96xf32>
    %cst_12 = arith.constant 0.000000e+00 : f32
    %10 = vector.broadcast %cst_12 : f32 to vector<8x32xf32>
    %c0_i32 = arith.constant 0 : i32
    %c8_i32 = arith.constant 8 : i32
    %11 = arith.muli %c0_i32, %c8_i32 : i32
    %12 = tpu.assume_multiple %11, 8 : i32
    %13 = arith.index_cast %12 : i32 to index
    %c0_13 = arith.constant 0 : index
    %14 = vector.load %arg12[%13, %c0_13] : memref<64x96xf32, #tpu.memory_space<vmem>>, vector<8x96xf32>
    %cst_14 = arith.constant dense<0.000000e+00> : vector<8x96xf32>
    %15 = tpu.matmul %10, %8, %cst_14 {dimension_numbers = #tpu.dot_dimension_numbers<[1], [0], [0], [1], [0, 0, 1, 1], [], []>} : vector<8x32xf32>, vector<32x96xf32>, vector<8x96xf32> -> vector<8x96xf32>
    %16 = vector.broadcast %9 : vector<1x96xf32> to vector<8x96xf32>
    %17 = arith.addf %15, %16 : vector<8x96xf32>
    %18 = vector.extract_strided_slice %14 {offsets = [0, 0], sizes = [8, 32], strides = [1, 1]} : vector<8x96xf32> to vector<8x32xf32>
    %19 = vector.extract_strided_slice %17 {offsets = [0, 0], sizes = [8, 32], strides = [1, 1]} : vector<8x96xf32> to vector<8x32xf32>
    %20 = arith.addf %18, %19 : vector<8x32xf32>
    %21 = arith.negf %20 : vector<8x32xf32>
    %22 = math.exp %21 : vector<8x32xf32>
    %cst_15 = arith.constant 1.000000e+00 : f32
    %23 = vector.broadcast %cst_15 : f32 to vector<8x32xf32>
    %24 = arith.addf %23, %22 : vector<8x32xf32>
    %25 = arith.divf %23, %24 : vector<8x32xf32>
    %26 = vector.extract_strided_slice %14 {offsets = [0, 32], sizes = [8, 32], strides = [1, 1]} : vector<8x96xf32> to vector<8x32xf32>
    %27 = vector.extract_strided_slice %17 {offsets = [0, 32], sizes = [8, 32], strides = [1, 1]} : vector<8x96xf32> to vector<8x32xf32>
    %28 = arith.addf %26, %27 : vector<8x32xf32>
    %29 = arith.negf %28 : vector<8x32xf32>
    %30 = math.exp %29 : vector<8x32xf32>
    %cst_16 = arith.constant 1.000000e+00 : f32
    %31 = vector.broadcast %cst_16 : f32 to vector<8x32xf32>
    %32 = arith.addf %31, %30 : vector<8x32xf32>
    %33 = arith.divf %31, %32 : vector<8x32xf32>
    %34 = vector.extract_strided_slice %14 {offsets = [0, 64], sizes = [8, 32], strides = [1, 1]} : vector<8x96xf32> to vector<8x32xf32>
    %35 = vector.extract_strided_slice %17 {offsets = [0, 64], sizes = [8, 32], strides = [1, 1]} : vector<8x96xf32> to vector<8x32xf32>
    %36 = arith.mulf %25, %35 : vector<8x32xf32>
    %37 = arith.addf %34, %36 : vector<8x32xf32>
    %38 = math.tanh %37 : vector<8x32xf32>
    %cst_17 = arith.constant 1.000000e+00 : f32
    %39 = vector.broadcast %cst_17 : f32 to vector<8x32xf32>
    %40 = arith.subf %39, %33 : vector<8x32xf32>
    %41 = arith.mulf %40, %38 : vector<8x32xf32>
    %42 = arith.mulf %33, %10 : vector<8x32xf32>
    %43 = arith.addf %41, %42 : vector<8x32xf32>
    %44 = arith.index_cast %c0_i32 : i32 to index
    %c0_18 = arith.constant 0 : index
    %c0_19 = arith.constant 0 : index
    %45 = vector.load %arg11[%44, %c0_18, %c0_19] : memref<8x8x32xf32, #tpu.memory_space<vmem>>, vector<1x8x32xf32>
    %46 = vector.shape_cast %45 : vector<1x8x32xf32> to vector<8x32xf32>
    %47 = vector.shape_cast %43 : vector<8x32xf32> to vector<1x8x32xf32>
    tpu.vector_store %arg11[%44, %c0_18, %c0_19], %47 {strides = array<i32>} : memref<8x8x32xf32, #tpu.memory_space<vmem>>, vector<1x8x32xf32>,
    %c1_i32 = arith.constant 1 : i32
    %c8_i32_20 = arith.constant 8 : i32
    %48 = arith.muli %c1_i32, %c8_i32_20 : i32
    %49 = tpu.assume_multiple %48, 8 : i32
    %50 = arith.index_cast %49 : i32 to index
    %c0_21 = arith.constant 0 : index
    %51 = vector.load %arg12[%50, %c0_21] : memref<64x96xf32, #tpu.memory_space<vmem>>, vector<8x96xf32>
    %cst_22 = arith.constant dense<0.000000e+00> : vector<8x96xf32>
    %52 = tpu.matmul %43, %8, %cst_22 {dimension_numbers = #tpu.dot_dimension_numbers<[1], [0], [0], [1], [0, 0, 1, 1], [], []>} : vector<8x32xf32>, vector<32x96xf32>, vector<8x96xf32> -> vector<8x96xf32>
    %53 = vector.broadcast %9 : vector<1x96xf32> to vector<8x96xf32>
    %54 = arith.addf %52, %53 : vector<8x96xf32>
    %55 = vector.extract_strided_slice %51 {offsets = [0, 0], sizes = [8, 32], strides = [1, 1]} : vector<8x96xf32> to vector<8x32xf32>
    %56 = vector.extract_strided_slice %54 {offsets = [0, 0], sizes = [8, 32], strides = [1, 1]} : vector<8x96xf32> to vector<8x32xf32>
    %57 = arith.addf %55, %56 : vector<8x32xf32>
    %58 = arith.negf %57 : vector<8x32xf32>
    %59 = math.exp %58 : vector<8x32xf32>
    %cst_23 = arith.constant 1.000000e+00 : f32
    %60 = vector.broadcast %cst_23 : f32 to vector<8x32xf32>
    %61 = arith.addf %60, %59 : vector<8x32xf32>
    %62 = arith.divf %60, %61 : vector<8x32xf32>
    %63 = vector.extract_strided_slice %51 {offsets = [0, 32], sizes = [8, 32], strides = [1, 1]} : vector<8x96xf32> to vector<8x32xf32>
    %64 = vector.extract_strided_slice %54 {offsets = [0, 32], sizes = [8, 32], strides = [1, 1]} : vector<8x96xf32> to vector<8x32xf32>
    %65 = arith.addf %63, %64 : vector<8x32xf32>
    %66 = arith.negf %65 : vector<8x32xf32>
    %67 = math.exp %66 : vector<8x32xf32>
    %cst_24 = arith.constant 1.000000e+00 : f32
    %68 = vector.broadcast %cst_24 : f32 to vector<8x32xf32>
    %69 = arith.addf %68, %67 : vector<8x32xf32>
    %70 = arith.divf %68, %69 : vector<8x32xf32>
    %71 = vector.extract_strided_slice %51 {offsets = [0, 64], sizes = [8, 32], strides = [1, 1]} : vector<8x96xf32> to vector<8x32xf32>
    %72 = vector.extract_strided_slice %54 {offsets = [0, 64], sizes = [8, 32], strides = [1, 1]} : vector<8x96xf32> to vector<8x32xf32>
    %73 = arith.mulf %62, %72 : vector<8x32xf32>
    %74 = arith.addf %71, %73 : vector<8x32xf32>
    %75 = math.tanh %74 : vector<8x32xf32>
    %cst_25 = arith.constant 1.000000e+00 : f32
    %76 = vector.broadcast %cst_25 : f32 to vector<8x32xf32>
    %77 = arith.subf %76, %70 : vector<8x32xf32>
    %78 = arith.mulf %77, %75 : vector<8x32xf32>
    %79 = arith.mulf %70, %43 : vector<8x32xf32>
    %80 = arith.addf %78, %79 : vector<8x32xf32>
    %81 = arith.index_cast %c1_i32 : i32 to index
    %c0_26 = arith.constant 0 : index
    %c0_27 = arith.constant 0 : index
    %82 = vector.load %arg11[%81, %c0_26, %c0_27] : memref<8x8x32xf32, #tpu.memory_space<vmem>>, vector<1x8x32xf32>
    %83 = vector.shape_cast %82 : vector<1x8x32xf32> to vector<8x32xf32>
    %84 = vector.shape_cast %80 : vector<8x32xf32> to vector<1x8x32xf32>
    tpu.vector_store %arg11[%81, %c0_26, %c0_27], %84 {strides = array<i32>} : memref<8x8x32xf32, #tpu.memory_space<vmem>>, vector<1x8x32xf32>,
    %c2_i32 = arith.constant 2 : i32
    %c8_i32_28 = arith.constant 8 : i32
    %85 = arith.muli %c2_i32, %c8_i32_28 : i32
    %86 = tpu.assume_multiple %85, 8 : i32
    %87 = arith.index_cast %86 : i32 to index
    %c0_29 = arith.constant 0 : index
    %88 = vector.load %arg12[%87, %c0_29] : memref<64x96xf32, #tpu.memory_space<vmem>>, vector<8x96xf32>
    %cst_30 = arith.constant dense<0.000000e+00> : vector<8x96xf32>
    %89 = tpu.matmul %80, %8, %cst_30 {dimension_numbers = #tpu.dot_dimension_numbers<[1], [0], [0], [1], [0, 0, 1, 1], [], []>} : vector<8x32xf32>, vector<32x96xf32>, vector<8x96xf32> -> vector<8x96xf32>
    %90 = vector.broadcast %9 : vector<1x96xf32> to vector<8x96xf32>
    %91 = arith.addf %89, %90 : vector<8x96xf32>
    %92 = vector.extract_strided_slice %88 {offsets = [0, 0], sizes = [8, 32], strides = [1, 1]} : vector<8x96xf32> to vector<8x32xf32>
    %93 = vector.extract_strided_slice %91 {offsets = [0, 0], sizes = [8, 32], strides = [1, 1]} : vector<8x96xf32> to vector<8x32xf32>
    %94 = arith.addf %92, %93 : vector<8x32xf32>
    %95 = arith.negf %94 : vector<8x32xf32>
    %96 = math.exp %95 : vector<8x32xf32>
    %cst_31 = arith.constant 1.000000e+00 : f32
    %97 = vector.broadcast %cst_31 : f32 to vector<8x32xf32>
    %98 = arith.addf %97, %96 : vector<8x32xf32>
    %99 = arith.divf %97, %98 : vector<8x32xf32>
    %100 = vector.extract_strided_slice %88 {offsets = [0, 32], sizes = [8, 32], strides = [1, 1]} : vector<8x96xf32> to vector<8x32xf32>
    %101 = vector.extract_strided_slice %91 {offsets = [0, 32], sizes = [8, 32], strides = [1, 1]} : vector<8x96xf32> to vector<8x32xf32>
    %102 = arith.addf %100, %101 : vector<8x32xf32>
    %103 = arith.negf %102 : vector<8x32xf32>
    %104 = math.exp %103 : vector<8x32xf32>
    %cst_32 = arith.constant 1.000000e+00 : f32
    %105 = vector.broadcast %cst_32 : f32 to vector<8x32xf32>
    %106 = arith.addf %105, %104 : vector<8x32xf32>
    %107 = arith.divf %105, %106 : vector<8x32xf32>
    %108 = vector.extract_strided_slice %88 {offsets = [0, 64], sizes = [8, 32], strides = [1, 1]} : vector<8x96xf32> to vector<8x32xf32>
    %109 = vector.extract_strided_slice %91 {offsets = [0, 64], sizes = [8, 32], strides = [1, 1]} : vector<8x96xf32> to vector<8x32xf32>
    %110 = arith.mulf %99, %109 : vector<8x32xf32>
    %111 = arith.addf %108, %110 : vector<8x32xf32>
    %112 = math.tanh %111 : vector<8x32xf32>
    %cst_33 = arith.constant 1.000000e+00 : f32
    %113 = vector.broadcast %cst_33 : f32 to vector<8x32xf32>
    %114 = arith.subf %113, %107 : vector<8x32xf32>
    %115 = arith.mulf %114, %112 : vector<8x32xf32>
    %116 = arith.mulf %107, %80 : vector<8x32xf32>
    %117 = arith.addf %115, %116 : vector<8x32xf32>
    %118 = arith.index_cast %c2_i32 : i32 to index
    %c0_34 = arith.constant 0 : index
    %c0_35 = arith.constant 0 : index
    %119 = vector.load %arg11[%118, %c0_34, %c0_35] : memref<8x8x32xf32, #tpu.memory_space<vmem>>, vector<1x8x32xf32>
    %120 = vector.shape_cast %119 : vector<1x8x32xf32> to vector<8x32xf32>
    %121 = vector.shape_cast %117 : vector<8x32xf32> to vector<1x8x32xf32>
    tpu.vector_store %arg11[%118, %c0_34, %c0_35], %121 {strides = array<i32>} : memref<8x8x32xf32, #tpu.memory_space<vmem>>, vector<1x8x32xf32>,
    %c3_i32 = arith.constant 3 : i32
    %c8_i32_36 = arith.constant 8 : i32
    %122 = arith.muli %c3_i32, %c8_i32_36 : i32
    %123 = tpu.assume_multiple %122, 8 : i32
    %124 = arith.index_cast %123 : i32 to index
    %c0_37 = arith.constant 0 : index
    %125 = vector.load %arg12[%124, %c0_37] : memref<64x96xf32, #tpu.memory_space<vmem>>, vector<8x96xf32>
    %cst_38 = arith.constant dense<0.000000e+00> : vector<8x96xf32>
    %126 = tpu.matmul %117, %8, %cst_38 {dimension_numbers = #tpu.dot_dimension_numbers<[1], [0], [0], [1], [0, 0, 1, 1], [], []>} : vector<8x32xf32>, vector<32x96xf32>, vector<8x96xf32> -> vector<8x96xf32>
    %127 = vector.broadcast %9 : vector<1x96xf32> to vector<8x96xf32>
    %128 = arith.addf %126, %127 : vector<8x96xf32>
    %129 = vector.extract_strided_slice %125 {offsets = [0, 0], sizes = [8, 32], strides = [1, 1]} : vector<8x96xf32> to vector<8x32xf32>
    %130 = vector.extract_strided_slice %128 {offsets = [0, 0], sizes = [8, 32], strides = [1, 1]} : vector<8x96xf32> to vector<8x32xf32>
    %131 = arith.addf %129, %130 : vector<8x32xf32>
    %132 = arith.negf %131 : vector<8x32xf32>
    %133 = math.exp %132 : vector<8x32xf32>
    %cst_39 = arith.constant 1.000000e+00 : f32
    %134 = vector.broadcast %cst_39 : f32 to vector<8x32xf32>
    %135 = arith.addf %134, %133 : vector<8x32xf32>
    %136 = arith.divf %134, %135 : vector<8x32xf32>
    %137 = vector.extract_strided_slice %125 {offsets = [0, 32], sizes = [8, 32], strides = [1, 1]} : vector<8x96xf32> to vector<8x32xf32>
    %138 = vector.extract_strided_slice %128 {offsets = [0, 32], sizes = [8, 32], strides = [1, 1]} : vector<8x96xf32> to vector<8x32xf32>
    %139 = arith.addf %137, %138 : vector<8x32xf32>
    %140 = arith.negf %139 : vector<8x32xf32>
    %141 = math.exp %140 : vector<8x32xf32>
    %cst_40 = arith.constant 1.000000e+00 : f32
    %142 = vector.broadcast %cst_40 : f32 to vector<8x32xf32>
    %143 = arith.addf %142, %141 : vector<8x32xf32>
    %144 = arith.divf %142, %143 : vector<8x32xf32>
    %145 = vector.extract_strided_slice %125 {offsets = [0, 64], sizes = [8, 32], strides = [1, 1]} : vector<8x96xf32> to vector<8x32xf32>
    %146 = vector.extract_strided_slice %128 {offsets = [0, 64], sizes = [8, 32], strides = [1, 1]} : vector<8x96xf32> to vector<8x32xf32>
    %147 = arith.mulf %136, %146 : vector<8x32xf32>
    %148 = arith.addf %145, %147 : vector<8x32xf32>
    %149 = math.tanh %148 : vector<8x32xf32>
    %cst_41 = arith.constant 1.000000e+00 : f32
    %150 = vector.broadcast %cst_41 : f32 to vector<8x32xf32>
    %151 = arith.subf %150, %144 : vector<8x32xf32>
    %152 = arith.mulf %151, %149 : vector<8x32xf32>
    %153 = arith.mulf %144, %117 : vector<8x32xf32>
    %154 = arith.addf %152, %153 : vector<8x32xf32>
    %155 = arith.index_cast %c3_i32 : i32 to index
    %c0_42 = arith.constant 0 : index
    %c0_43 = arith.constant 0 : index
    %156 = vector.load %arg11[%155, %c0_42, %c0_43] : memref<8x8x32xf32, #tpu.memory_space<vmem>>, vector<1x8x32xf32>
    %157 = vector.shape_cast %156 : vector<1x8x32xf32> to vector<8x32xf32>
    %158 = vector.shape_cast %154 : vector<8x32xf32> to vector<1x8x32xf32>
    tpu.vector_store %arg11[%155, %c0_42, %c0_43], %158 {strides = array<i32>} : memref<8x8x32xf32, #tpu.memory_space<vmem>>, vector<1x8x32xf32>,
    %c4_i32 = arith.constant 4 : i32
    %c8_i32_44 = arith.constant 8 : i32
    %159 = arith.muli %c4_i32, %c8_i32_44 : i32
    %160 = tpu.assume_multiple %159, 8 : i32
    %161 = arith.index_cast %160 : i32 to index
    %c0_45 = arith.constant 0 : index
    %162 = vector.load %arg12[%161, %c0_45] : memref<64x96xf32, #tpu.memory_space<vmem>>, vector<8x96xf32>
    %cst_46 = arith.constant dense<0.000000e+00> : vector<8x96xf32>
    %163 = tpu.matmul %154, %8, %cst_46 {dimension_numbers = #tpu.dot_dimension_numbers<[1], [0], [0], [1], [0, 0, 1, 1], [], []>} : vector<8x32xf32>, vector<32x96xf32>, vector<8x96xf32> -> vector<8x96xf32>
    %164 = vector.broadcast %9 : vector<1x96xf32> to vector<8x96xf32>
    %165 = arith.addf %163, %164 : vector<8x96xf32>
    %166 = vector.extract_strided_slice %162 {offsets = [0, 0], sizes = [8, 32], strides = [1, 1]} : vector<8x96xf32> to vector<8x32xf32>
    %167 = vector.extract_strided_slice %165 {offsets = [0, 0], sizes = [8, 32], strides = [1, 1]} : vector<8x96xf32> to vector<8x32xf32>
    %168 = arith.addf %166, %167 : vector<8x32xf32>
    %169 = arith.negf %168 : vector<8x32xf32>
    %170 = math.exp %169 : vector<8x32xf32>
    %cst_47 = arith.constant 1.000000e+00 : f32
    %171 = vector.broadcast %cst_47 : f32 to vector<8x32xf32>
    %172 = arith.addf %171, %170 : vector<8x32xf32>
    %173 = arith.divf %171, %172 : vector<8x32xf32>
    %174 = vector.extract_strided_slice %162 {offsets = [0, 32], sizes = [8, 32], strides = [1, 1]} : vector<8x96xf32> to vector<8x32xf32>
    %175 = vector.extract_strided_slice %165 {offsets = [0, 32], sizes = [8, 32], strides = [1, 1]} : vector<8x96xf32> to vector<8x32xf32>
    %176 = arith.addf %174, %175 : vector<8x32xf32>
    %177 = arith.negf %176 : vector<8x32xf32>
    %178 = math.exp %177 : vector<8x32xf32>
    %cst_48 = arith.constant 1.000000e+00 : f32
    %179 = vector.broadcast %cst_48 : f32 to vector<8x32xf32>
    %180 = arith.addf %179, %178 : vector<8x32xf32>
    %181 = arith.divf %179, %180 : vector<8x32xf32>
    %182 = vector.extract_strided_slice %162 {offsets = [0, 64], sizes = [8, 32], strides = [1, 1]} : vector<8x96xf32> to vector<8x32xf32>
    %183 = vector.extract_strided_slice %165 {offsets = [0, 64], sizes = [8, 32], strides = [1, 1]} : vector<8x96xf32> to vector<8x32xf32>
    %184 = arith.mulf %173, %183 : vector<8x32xf32>
    %185 = arith.addf %182, %184 : vector<8x32xf32>
    %186 = math.tanh %185 : vector<8x32xf32>
    %cst_49 = arith.constant 1.000000e+00 : f32
    %187 = vector.broadcast %cst_49 : f32 to vector<8x32xf32>
    %188 = arith.subf %187, %181 : vector<8x32xf32>
    %189 = arith.mulf %188, %186 : vector<8x32xf32>
    %190 = arith.mulf %181, %154 : vector<8x32xf32>
    %191 = arith.addf %189, %190 : vector<8x32xf32>
    %192 = arith.index_cast %c4_i32 : i32 to index
    %c0_50 = arith.constant 0 : index
    %c0_51 = arith.constant 0 : index
    %193 = vector.load %arg11[%192, %c0_50, %c0_51] : memref<8x8x32xf32, #tpu.memory_space<vmem>>, vector<1x8x32xf32>
    %194 = vector.shape_cast %193 : vector<1x8x32xf32> to vector<8x32xf32>
    %195 = vector.shape_cast %191 : vector<8x32xf32> to vector<1x8x32xf32>
    tpu.vector_store %arg11[%192, %c0_50, %c0_51], %195 {strides = array<i32>} : memref<8x8x32xf32, #tpu.memory_space<vmem>>, vector<1x8x32xf32>,
    %c5_i32 = arith.constant 5 : i32
    %c8_i32_52 = arith.constant 8 : i32
    %196 = arith.muli %c5_i32, %c8_i32_52 : i32
    %197 = tpu.assume_multiple %196, 8 : i32
    %198 = arith.index_cast %197 : i32 to index
    %c0_53 = arith.constant 0 : index
    %199 = vector.load %arg12[%198, %c0_53] : memref<64x96xf32, #tpu.memory_space<vmem>>, vector<8x96xf32>
    %cst_54 = arith.constant dense<0.000000e+00> : vector<8x96xf32>
    %200 = tpu.matmul %191, %8, %cst_54 {dimension_numbers = #tpu.dot_dimension_numbers<[1], [0], [0], [1], [0, 0, 1, 1], [], []>} : vector<8x32xf32>, vector<32x96xf32>, vector<8x96xf32> -> vector<8x96xf32>
    %201 = vector.broadcast %9 : vector<1x96xf32> to vector<8x96xf32>
    %202 = arith.addf %200, %201 : vector<8x96xf32>
    %203 = vector.extract_strided_slice %199 {offsets = [0, 0], sizes = [8, 32], strides = [1, 1]} : vector<8x96xf32> to vector<8x32xf32>
    %204 = vector.extract_strided_slice %202 {offsets = [0, 0], sizes = [8, 32], strides = [1, 1]} : vector<8x96xf32> to vector<8x32xf32>
    %205 = arith.addf %203, %204 : vector<8x32xf32>
    %206 = arith.negf %205 : vector<8x32xf32>
    %207 = math.exp %206 : vector<8x32xf32>
    %cst_55 = arith.constant 1.000000e+00 : f32
    %208 = vector.broadcast %cst_55 : f32 to vector<8x32xf32>
    %209 = arith.addf %208, %207 : vector<8x32xf32>
    %210 = arith.divf %208, %209 : vector<8x32xf32>
    %211 = vector.extract_strided_slice %199 {offsets = [0, 32], sizes = [8, 32], strides = [1, 1]} : vector<8x96xf32> to vector<8x32xf32>
    %212 = vector.extract_strided_slice %202 {offsets = [0, 32], sizes = [8, 32], strides = [1, 1]} : vector<8x96xf32> to vector<8x32xf32>
    %213 = arith.addf %211, %212 : vector<8x32xf32>
    %214 = arith.negf %213 : vector<8x32xf32>
    %215 = math.exp %214 : vector<8x32xf32>
    %cst_56 = arith.constant 1.000000e+00 : f32
    %216 = vector.broadcast %cst_56 : f32 to vector<8x32xf32>
    %217 = arith.addf %216, %215 : vector<8x32xf32>
    %218 = arith.divf %216, %217 : vector<8x32xf32>
    %219 = vector.extract_strided_slice %199 {offsets = [0, 64], sizes = [8, 32], strides = [1, 1]} : vector<8x96xf32> to vector<8x32xf32>
    %220 = vector.extract_strided_slice %202 {offsets = [0, 64], sizes = [8, 32], strides = [1, 1]} : vector<8x96xf32> to vector<8x32xf32>
    %221 = arith.mulf %210, %220 : vector<8x32xf32>
    %222 = arith.addf %219, %221 : vector<8x32xf32>
    %223 = math.tanh %222 : vector<8x32xf32>
    %cst_57 = arith.constant 1.000000e+00 : f32
    %224 = vector.broadcast %cst_57 : f32 to vector<8x32xf32>
    %225 = arith.subf %224, %218 : vector<8x32xf32>
    %226 = arith.mulf %225, %223 : vector<8x32xf32>
    %227 = arith.mulf %218, %191 : vector<8x32xf32>
    %228 = arith.addf %226, %227 : vector<8x32xf32>
    %229 = arith.index_cast %c5_i32 : i32 to index
    %c0_58 = arith.constant 0 : index
    %c0_59 = arith.constant 0 : index
    %230 = vector.load %arg11[%229, %c0_58, %c0_59] : memref<8x8x32xf32, #tpu.memory_space<vmem>>, vector<1x8x32xf32>
    %231 = vector.shape_cast %230 : vector<1x8x32xf32> to vector<8x32xf32>
    %232 = vector.shape_cast %228 : vector<8x32xf32> to vector<1x8x32xf32>
    tpu.vector_store %arg11[%229, %c0_58, %c0_59], %232 {strides = array<i32>} : memref<8x8x32xf32, #tpu.memory_space<vmem>>, vector<1x8x32xf32>,
    %c6_i32 = arith.constant 6 : i32
    %c8_i32_60 = arith.constant 8 : i32
    %233 = arith.muli %c6_i32, %c8_i32_60 : i32
    %234 = tpu.assume_multiple %233, 8 : i32
    %235 = arith.index_cast %234 : i32 to index
    %c0_61 = arith.constant 0 : index
    %236 = vector.load %arg12[%235, %c0_61] : memref<64x96xf32, #tpu.memory_space<vmem>>, vector<8x96xf32>
    %cst_62 = arith.constant dense<0.000000e+00> : vector<8x96xf32>
    %237 = tpu.matmul %228, %8, %cst_62 {dimension_numbers = #tpu.dot_dimension_numbers<[1], [0], [0], [1], [0, 0, 1, 1], [], []>} : vector<8x32xf32>, vector<32x96xf32>, vector<8x96xf32> -> vector<8x96xf32>
    %238 = vector.broadcast %9 : vector<1x96xf32> to vector<8x96xf32>
    %239 = arith.addf %237, %238 : vector<8x96xf32>
    %240 = vector.extract_strided_slice %236 {offsets = [0, 0], sizes = [8, 32], strides = [1, 1]} : vector<8x96xf32> to vector<8x32xf32>
    %241 = vector.extract_strided_slice %239 {offsets = [0, 0], sizes = [8, 32], strides = [1, 1]} : vector<8x96xf32> to vector<8x32xf32>
    %242 = arith.addf %240, %241 : vector<8x32xf32>
    %243 = arith.negf %242 : vector<8x32xf32>
    %244 = math.exp %243 : vector<8x32xf32>
    %cst_63 = arith.constant 1.000000e+00 : f32
    %245 = vector.broadcast %cst_63 : f32 to vector<8x32xf32>
    %246 = arith.addf %245, %244 : vector<8x32xf32>
    %247 = arith.divf %245, %246 : vector<8x32xf32>
    %248 = vector.extract_strided_slice %236 {offsets = [0, 32], sizes = [8, 32], strides = [1, 1]} : vector<8x96xf32> to vector<8x32xf32>
    %249 = vector.extract_strided_slice %239 {offsets = [0, 32], sizes = [8, 32], strides = [1, 1]} : vector<8x96xf32> to vector<8x32xf32>
    %250 = arith.addf %248, %249 : vector<8x32xf32>
    %251 = arith.negf %250 : vector<8x32xf32>
    %252 = math.exp %251 : vector<8x32xf32>
    %cst_64 = arith.constant 1.000000e+00 : f32
    %253 = vector.broadcast %cst_64 : f32 to vector<8x32xf32>
    %254 = arith.addf %253, %252 : vector<8x32xf32>
    %255 = arith.divf %253, %254 : vector<8x32xf32>
    %256 = vector.extract_strided_slice %236 {offsets = [0, 64], sizes = [8, 32], strides = [1, 1]} : vector<8x96xf32> to vector<8x32xf32>
    %257 = vector.extract_strided_slice %239 {offsets = [0, 64], sizes = [8, 32], strides = [1, 1]} : vector<8x96xf32> to vector<8x32xf32>
    %258 = arith.mulf %247, %257 : vector<8x32xf32>
    %259 = arith.addf %256, %258 : vector<8x32xf32>
    %260 = math.tanh %259 : vector<8x32xf32>
    %cst_65 = arith.constant 1.000000e+00 : f32
    %261 = vector.broadcast %cst_65 : f32 to vector<8x32xf32>
    %262 = arith.subf %261, %255 : vector<8x32xf32>
    %263 = arith.mulf %262, %260 : vector<8x32xf32>
    %264 = arith.mulf %255, %228 : vector<8x32xf32>
    %265 = arith.addf %263, %264 : vector<8x32xf32>
    %266 = arith.index_cast %c6_i32 : i32 to index
    %c0_66 = arith.constant 0 : index
    %c0_67 = arith.constant 0 : index
    %267 = vector.load %arg11[%266, %c0_66, %c0_67] : memref<8x8x32xf32, #tpu.memory_space<vmem>>, vector<1x8x32xf32>
    %268 = vector.shape_cast %267 : vector<1x8x32xf32> to vector<8x32xf32>
    %269 = vector.shape_cast %265 : vector<8x32xf32> to vector<1x8x32xf32>
    tpu.vector_store %arg11[%266, %c0_66, %c0_67], %269 {strides = array<i32>} : memref<8x8x32xf32, #tpu.memory_space<vmem>>, vector<1x8x32xf32>,
    %c7_i32 = arith.constant 7 : i32
    %c8_i32_68 = arith.constant 8 : i32
    %270 = arith.muli %c7_i32, %c8_i32_68 : i32
    %271 = tpu.assume_multiple %270, 8 : i32
    %272 = arith.index_cast %271 : i32 to index
    %c0_69 = arith.constant 0 : index
    %273 = vector.load %arg12[%272, %c0_69] : memref<64x96xf32, #tpu.memory_space<vmem>>, vector<8x96xf32>
    %cst_70 = arith.constant dense<0.000000e+00> : vector<8x96xf32>
    %274 = tpu.matmul %265, %8, %cst_70 {dimension_numbers = #tpu.dot_dimension_numbers<[1], [0], [0], [1], [0, 0, 1, 1], [], []>} : vector<8x32xf32>, vector<32x96xf32>, vector<8x96xf32> -> vector<8x96xf32>
    %275 = vector.broadcast %9 : vector<1x96xf32> to vector<8x96xf32>
    %276 = arith.addf %274, %275 : vector<8x96xf32>
    %277 = vector.extract_strided_slice %273 {offsets = [0, 0], sizes = [8, 32], strides = [1, 1]} : vector<8x96xf32> to vector<8x32xf32>
    %278 = vector.extract_strided_slice %276 {offsets = [0, 0], sizes = [8, 32], strides = [1, 1]} : vector<8x96xf32> to vector<8x32xf32>
    %279 = arith.addf %277, %278 : vector<8x32xf32>
    %280 = arith.negf %279 : vector<8x32xf32>
    %281 = math.exp %280 : vector<8x32xf32>
    %cst_71 = arith.constant 1.000000e+00 : f32
    %282 = vector.broadcast %cst_71 : f32 to vector<8x32xf32>
    %283 = arith.addf %282, %281 : vector<8x32xf32>
    %284 = arith.divf %282, %283 : vector<8x32xf32>
    %285 = vector.extract_strided_slice %273 {offsets = [0, 32], sizes = [8, 32], strides = [1, 1]} : vector<8x96xf32> to vector<8x32xf32>
    %286 = vector.extract_strided_slice %276 {offsets = [0, 32], sizes = [8, 32], strides = [1, 1]} : vector<8x96xf32> to vector<8x32xf32>
    %287 = arith.addf %285, %286 : vector<8x32xf32>
    %288 = arith.negf %287 : vector<8x32xf32>
    %289 = math.exp %288 : vector<8x32xf32>
    %cst_72 = arith.constant 1.000000e+00 : f32
    %290 = vector.broadcast %cst_72 : f32 to vector<8x32xf32>
    %291 = arith.addf %290, %289 : vector<8x32xf32>
    %292 = arith.divf %290, %291 : vector<8x32xf32>
    %293 = vector.extract_strided_slice %273 {offsets = [0, 64], sizes = [8, 32], strides = [1, 1]} : vector<8x96xf32> to vector<8x32xf32>
    %294 = vector.extract_strided_slice %276 {offsets = [0, 64], sizes = [8, 32], strides = [1, 1]} : vector<8x96xf32> to vector<8x32xf32>
    %295 = arith.mulf %284, %294 : vector<8x32xf32>
    %296 = arith.addf %293, %295 : vector<8x32xf32>
    %297 = math.tanh %296 : vector<8x32xf32>
    %cst_73 = arith.constant 1.000000e+00 : f32
    %298 = vector.broadcast %cst_73 : f32 to vector<8x32xf32>
    %299 = arith.subf %298, %292 : vector<8x32xf32>
    %300 = arith.mulf %299, %297 : vector<8x32xf32>
    %301 = arith.mulf %292, %265 : vector<8x32xf32>
    %302 = arith.addf %300, %301 : vector<8x32xf32>
    %303 = arith.index_cast %c7_i32 : i32 to index
    %c0_74 = arith.constant 0 : index
    %c0_75 = arith.constant 0 : index
    %304 = vector.load %arg11[%303, %c0_74, %c0_75] : memref<8x8x32xf32, #tpu.memory_space<vmem>>, vector<1x8x32xf32>
    %305 = vector.shape_cast %304 : vector<1x8x32xf32> to vector<8x32xf32>
    %306 = vector.shape_cast %302 : vector<8x32xf32> to vector<1x8x32xf32>
    tpu.vector_store %arg11[%303, %c0_74, %c0_75], %306 {strides = array<i32>} : memref<8x8x32xf32, #tpu.memory_space<vmem>>, vector<1x8x32xf32>,
    %c8_i32_76 = arith.constant 8 : i32
    %c0_77 = arith.constant 0 : index
    %c0_78 = arith.constant 0 : index
    %c0_79 = arith.constant 0 : index
    %307 = vector.load %arg11[%c0_77, %c0_78, %c0_79] : memref<8x8x32xf32, #tpu.memory_space<vmem>>, vector<8x8x32xf32>
    %308 = vector.shape_cast %307 : vector<8x8x32xf32> to vector<64x32xf32>
    %c0_80 = arith.constant 0 : index
    %c0_81 = arith.constant 0 : index
    %309 = vector.load %arg6[%c0_80, %c0_81] : memref<32x96xf32, #tpu.memory_space<vmem>>, vector<32x96xf32>
    %cst_82 = arith.constant dense<0.000000e+00> : vector<64x96xf32>
    %310 = tpu.matmul %308, %309, %cst_82 {dimension_numbers = #tpu.dot_dimension_numbers<[1], [0], [0], [1], [0, 0, 1, 1], [], []>} : vector<64x32xf32>, vector<32x96xf32>, vector<64x96xf32> -> vector<64x96xf32>
    %c0_83 = arith.constant 0 : index
    %c0_84 = arith.constant 0 : index
    %311 = vector.load %arg7[%c0_83, %c0_84] : memref<1x96xf32, #tpu.memory_space<vmem>>, vector<1x96xf32>
    %312 = vector.broadcast %311 : vector<1x96xf32> to vector<64x96xf32>
    %313 = arith.addf %310, %312 : vector<64x96xf32>
    %c0_85 = arith.constant 0 : index
    %c0_86 = arith.constant 0 : index
    %314 = vector.load %arg12[%c0_85, %c0_86] : memref<64x96xf32, #tpu.memory_space<vmem>>, vector<64x96xf32>
    tpu.vector_store %arg12[%c0_85, %c0_86], %313 {strides = array<i32>} : memref<64x96xf32, #tpu.memory_space<vmem>>, vector<64x96xf32>,
    %c0_87 = arith.constant 0 : index
    %c0_88 = arith.constant 0 : index
    %315 = vector.load %arg8[%c0_87, %c0_88] : memref<32x96xf32, #tpu.memory_space<vmem>>, vector<32x96xf32>
    %c0_89 = arith.constant 0 : index
    %c0_90 = arith.constant 0 : index
    %316 = vector.load %arg9[%c0_89, %c0_90] : memref<1x96xf32, #tpu.memory_space<vmem>>, vector<1x96xf32>
    %cst_91 = arith.constant 0.000000e+00 : f32
    %317 = vector.broadcast %cst_91 : f32 to vector<8x32xf32>
    %c0_i32_92 = arith.constant 0 : i32
    %c8_i32_93 = arith.constant 8 : i32
    %318 = arith.muli %c0_i32_92, %c8_i32_93 : i32
    %319 = tpu.assume_multiple %318, 8 : i32
    %320 = arith.index_cast %319 : i32 to index
    %c0_94 = arith.constant 0 : index
    %321 = vector.load %arg12[%320, %c0_94] : memref<64x96xf32, #tpu.memory_space<vmem>>, vector<8x96xf32>
    %cst_95 = arith.constant dense<0.000000e+00> : vector<8x96xf32>
    %322 = tpu.matmul %317, %315, %cst_95 {dimension_numbers = #tpu.dot_dimension_numbers<[1], [0], [0], [1], [0, 0, 1, 1], [], []>} : vector<8x32xf32>, vector<32x96xf32>, vector<8x96xf32> -> vector<8x96xf32>
    %323 = vector.broadcast %316 : vector<1x96xf32> to vector<8x96xf32>
    %324 = arith.addf %322, %323 : vector<8x96xf32>
    %325 = vector.extract_strided_slice %321 {offsets = [0, 0], sizes = [8, 32], strides = [1, 1]} : vector<8x96xf32> to vector<8x32xf32>
    %326 = vector.extract_strided_slice %324 {offsets = [0, 0], sizes = [8, 32], strides = [1, 1]} : vector<8x96xf32> to vector<8x32xf32>
    %327 = arith.addf %325, %326 : vector<8x32xf32>
    %328 = arith.negf %327 : vector<8x32xf32>
    %329 = math.exp %328 : vector<8x32xf32>
    %cst_96 = arith.constant 1.000000e+00 : f32
    %330 = vector.broadcast %cst_96 : f32 to vector<8x32xf32>
    %331 = arith.addf %330, %329 : vector<8x32xf32>
    %332 = arith.divf %330, %331 : vector<8x32xf32>
    %333 = vector.extract_strided_slice %321 {offsets = [0, 32], sizes = [8, 32], strides = [1, 1]} : vector<8x96xf32> to vector<8x32xf32>
    %334 = vector.extract_strided_slice %324 {offsets = [0, 32], sizes = [8, 32], strides = [1, 1]} : vector<8x96xf32> to vector<8x32xf32>
    %335 = arith.addf %333, %334 : vector<8x32xf32>
    %336 = arith.negf %335 : vector<8x32xf32>
    %337 = math.exp %336 : vector<8x32xf32>
    %cst_97 = arith.constant 1.000000e+00 : f32
    %338 = vector.broadcast %cst_97 : f32 to vector<8x32xf32>
    %339 = arith.addf %338, %337 : vector<8x32xf32>
    %340 = arith.divf %338, %339 : vector<8x32xf32>
    %341 = vector.extract_strided_slice %321 {offsets = [0, 64], sizes = [8, 32], strides = [1, 1]} : vector<8x96xf32> to vector<8x32xf32>
    %342 = vector.extract_strided_slice %324 {offsets = [0, 64], sizes = [8, 32], strides = [1, 1]} : vector<8x96xf32> to vector<8x32xf32>
    %343 = arith.mulf %332, %342 : vector<8x32xf32>
    %344 = arith.addf %341, %343 : vector<8x32xf32>
    %345 = math.tanh %344 : vector<8x32xf32>
    %cst_98 = arith.constant 1.000000e+00 : f32
    %346 = vector.broadcast %cst_98 : f32 to vector<8x32xf32>
    %347 = arith.subf %346, %340 : vector<8x32xf32>
    %348 = arith.mulf %347, %345 : vector<8x32xf32>
    %349 = arith.mulf %340, %317 : vector<8x32xf32>
    %350 = arith.addf %348, %349 : vector<8x32xf32>
    %351 = arith.index_cast %c0_i32_92 : i32 to index
    %c0_99 = arith.constant 0 : index
    %c0_100 = arith.constant 0 : index
    %352 = vector.load %arg10[%351, %c0_99, %c0_100] : memref<8x8x32xf32, #tpu.memory_space<vmem>>, vector<1x8x32xf32>
    %353 = vector.shape_cast %352 : vector<1x8x32xf32> to vector<8x32xf32>
    %354 = vector.shape_cast %350 : vector<8x32xf32> to vector<1x8x32xf32>
    tpu.vector_store %arg10[%351, %c0_99, %c0_100], %354 {strides = array<i32>} : memref<8x8x32xf32, #tpu.memory_space<vmem>>, vector<1x8x32xf32>,
    %c1_i32_101 = arith.constant 1 : i32
    %c8_i32_102 = arith.constant 8 : i32
    %355 = arith.muli %c1_i32_101, %c8_i32_102 : i32
    %356 = tpu.assume_multiple %355, 8 : i32
    %357 = arith.index_cast %356 : i32 to index
    %c0_103 = arith.constant 0 : index
    %358 = vector.load %arg12[%357, %c0_103] : memref<64x96xf32, #tpu.memory_space<vmem>>, vector<8x96xf32>
    %cst_104 = arith.constant dense<0.000000e+00> : vector<8x96xf32>
    %359 = tpu.matmul %350, %315, %cst_104 {dimension_numbers = #tpu.dot_dimension_numbers<[1], [0], [0], [1], [0, 0, 1, 1], [], []>} : vector<8x32xf32>, vector<32x96xf32>, vector<8x96xf32> -> vector<8x96xf32>
    %360 = vector.broadcast %316 : vector<1x96xf32> to vector<8x96xf32>
    %361 = arith.addf %359, %360 : vector<8x96xf32>
    %362 = vector.extract_strided_slice %358 {offsets = [0, 0], sizes = [8, 32], strides = [1, 1]} : vector<8x96xf32> to vector<8x32xf32>
    %363 = vector.extract_strided_slice %361 {offsets = [0, 0], sizes = [8, 32], strides = [1, 1]} : vector<8x96xf32> to vector<8x32xf32>
    %364 = arith.addf %362, %363 : vector<8x32xf32>
    %365 = arith.negf %364 : vector<8x32xf32>
    %366 = math.exp %365 : vector<8x32xf32>
    %cst_105 = arith.constant 1.000000e+00 : f32
    %367 = vector.broadcast %cst_105 : f32 to vector<8x32xf32>
    %368 = arith.addf %367, %366 : vector<8x32xf32>
    %369 = arith.divf %367, %368 : vector<8x32xf32>
    %370 = vector.extract_strided_slice %358 {offsets = [0, 32], sizes = [8, 32], strides = [1, 1]} : vector<8x96xf32> to vector<8x32xf32>
    %371 = vector.extract_strided_slice %361 {offsets = [0, 32], sizes = [8, 32], strides = [1, 1]} : vector<8x96xf32> to vector<8x32xf32>
    %372 = arith.addf %370, %371 : vector<8x32xf32>
    %373 = arith.negf %372 : vector<8x32xf32>
    %374 = math.exp %373 : vector<8x32xf32>
    %cst_106 = arith.constant 1.000000e+00 : f32
    %375 = vector.broadcast %cst_106 : f32 to vector<8x32xf32>
    %376 = arith.addf %375, %374 : vector<8x32xf32>
    %377 = arith.divf %375, %376 : vector<8x32xf32>
    %378 = vector.extract_strided_slice %358 {offsets = [0, 64], sizes = [8, 32], strides = [1, 1]} : vector<8x96xf32> to vector<8x32xf32>
    %379 = vector.extract_strided_slice %361 {offsets = [0, 64], sizes = [8, 32], strides = [1, 1]} : vector<8x96xf32> to vector<8x32xf32>
    %380 = arith.mulf %369, %379 : vector<8x32xf32>
    %381 = arith.addf %378, %380 : vector<8x32xf32>
    %382 = math.tanh %381 : vector<8x32xf32>
    %cst_107 = arith.constant 1.000000e+00 : f32
    %383 = vector.broadcast %cst_107 : f32 to vector<8x32xf32>
    %384 = arith.subf %383, %377 : vector<8x32xf32>
    %385 = arith.mulf %384, %382 : vector<8x32xf32>
    %386 = arith.mulf %377, %350 : vector<8x32xf32>
    %387 = arith.addf %385, %386 : vector<8x32xf32>
    %388 = arith.index_cast %c1_i32_101 : i32 to index
    %c0_108 = arith.constant 0 : index
    %c0_109 = arith.constant 0 : index
    %389 = vector.load %arg10[%388, %c0_108, %c0_109] : memref<8x8x32xf32, #tpu.memory_space<vmem>>, vector<1x8x32xf32>
    %390 = vector.shape_cast %389 : vector<1x8x32xf32> to vector<8x32xf32>
    %391 = vector.shape_cast %387 : vector<8x32xf32> to vector<1x8x32xf32>
    tpu.vector_store %arg10[%388, %c0_108, %c0_109], %391 {strides = array<i32>} : memref<8x8x32xf32, #tpu.memory_space<vmem>>, vector<1x8x32xf32>,
    %c2_i32_110 = arith.constant 2 : i32
    %c8_i32_111 = arith.constant 8 : i32
    %392 = arith.muli %c2_i32_110, %c8_i32_111 : i32
    %393 = tpu.assume_multiple %392, 8 : i32
    %394 = arith.index_cast %393 : i32 to index
    %c0_112 = arith.constant 0 : index
    %395 = vector.load %arg12[%394, %c0_112] : memref<64x96xf32, #tpu.memory_space<vmem>>, vector<8x96xf32>
    %cst_113 = arith.constant dense<0.000000e+00> : vector<8x96xf32>
    %396 = tpu.matmul %387, %315, %cst_113 {dimension_numbers = #tpu.dot_dimension_numbers<[1], [0], [0], [1], [0, 0, 1, 1], [], []>} : vector<8x32xf32>, vector<32x96xf32>, vector<8x96xf32> -> vector<8x96xf32>
    %397 = vector.broadcast %316 : vector<1x96xf32> to vector<8x96xf32>
    %398 = arith.addf %396, %397 : vector<8x96xf32>
    %399 = vector.extract_strided_slice %395 {offsets = [0, 0], sizes = [8, 32], strides = [1, 1]} : vector<8x96xf32> to vector<8x32xf32>
    %400 = vector.extract_strided_slice %398 {offsets = [0, 0], sizes = [8, 32], strides = [1, 1]} : vector<8x96xf32> to vector<8x32xf32>
    %401 = arith.addf %399, %400 : vector<8x32xf32>
    %402 = arith.negf %401 : vector<8x32xf32>
    %403 = math.exp %402 : vector<8x32xf32>
    %cst_114 = arith.constant 1.000000e+00 : f32
    %404 = vector.broadcast %cst_114 : f32 to vector<8x32xf32>
    %405 = arith.addf %404, %403 : vector<8x32xf32>
    %406 = arith.divf %404, %405 : vector<8x32xf32>
    %407 = vector.extract_strided_slice %395 {offsets = [0, 32], sizes = [8, 32], strides = [1, 1]} : vector<8x96xf32> to vector<8x32xf32>
    %408 = vector.extract_strided_slice %398 {offsets = [0, 32], sizes = [8, 32], strides = [1, 1]} : vector<8x96xf32> to vector<8x32xf32>
    %409 = arith.addf %407, %408 : vector<8x32xf32>
    %410 = arith.negf %409 : vector<8x32xf32>
    %411 = math.exp %410 : vector<8x32xf32>
    %cst_115 = arith.constant 1.000000e+00 : f32
    %412 = vector.broadcast %cst_115 : f32 to vector<8x32xf32>
    %413 = arith.addf %412, %411 : vector<8x32xf32>
    %414 = arith.divf %412, %413 : vector<8x32xf32>
    %415 = vector.extract_strided_slice %395 {offsets = [0, 64], sizes = [8, 32], strides = [1, 1]} : vector<8x96xf32> to vector<8x32xf32>
    %416 = vector.extract_strided_slice %398 {offsets = [0, 64], sizes = [8, 32], strides = [1, 1]} : vector<8x96xf32> to vector<8x32xf32>
    %417 = arith.mulf %406, %416 : vector<8x32xf32>
    %418 = arith.addf %415, %417 : vector<8x32xf32>
    %419 = math.tanh %418 : vector<8x32xf32>
    %cst_116 = arith.constant 1.000000e+00 : f32
    %420 = vector.broadcast %cst_116 : f32 to vector<8x32xf32>
    %421 = arith.subf %420, %414 : vector<8x32xf32>
    %422 = arith.mulf %421, %419 : vector<8x32xf32>
    %423 = arith.mulf %414, %387 : vector<8x32xf32>
    %424 = arith.addf %422, %423 : vector<8x32xf32>
    %425 = arith.index_cast %c2_i32_110 : i32 to index
    %c0_117 = arith.constant 0 : index
    %c0_118 = arith.constant 0 : index
    %426 = vector.load %arg10[%425, %c0_117, %c0_118] : memref<8x8x32xf32, #tpu.memory_space<vmem>>, vector<1x8x32xf32>
    %427 = vector.shape_cast %426 : vector<1x8x32xf32> to vector<8x32xf32>
    %428 = vector.shape_cast %424 : vector<8x32xf32> to vector<1x8x32xf32>
    tpu.vector_store %arg10[%425, %c0_117, %c0_118], %428 {strides = array<i32>} : memref<8x8x32xf32, #tpu.memory_space<vmem>>, vector<1x8x32xf32>,
    %c3_i32_119 = arith.constant 3 : i32
    %c8_i32_120 = arith.constant 8 : i32
    %429 = arith.muli %c3_i32_119, %c8_i32_120 : i32
    %430 = tpu.assume_multiple %429, 8 : i32
    %431 = arith.index_cast %430 : i32 to index
    %c0_121 = arith.constant 0 : index
    %432 = vector.load %arg12[%431, %c0_121] : memref<64x96xf32, #tpu.memory_space<vmem>>, vector<8x96xf32>
    %cst_122 = arith.constant dense<0.000000e+00> : vector<8x96xf32>
    %433 = tpu.matmul %424, %315, %cst_122 {dimension_numbers = #tpu.dot_dimension_numbers<[1], [0], [0], [1], [0, 0, 1, 1], [], []>} : vector<8x32xf32>, vector<32x96xf32>, vector<8x96xf32> -> vector<8x96xf32>
    %434 = vector.broadcast %316 : vector<1x96xf32> to vector<8x96xf32>
    %435 = arith.addf %433, %434 : vector<8x96xf32>
    %436 = vector.extract_strided_slice %432 {offsets = [0, 0], sizes = [8, 32], strides = [1, 1]} : vector<8x96xf32> to vector<8x32xf32>
    %437 = vector.extract_strided_slice %435 {offsets = [0, 0], sizes = [8, 32], strides = [1, 1]} : vector<8x96xf32> to vector<8x32xf32>
    %438 = arith.addf %436, %437 : vector<8x32xf32>
    %439 = arith.negf %438 : vector<8x32xf32>
    %440 = math.exp %439 : vector<8x32xf32>
    %cst_123 = arith.constant 1.000000e+00 : f32
    %441 = vector.broadcast %cst_123 : f32 to vector<8x32xf32>
    %442 = arith.addf %441, %440 : vector<8x32xf32>
    %443 = arith.divf %441, %442 : vector<8x32xf32>
    %444 = vector.extract_strided_slice %432 {offsets = [0, 32], sizes = [8, 32], strides = [1, 1]} : vector<8x96xf32> to vector<8x32xf32>
    %445 = vector.extract_strided_slice %435 {offsets = [0, 32], sizes = [8, 32], strides = [1, 1]} : vector<8x96xf32> to vector<8x32xf32>
    %446 = arith.addf %444, %445 : vector<8x32xf32>
    %447 = arith.negf %446 : vector<8x32xf32>
    %448 = math.exp %447 : vector<8x32xf32>
    %cst_124 = arith.constant 1.000000e+00 : f32
    %449 = vector.broadcast %cst_124 : f32 to vector<8x32xf32>
    %450 = arith.addf %449, %448 : vector<8x32xf32>
    %451 = arith.divf %449, %450 : vector<8x32xf32>
    %452 = vector.extract_strided_slice %432 {offsets = [0, 64], sizes = [8, 32], strides = [1, 1]} : vector<8x96xf32> to vector<8x32xf32>
    %453 = vector.extract_strided_slice %435 {offsets = [0, 64], sizes = [8, 32], strides = [1, 1]} : vector<8x96xf32> to vector<8x32xf32>
    %454 = arith.mulf %443, %453 : vector<8x32xf32>
    %455 = arith.addf %452, %454 : vector<8x32xf32>
    %456 = math.tanh %455 : vector<8x32xf32>
    %cst_125 = arith.constant 1.000000e+00 : f32
    %457 = vector.broadcast %cst_125 : f32 to vector<8x32xf32>
    %458 = arith.subf %457, %451 : vector<8x32xf32>
    %459 = arith.mulf %458, %456 : vector<8x32xf32>
    %460 = arith.mulf %451, %424 : vector<8x32xf32>
    %461 = arith.addf %459, %460 : vector<8x32xf32>
    %462 = arith.index_cast %c3_i32_119 : i32 to index
    %c0_126 = arith.constant 0 : index
    %c0_127 = arith.constant 0 : index
    %463 = vector.load %arg10[%462, %c0_126, %c0_127] : memref<8x8x32xf32, #tpu.memory_space<vmem>>, vector<1x8x32xf32>
    %464 = vector.shape_cast %463 : vector<1x8x32xf32> to vector<8x32xf32>
    %465 = vector.shape_cast %461 : vector<8x32xf32> to vector<1x8x32xf32>
    tpu.vector_store %arg10[%462, %c0_126, %c0_127], %465 {strides = array<i32>} : memref<8x8x32xf32, #tpu.memory_space<vmem>>, vector<1x8x32xf32>,
    %c4_i32_128 = arith.constant 4 : i32
    %c8_i32_129 = arith.constant 8 : i32
    %466 = arith.muli %c4_i32_128, %c8_i32_129 : i32
    %467 = tpu.assume_multiple %466, 8 : i32
    %468 = arith.index_cast %467 : i32 to index
    %c0_130 = arith.constant 0 : index
    %469 = vector.load %arg12[%468, %c0_130] : memref<64x96xf32, #tpu.memory_space<vmem>>, vector<8x96xf32>
    %cst_131 = arith.constant dense<0.000000e+00> : vector<8x96xf32>
    %470 = tpu.matmul %461, %315, %cst_131 {dimension_numbers = #tpu.dot_dimension_numbers<[1], [0], [0], [1], [0, 0, 1, 1], [], []>} : vector<8x32xf32>, vector<32x96xf32>, vector<8x96xf32> -> vector<8x96xf32>
    %471 = vector.broadcast %316 : vector<1x96xf32> to vector<8x96xf32>
    %472 = arith.addf %470, %471 : vector<8x96xf32>
    %473 = vector.extract_strided_slice %469 {offsets = [0, 0], sizes = [8, 32], strides = [1, 1]} : vector<8x96xf32> to vector<8x32xf32>
    %474 = vector.extract_strided_slice %472 {offsets = [0, 0], sizes = [8, 32], strides = [1, 1]} : vector<8x96xf32> to vector<8x32xf32>
    %475 = arith.addf %473, %474 : vector<8x32xf32>
    %476 = arith.negf %475 : vector<8x32xf32>
    %477 = math.exp %476 : vector<8x32xf32>
    %cst_132 = arith.constant 1.000000e+00 : f32
    %478 = vector.broadcast %cst_132 : f32 to vector<8x32xf32>
    %479 = arith.addf %478, %477 : vector<8x32xf32>
    %480 = arith.divf %478, %479 : vector<8x32xf32>
    %481 = vector.extract_strided_slice %469 {offsets = [0, 32], sizes = [8, 32], strides = [1, 1]} : vector<8x96xf32> to vector<8x32xf32>
    %482 = vector.extract_strided_slice %472 {offsets = [0, 32], sizes = [8, 32], strides = [1, 1]} : vector<8x96xf32> to vector<8x32xf32>
    %483 = arith.addf %481, %482 : vector<8x32xf32>
    %484 = arith.negf %483 : vector<8x32xf32>
    %485 = math.exp %484 : vector<8x32xf32>
    %cst_133 = arith.constant 1.000000e+00 : f32
    %486 = vector.broadcast %cst_133 : f32 to vector<8x32xf32>
    %487 = arith.addf %486, %485 : vector<8x32xf32>
    %488 = arith.divf %486, %487 : vector<8x32xf32>
    %489 = vector.extract_strided_slice %469 {offsets = [0, 64], sizes = [8, 32], strides = [1, 1]} : vector<8x96xf32> to vector<8x32xf32>
    %490 = vector.extract_strided_slice %472 {offsets = [0, 64], sizes = [8, 32], strides = [1, 1]} : vector<8x96xf32> to vector<8x32xf32>
    %491 = arith.mulf %480, %490 : vector<8x32xf32>
    %492 = arith.addf %489, %491 : vector<8x32xf32>
    %493 = math.tanh %492 : vector<8x32xf32>
    %cst_134 = arith.constant 1.000000e+00 : f32
    %494 = vector.broadcast %cst_134 : f32 to vector<8x32xf32>
    %495 = arith.subf %494, %488 : vector<8x32xf32>
    %496 = arith.mulf %495, %493 : vector<8x32xf32>
    %497 = arith.mulf %488, %461 : vector<8x32xf32>
    %498 = arith.addf %496, %497 : vector<8x32xf32>
    %499 = arith.index_cast %c4_i32_128 : i32 to index
    %c0_135 = arith.constant 0 : index
    %c0_136 = arith.constant 0 : index
    %500 = vector.load %arg10[%499, %c0_135, %c0_136] : memref<8x8x32xf32, #tpu.memory_space<vmem>>, vector<1x8x32xf32>
    %501 = vector.shape_cast %500 : vector<1x8x32xf32> to vector<8x32xf32>
    %502 = vector.shape_cast %498 : vector<8x32xf32> to vector<1x8x32xf32>
    tpu.vector_store %arg10[%499, %c0_135, %c0_136], %502 {strides = array<i32>} : memref<8x8x32xf32, #tpu.memory_space<vmem>>, vector<1x8x32xf32>,
    %c5_i32_137 = arith.constant 5 : i32
    %c8_i32_138 = arith.constant 8 : i32
    %503 = arith.muli %c5_i32_137, %c8_i32_138 : i32
    %504 = tpu.assume_multiple %503, 8 : i32
    %505 = arith.index_cast %504 : i32 to index
    %c0_139 = arith.constant 0 : index
    %506 = vector.load %arg12[%505, %c0_139] : memref<64x96xf32, #tpu.memory_space<vmem>>, vector<8x96xf32>
    %cst_140 = arith.constant dense<0.000000e+00> : vector<8x96xf32>
    %507 = tpu.matmul %498, %315, %cst_140 {dimension_numbers = #tpu.dot_dimension_numbers<[1], [0], [0], [1], [0, 0, 1, 1], [], []>} : vector<8x32xf32>, vector<32x96xf32>, vector<8x96xf32> -> vector<8x96xf32>
    %508 = vector.broadcast %316 : vector<1x96xf32> to vector<8x96xf32>
    %509 = arith.addf %507, %508 : vector<8x96xf32>
    %510 = vector.extract_strided_slice %506 {offsets = [0, 0], sizes = [8, 32], strides = [1, 1]} : vector<8x96xf32> to vector<8x32xf32>
    %511 = vector.extract_strided_slice %509 {offsets = [0, 0], sizes = [8, 32], strides = [1, 1]} : vector<8x96xf32> to vector<8x32xf32>
    %512 = arith.addf %510, %511 : vector<8x32xf32>
    %513 = arith.negf %512 : vector<8x32xf32>
    %514 = math.exp %513 : vector<8x32xf32>
    %cst_141 = arith.constant 1.000000e+00 : f32
    %515 = vector.broadcast %cst_141 : f32 to vector<8x32xf32>
    %516 = arith.addf %515, %514 : vector<8x32xf32>
    %517 = arith.divf %515, %516 : vector<8x32xf32>
    %518 = vector.extract_strided_slice %506 {offsets = [0, 32], sizes = [8, 32], strides = [1, 1]} : vector<8x96xf32> to vector<8x32xf32>
    %519 = vector.extract_strided_slice %509 {offsets = [0, 32], sizes = [8, 32], strides = [1, 1]} : vector<8x96xf32> to vector<8x32xf32>
    %520 = arith.addf %518, %519 : vector<8x32xf32>
    %521 = arith.negf %520 : vector<8x32xf32>
    %522 = math.exp %521 : vector<8x32xf32>
    %cst_142 = arith.constant 1.000000e+00 : f32
    %523 = vector.broadcast %cst_142 : f32 to vector<8x32xf32>
    %524 = arith.addf %523, %522 : vector<8x32xf32>
    %525 = arith.divf %523, %524 : vector<8x32xf32>
    %526 = vector.extract_strided_slice %506 {offsets = [0, 64], sizes = [8, 32], strides = [1, 1]} : vector<8x96xf32> to vector<8x32xf32>
    %527 = vector.extract_strided_slice %509 {offsets = [0, 64], sizes = [8, 32], strides = [1, 1]} : vector<8x96xf32> to vector<8x32xf32>
    %528 = arith.mulf %517, %527 : vector<8x32xf32>
    %529 = arith.addf %526, %528 : vector<8x32xf32>
    %530 = math.tanh %529 : vector<8x32xf32>
    %cst_143 = arith.constant 1.000000e+00 : f32
    %531 = vector.broadcast %cst_143 : f32 to vector<8x32xf32>
    %532 = arith.subf %531, %525 : vector<8x32xf32>
    %533 = arith.mulf %532, %530 : vector<8x32xf32>
    %534 = arith.mulf %525, %498 : vector<8x32xf32>
    %535 = arith.addf %533, %534 : vector<8x32xf32>
    %536 = arith.index_cast %c5_i32_137 : i32 to index
    %c0_144 = arith.constant 0 : index
    %c0_145 = arith.constant 0 : index
    %537 = vector.load %arg10[%536, %c0_144, %c0_145] : memref<8x8x32xf32, #tpu.memory_space<vmem>>, vector<1x8x32xf32>
    %538 = vector.shape_cast %537 : vector<1x8x32xf32> to vector<8x32xf32>
    %539 = vector.shape_cast %535 : vector<8x32xf32> to vector<1x8x32xf32>
    tpu.vector_store %arg10[%536, %c0_144, %c0_145], %539 {strides = array<i32>} : memref<8x8x32xf32, #tpu.memory_space<vmem>>, vector<1x8x32xf32>,
    %c6_i32_146 = arith.constant 6 : i32
    %c8_i32_147 = arith.constant 8 : i32
    %540 = arith.muli %c6_i32_146, %c8_i32_147 : i32
    %541 = tpu.assume_multiple %540, 8 : i32
    %542 = arith.index_cast %541 : i32 to index
    %c0_148 = arith.constant 0 : index
    %543 = vector.load %arg12[%542, %c0_148] : memref<64x96xf32, #tpu.memory_space<vmem>>, vector<8x96xf32>
    %cst_149 = arith.constant dense<0.000000e+00> : vector<8x96xf32>
    %544 = tpu.matmul %535, %315, %cst_149 {dimension_numbers = #tpu.dot_dimension_numbers<[1], [0], [0], [1], [0, 0, 1, 1], [], []>} : vector<8x32xf32>, vector<32x96xf32>, vector<8x96xf32> -> vector<8x96xf32>
    %545 = vector.broadcast %316 : vector<1x96xf32> to vector<8x96xf32>
    %546 = arith.addf %544, %545 : vector<8x96xf32>
    %547 = vector.extract_strided_slice %543 {offsets = [0, 0], sizes = [8, 32], strides = [1, 1]} : vector<8x96xf32> to vector<8x32xf32>
    %548 = vector.extract_strided_slice %546 {offsets = [0, 0], sizes = [8, 32], strides = [1, 1]} : vector<8x96xf32> to vector<8x32xf32>
    %549 = arith.addf %547, %548 : vector<8x32xf32>
    %550 = arith.negf %549 : vector<8x32xf32>
    %551 = math.exp %550 : vector<8x32xf32>
    %cst_150 = arith.constant 1.000000e+00 : f32
    %552 = vector.broadcast %cst_150 : f32 to vector<8x32xf32>
    %553 = arith.addf %552, %551 : vector<8x32xf32>
    %554 = arith.divf %552, %553 : vector<8x32xf32>
    %555 = vector.extract_strided_slice %543 {offsets = [0, 32], sizes = [8, 32], strides = [1, 1]} : vector<8x96xf32> to vector<8x32xf32>
    %556 = vector.extract_strided_slice %546 {offsets = [0, 32], sizes = [8, 32], strides = [1, 1]} : vector<8x96xf32> to vector<8x32xf32>
    %557 = arith.addf %555, %556 : vector<8x32xf32>
    %558 = arith.negf %557 : vector<8x32xf32>
    %559 = math.exp %558 : vector<8x32xf32>
    %cst_151 = arith.constant 1.000000e+00 : f32
    %560 = vector.broadcast %cst_151 : f32 to vector<8x32xf32>
    %561 = arith.addf %560, %559 : vector<8x32xf32>
    %562 = arith.divf %560, %561 : vector<8x32xf32>
    %563 = vector.extract_strided_slice %543 {offsets = [0, 64], sizes = [8, 32], strides = [1, 1]} : vector<8x96xf32> to vector<8x32xf32>
    %564 = vector.extract_strided_slice %546 {offsets = [0, 64], sizes = [8, 32], strides = [1, 1]} : vector<8x96xf32> to vector<8x32xf32>
    %565 = arith.mulf %554, %564 : vector<8x32xf32>
    %566 = arith.addf %563, %565 : vector<8x32xf32>
    %567 = math.tanh %566 : vector<8x32xf32>
    %cst_152 = arith.constant 1.000000e+00 : f32
    %568 = vector.broadcast %cst_152 : f32 to vector<8x32xf32>
    %569 = arith.subf %568, %562 : vector<8x32xf32>
    %570 = arith.mulf %569, %567 : vector<8x32xf32>
    %571 = arith.mulf %562, %535 : vector<8x32xf32>
    %572 = arith.addf %570, %571 : vector<8x32xf32>
    %573 = arith.index_cast %c6_i32_146 : i32 to index
    %c0_153 = arith.constant 0 : index
    %c0_154 = arith.constant 0 : index
    %574 = vector.load %arg10[%573, %c0_153, %c0_154] : memref<8x8x32xf32, #tpu.memory_space<vmem>>, vector<1x8x32xf32>
    %575 = vector.shape_cast %574 : vector<1x8x32xf32> to vector<8x32xf32>
    %576 = vector.shape_cast %572 : vector<8x32xf32> to vector<1x8x32xf32>
    tpu.vector_store %arg10[%573, %c0_153, %c0_154], %576 {strides = array<i32>} : memref<8x8x32xf32, #tpu.memory_space<vmem>>, vector<1x8x32xf32>,
    %c7_i32_155 = arith.constant 7 : i32
    %c8_i32_156 = arith.constant 8 : i32
    %577 = arith.muli %c7_i32_155, %c8_i32_156 : i32
    %578 = tpu.assume_multiple %577, 8 : i32
    %579 = arith.index_cast %578 : i32 to index
    %c0_157 = arith.constant 0 : index
    %580 = vector.load %arg12[%579, %c0_157] : memref<64x96xf32, #tpu.memory_space<vmem>>, vector<8x96xf32>
    %cst_158 = arith.constant dense<0.000000e+00> : vector<8x96xf32>
    %581 = tpu.matmul %572, %315, %cst_158 {dimension_numbers = #tpu.dot_dimension_numbers<[1], [0], [0], [1], [0, 0, 1, 1], [], []>} : vector<8x32xf32>, vector<32x96xf32>, vector<8x96xf32> -> vector<8x96xf32>
    %582 = vector.broadcast %316 : vector<1x96xf32> to vector<8x96xf32>
    %583 = arith.addf %581, %582 : vector<8x96xf32>
    %584 = vector.extract_strided_slice %580 {offsets = [0, 0], sizes = [8, 32], strides = [1, 1]} : vector<8x96xf32> to vector<8x32xf32>
    %585 = vector.extract_strided_slice %583 {offsets = [0, 0], sizes = [8, 32], strides = [1, 1]} : vector<8x96xf32> to vector<8x32xf32>
    %586 = arith.addf %584, %585 : vector<8x32xf32>
    %587 = arith.negf %586 : vector<8x32xf32>
    %588 = math.exp %587 : vector<8x32xf32>
    %cst_159 = arith.constant 1.000000e+00 : f32
    %589 = vector.broadcast %cst_159 : f32 to vector<8x32xf32>
    %590 = arith.addf %589, %588 : vector<8x32xf32>
    %591 = arith.divf %589, %590 : vector<8x32xf32>
    %592 = vector.extract_strided_slice %580 {offsets = [0, 32], sizes = [8, 32], strides = [1, 1]} : vector<8x96xf32> to vector<8x32xf32>
    %593 = vector.extract_strided_slice %583 {offsets = [0, 32], sizes = [8, 32], strides = [1, 1]} : vector<8x96xf32> to vector<8x32xf32>
    %594 = arith.addf %592, %593 : vector<8x32xf32>
    %595 = arith.negf %594 : vector<8x32xf32>
    %596 = math.exp %595 : vector<8x32xf32>
    %cst_160 = arith.constant 1.000000e+00 : f32
    %597 = vector.broadcast %cst_160 : f32 to vector<8x32xf32>
    %598 = arith.addf %597, %596 : vector<8x32xf32>
    %599 = arith.divf %597, %598 : vector<8x32xf32>
    %600 = vector.extract_strided_slice %580 {offsets = [0, 64], sizes = [8, 32], strides = [1, 1]} : vector<8x96xf32> to vector<8x32xf32>
    %601 = vector.extract_strided_slice %583 {offsets = [0, 64], sizes = [8, 32], strides = [1, 1]} : vector<8x96xf32> to vector<8x32xf32>
    %602 = arith.mulf %591, %601 : vector<8x32xf32>
    %603 = arith.addf %600, %602 : vector<8x32xf32>
    %604 = math.tanh %603 : vector<8x32xf32>
    %cst_161 = arith.constant 1.000000e+00 : f32
    %605 = vector.broadcast %cst_161 : f32 to vector<8x32xf32>
    %606 = arith.subf %605, %599 : vector<8x32xf32>
    %607 = arith.mulf %606, %604 : vector<8x32xf32>
    %608 = arith.mulf %599, %572 : vector<8x32xf32>
    %609 = arith.addf %607, %608 : vector<8x32xf32>
    %610 = arith.index_cast %c7_i32_155 : i32 to index
    %c0_162 = arith.constant 0 : index
    %c0_163 = arith.constant 0 : index
    %611 = vector.load %arg10[%610, %c0_162, %c0_163] : memref<8x8x32xf32, #tpu.memory_space<vmem>>, vector<1x8x32xf32>
    %612 = vector.shape_cast %611 : vector<1x8x32xf32> to vector<8x32xf32>
    %613 = vector.shape_cast %609 : vector<8x32xf32> to vector<1x8x32xf32>
    tpu.vector_store %arg10[%610, %c0_162, %c0_163], %613 {strides = array<i32>} : memref<8x8x32xf32, #tpu.memory_space<vmem>>, vector<1x8x32xf32>,
    %c8_i32_164 = arith.constant 8 : i32
    return
  }
  func.func @transform_0(%arg0: i32) -> (i32, i32, i32) {
    %c0_i32 = arith.constant 0 : i32
    %c0_i32_0 = arith.constant 0 : i32
    %c0_i32_1 = arith.constant 0 : i32
    return %c0_i32, %arg0, %c0_i32_0 : i32, i32, i32
  }
  func.func @transform_1(%arg0: i32) -> (i32, i32) {
    %c0_i32 = arith.constant 0 : i32
    %c0_i32_0 = arith.constant 0 : i32
    %c0_i32_1 = arith.constant 0 : i32
    return %c0_i32, %c0_i32_0 : i32, i32
  }
  func.func @transform_2(%arg0: i32) -> (i32, i32) {
    %c0_i32 = arith.constant 0 : i32
    %c0_i32_0 = arith.constant 0 : i32
    %c0_i32_1 = arith.constant 0 : i32
    return %c0_i32, %c0_i32_0 : i32, i32
  }
  func.func @transform_3(%arg0: i32) -> (i32, i32) {
    %c0_i32 = arith.constant 0 : i32
    %c0_i32_0 = arith.constant 0 : i32
    %c0_i32_1 = arith.constant 0 : i32
    return %c0_i32, %c0_i32_0 : i32, i32
  }
  func.func @transform_4(%arg0: i32) -> (i32, i32) {
    %c0_i32 = arith.constant 0 : i32
    %c0_i32_0 = arith.constant 0 : i32
    %c0_i32_1 = arith.constant 0 : i32
    return %c0_i32, %c0_i32_0 : i32, i32
  }
  func.func @transform_5(%arg0: i32) -> (i32, i32) {
    %c0_i32 = arith.constant 0 : i32
    %c0_i32_0 = arith.constant 0 : i32
    %c0_i32_1 = arith.constant 0 : i32
    return %c0_i32, %c0_i32_0 : i32, i32
  }
  func.func @transform_6(%arg0: i32) -> (i32, i32) {
    %c0_i32 = arith.constant 0 : i32
    %c0_i32_0 = arith.constant 0 : i32
    %c0_i32_1 = arith.constant 0 : i32
    return %c0_i32, %c0_i32_0 : i32, i32
  }
  func.func @transform_7(%arg0: i32) -> (i32, i32) {
    %c0_i32 = arith.constant 0 : i32
    %c0_i32_0 = arith.constant 0 : i32
    %c0_i32_1 = arith.constant 0 : i32
    return %c0_i32, %c0_i32_0 : i32, i32
  }
  func.func @transform_8(%arg0: i32) -> (i32, i32) {
    %c0_i32 = arith.constant 0 : i32
    %c0_i32_0 = arith.constant 0 : i32
    %c0_i32_1 = arith.constant 0 : i32
    return %c0_i32, %c0_i32_0 : i32, i32
  }
  func.func @transform_9(%arg0: i32) -> (i32, i32, i32) {
    %c0_i32 = arith.constant 0 : i32
    %c0_i32_0 = arith.constant 0 : i32
    %c0_i32_1 = arith.constant 0 : i32
    return %c0_i32, %arg0, %c0_i32_0 : i32, i32, i32
  }
}

module attributes {stable_mosaic.version = 11 : i64} {
  func.func @_tx_layer_kernel(%arg0: i32, %arg1: memref<16x32xf32, #tpu.memory_space<vmem>>, %arg2: memref<16x1xi32, #tpu.memory_space<vmem>>, %arg3: memref<1x16xi32, #tpu.memory_space<vmem>>, %arg4: memref<32x96xbf16, #tpu.memory_space<vmem>>, %arg5: memref<1x96xf32, #tpu.memory_space<vmem>>, %arg6: memref<32x32xbf16, #tpu.memory_space<vmem>>, %arg7: memref<1x32xf32, #tpu.memory_space<vmem>>, %arg8: memref<1x32xf32, #tpu.memory_space<vmem>>, %arg9: memref<1x32xf32, #tpu.memory_space<vmem>>, %arg10: memref<32x64xbf16, #tpu.memory_space<vmem>>, %arg11: memref<1x64xf32, #tpu.memory_space<vmem>>, %arg12: memref<64x32xbf16, #tpu.memory_space<vmem>>, %arg13: memref<1x32xf32, #tpu.memory_space<vmem>>, %arg14: memref<1x32xf32, #tpu.memory_space<vmem>>, %arg15: memref<1x32xf32, #tpu.memory_space<vmem>>, %arg16: memref<16x32xf32, #tpu.memory_space<vmem>>) attributes {dimension_semantics = [#tpu.dimension_semantics<parallel>], iteration_bounds = array<i64: 4>, scalar_prefetch = 0 : i64, scratch_operands = 0 : i64, tpu.core_type = #tpu.core_type<tc>, window_params = [{transform_indices = @transform_0, window_bounds = array<i64: 16, 32>}, {pipeline_mode = #tpu.pipeline_mode<synchronous>, transform_indices = @transform_1, window_bounds = array<i64: 16, 1>}, {pipeline_mode = #tpu.pipeline_mode<synchronous>, transform_indices = @transform_2, window_bounds = array<i64: 1, 16>}, {pipeline_mode = #tpu.pipeline_mode<synchronous>, transform_indices = @transform_3, window_bounds = array<i64: 32, 96>}, {pipeline_mode = #tpu.pipeline_mode<synchronous>, transform_indices = @transform_4, window_bounds = array<i64: 1, 96>}, {pipeline_mode = #tpu.pipeline_mode<synchronous>, transform_indices = @transform_5, window_bounds = array<i64: 32, 32>}, {pipeline_mode = #tpu.pipeline_mode<synchronous>, transform_indices = @transform_6, window_bounds = array<i64: 1, 32>}, {pipeline_mode = #tpu.pipeline_mode<synchronous>, transform_indices = @transform_7, window_bounds = array<i64: 1, 32>}, {pipeline_mode = #tpu.pipeline_mode<synchronous>, transform_indices = @transform_8, window_bounds = array<i64: 1, 32>}, {pipeline_mode = #tpu.pipeline_mode<synchronous>, transform_indices = @transform_9, window_bounds = array<i64: 32, 64>}, {pipeline_mode = #tpu.pipeline_mode<synchronous>, transform_indices = @transform_10, window_bounds = array<i64: 1, 64>}, {pipeline_mode = #tpu.pipeline_mode<synchronous>, transform_indices = @transform_11, window_bounds = array<i64: 64, 32>}, {pipeline_mode = #tpu.pipeline_mode<synchronous>, transform_indices = @transform_12, window_bounds = array<i64: 1, 32>}, {pipeline_mode = #tpu.pipeline_mode<synchronous>, transform_indices = @transform_13, window_bounds = array<i64: 1, 32>}, {pipeline_mode = #tpu.pipeline_mode<synchronous>, transform_indices = @transform_14, window_bounds = array<i64: 1, 32>}, {transform_indices = @transform_15, window_bounds = array<i64: 16, 32>}]} {
    %c0 = arith.constant 0 : index
    %c0_0 = arith.constant 0 : index
    %0 = vector.load %arg1[%c0, %c0_0] : memref<16x32xf32, #tpu.memory_space<vmem>>, vector<16x32xf32>
    %1 = arith.truncf %0 : vector<16x32xf32> to vector<16x32xbf16>
    %c0_1 = arith.constant 0 : index
    %c0_2 = arith.constant 0 : index
    %2 = vector.load %arg4[%c0_1, %c0_2] : memref<32x96xbf16, #tpu.memory_space<vmem>>, vector<32x96xbf16>
    %cst = arith.constant dense<0.000000e+00> : vector<16x96xf32>
    %3 = tpu.matmul %1, %2, %cst {dimension_numbers = #tpu.dot_dimension_numbers<[1], [0], [0], [1], [0, 0, 1, 1], [], []>} : vector<16x32xbf16>, vector<32x96xbf16>, vector<16x96xf32> -> vector<16x96xf32>
    %c0_3 = arith.constant 0 : index
    %c0_4 = arith.constant 0 : index
    %4 = vector.load %arg5[%c0_3, %c0_4] : memref<1x96xf32, #tpu.memory_space<vmem>>, vector<1x96xf32>
    %5 = vector.broadcast %4 : vector<1x96xf32> to vector<16x96xf32>
    %6 = arith.addf %3, %5 : vector<16x96xf32>
    %7 = vector.extract_strided_slice %6 {offsets = [0, 0], sizes = [16, 32], strides = [1, 1]} : vector<16x96xf32> to vector<16x32xf32>
    %cst_5 = arith.constant 0.353553385 : f32
    %8 = vector.broadcast %cst_5 : f32 to vector<16x32xf32>
    %9 = arith.mulf %7, %8 : vector<16x32xf32>
    %10 = arith.truncf %9 : vector<16x32xf32> to vector<16x32xbf16>
    %11 = vector.extract_strided_slice %6 {offsets = [0, 32], sizes = [16, 32], strides = [1, 1]} : vector<16x96xf32> to vector<16x32xf32>
    %12 = arith.truncf %11 : vector<16x32xf32> to vector<16x32xbf16>
    %13 = vector.extract_strided_slice %6 {offsets = [0, 64], sizes = [16, 32], strides = [1, 1]} : vector<16x96xf32> to vector<16x32xf32>
    %14 = arith.truncf %13 : vector<16x32xf32> to vector<16x32xbf16>
    %c0_6 = arith.constant 0 : index
    %c0_7 = arith.constant 0 : index
    %15 = vector.load %arg2[%c0_6, %c0_7] : memref<16x1xi32, #tpu.memory_space<vmem>>, vector<16x1xi32>
    %c0_8 = arith.constant 0 : index
    %c0_9 = arith.constant 0 : index
    %16 = vector.load %arg3[%c0_8, %c0_9] : memref<1x16xi32, #tpu.memory_space<vmem>>, vector<1x16xi32>
    %17 = vector.broadcast %15 : vector<16x1xi32> to vector<16x16xi32>
    %18 = vector.broadcast %16 : vector<1x16xi32> to vector<16x16xi32>
    %19 = arith.cmpi eq, %17, %18 : vector<16x16xi32>
    %20 = vector.extract_strided_slice %10 {offsets = [0, 0], sizes = [16, 8], strides = [1, 1]} : vector<16x32xbf16> to vector<16x8xbf16>
    %21 = vector.extract_strided_slice %12 {offsets = [0, 0], sizes = [16, 8], strides = [1, 1]} : vector<16x32xbf16> to vector<16x8xbf16>
    %cst_10 = arith.constant dense<0.000000e+00> : vector<16x16xf32>
    %22 = tpu.matmul %20, %21, %cst_10 {dimension_numbers = #tpu.dot_dimension_numbers<[1], [1], [0], [0], [0, 0, 1, 0], [], []>} : vector<16x8xbf16>, vector<16x8xbf16>, vector<16x16xf32> -> vector<16x16xf32>
    %cst_11 = arith.constant -1.000000e+30 : f32
    %23 = vector.broadcast %cst_11 : f32 to vector<16x16xf32>
    %24 = arith.select %19, %22, %23 : vector<16x16xi1>, vector<16x16xf32>
    %cst_12 = arith.constant dense<0xFF800000> : vector<16xf32>
    %25 = vector.multi_reduction <maximumf>, %24, %cst_12 [1] : vector<16x16xf32> to vector<16xf32>
    %26 = vector.shape_cast %25 : vector<16xf32> to vector<16x1xf32>
    %27 = vector.broadcast %26 : vector<16x1xf32> to vector<16x16xf32>
    %28 = arith.subf %24, %27 : vector<16x16xf32>
    %29 = math.exp %28 : vector<16x16xf32>
    %cst_13 = arith.constant dense<0.000000e+00> : vector<16xf32>
    %30 = vector.multi_reduction <add>, %29, %cst_13 [1] : vector<16x16xf32> to vector<16xf32>
    %31 = vector.shape_cast %30 : vector<16xf32> to vector<16x1xf32>
    %32 = tpu.reciprocal %31 {approx = true} : vector<16x1xf32> -> vector<16x1xf32>
    %33 = arith.truncf %29 : vector<16x16xf32> to vector<16x16xbf16>
    %34 = vector.extract_strided_slice %14 {offsets = [0, 0], sizes = [16, 8], strides = [1, 1]} : vector<16x32xbf16> to vector<16x8xbf16>
    %cst_14 = arith.constant dense<0.000000e+00> : vector<16x8xf32>
    %35 = tpu.matmul %33, %34, %cst_14 {dimension_numbers = #tpu.dot_dimension_numbers<[1], [0], [0], [1], [0, 0, 1, 1], [], []>} : vector<16x16xbf16>, vector<16x8xbf16>, vector<16x8xf32> -> vector<16x8xf32>
    %36 = vector.broadcast %32 : vector<16x1xf32> to vector<16x8xf32>
    %37 = arith.mulf %35, %36 : vector<16x8xf32>
    %38 = vector.extract_strided_slice %10 {offsets = [0, 8], sizes = [16, 8], strides = [1, 1]} : vector<16x32xbf16> to vector<16x8xbf16>
    %39 = vector.extract_strided_slice %12 {offsets = [0, 8], sizes = [16, 8], strides = [1, 1]} : vector<16x32xbf16> to vector<16x8xbf16>
    %cst_15 = arith.constant dense<0.000000e+00> : vector<16x16xf32>
    %40 = tpu.matmul %38, %39, %cst_15 {dimension_numbers = #tpu.dot_dimension_numbers<[1], [1], [0], [0], [0, 0, 1, 0], [], []>} : vector<16x8xbf16>, vector<16x8xbf16>, vector<16x16xf32> -> vector<16x16xf32>
    %cst_16 = arith.constant -1.000000e+30 : f32
    %41 = vector.broadcast %cst_16 : f32 to vector<16x16xf32>
    %42 = arith.select %19, %40, %41 : vector<16x16xi1>, vector<16x16xf32>
    %cst_17 = arith.constant dense<0xFF800000> : vector<16xf32>
    %43 = vector.multi_reduction <maximumf>, %42, %cst_17 [1] : vector<16x16xf32> to vector<16xf32>
    %44 = vector.shape_cast %43 : vector<16xf32> to vector<16x1xf32>
    %45 = vector.broadcast %44 : vector<16x1xf32> to vector<16x16xf32>
    %46 = arith.subf %42, %45 : vector<16x16xf32>
    %47 = math.exp %46 : vector<16x16xf32>
    %cst_18 = arith.constant dense<0.000000e+00> : vector<16xf32>
    %48 = vector.multi_reduction <add>, %47, %cst_18 [1] : vector<16x16xf32> to vector<16xf32>
    %49 = vector.shape_cast %48 : vector<16xf32> to vector<16x1xf32>
    %50 = tpu.reciprocal %49 {approx = true} : vector<16x1xf32> -> vector<16x1xf32>
    %51 = arith.truncf %47 : vector<16x16xf32> to vector<16x16xbf16>
    %52 = vector.extract_strided_slice %14 {offsets = [0, 8], sizes = [16, 8], strides = [1, 1]} : vector<16x32xbf16> to vector<16x8xbf16>
    %cst_19 = arith.constant dense<0.000000e+00> : vector<16x8xf32>
    %53 = tpu.matmul %51, %52, %cst_19 {dimension_numbers = #tpu.dot_dimension_numbers<[1], [0], [0], [1], [0, 0, 1, 1], [], []>} : vector<16x16xbf16>, vector<16x8xbf16>, vector<16x8xf32> -> vector<16x8xf32>
    %54 = vector.broadcast %50 : vector<16x1xf32> to vector<16x8xf32>
    %55 = arith.mulf %53, %54 : vector<16x8xf32>
    %56 = vector.extract_strided_slice %10 {offsets = [0, 16], sizes = [16, 8], strides = [1, 1]} : vector<16x32xbf16> to vector<16x8xbf16>
    %57 = vector.extract_strided_slice %12 {offsets = [0, 16], sizes = [16, 8], strides = [1, 1]} : vector<16x32xbf16> to vector<16x8xbf16>
    %cst_20 = arith.constant dense<0.000000e+00> : vector<16x16xf32>
    %58 = tpu.matmul %56, %57, %cst_20 {dimension_numbers = #tpu.dot_dimension_numbers<[1], [1], [0], [0], [0, 0, 1, 0], [], []>} : vector<16x8xbf16>, vector<16x8xbf16>, vector<16x16xf32> -> vector<16x16xf32>
    %cst_21 = arith.constant -1.000000e+30 : f32
    %59 = vector.broadcast %cst_21 : f32 to vector<16x16xf32>
    %60 = arith.select %19, %58, %59 : vector<16x16xi1>, vector<16x16xf32>
    %cst_22 = arith.constant dense<0xFF800000> : vector<16xf32>
    %61 = vector.multi_reduction <maximumf>, %60, %cst_22 [1] : vector<16x16xf32> to vector<16xf32>
    %62 = vector.shape_cast %61 : vector<16xf32> to vector<16x1xf32>
    %63 = vector.broadcast %62 : vector<16x1xf32> to vector<16x16xf32>
    %64 = arith.subf %60, %63 : vector<16x16xf32>
    %65 = math.exp %64 : vector<16x16xf32>
    %cst_23 = arith.constant dense<0.000000e+00> : vector<16xf32>
    %66 = vector.multi_reduction <add>, %65, %cst_23 [1] : vector<16x16xf32> to vector<16xf32>
    %67 = vector.shape_cast %66 : vector<16xf32> to vector<16x1xf32>
    %68 = tpu.reciprocal %67 {approx = true} : vector<16x1xf32> -> vector<16x1xf32>
    %69 = arith.truncf %65 : vector<16x16xf32> to vector<16x16xbf16>
    %70 = vector.extract_strided_slice %14 {offsets = [0, 16], sizes = [16, 8], strides = [1, 1]} : vector<16x32xbf16> to vector<16x8xbf16>
    %cst_24 = arith.constant dense<0.000000e+00> : vector<16x8xf32>
    %71 = tpu.matmul %69, %70, %cst_24 {dimension_numbers = #tpu.dot_dimension_numbers<[1], [0], [0], [1], [0, 0, 1, 1], [], []>} : vector<16x16xbf16>, vector<16x8xbf16>, vector<16x8xf32> -> vector<16x8xf32>
    %72 = vector.broadcast %68 : vector<16x1xf32> to vector<16x8xf32>
    %73 = arith.mulf %71, %72 : vector<16x8xf32>
    %74 = vector.extract_strided_slice %10 {offsets = [0, 24], sizes = [16, 8], strides = [1, 1]} : vector<16x32xbf16> to vector<16x8xbf16>
    %75 = vector.extract_strided_slice %12 {offsets = [0, 24], sizes = [16, 8], strides = [1, 1]} : vector<16x32xbf16> to vector<16x8xbf16>
    %cst_25 = arith.constant dense<0.000000e+00> : vector<16x16xf32>
    %76 = tpu.matmul %74, %75, %cst_25 {dimension_numbers = #tpu.dot_dimension_numbers<[1], [1], [0], [0], [0, 0, 1, 0], [], []>} : vector<16x8xbf16>, vector<16x8xbf16>, vector<16x16xf32> -> vector<16x16xf32>
    %cst_26 = arith.constant -1.000000e+30 : f32
    %77 = vector.broadcast %cst_26 : f32 to vector<16x16xf32>
    %78 = arith.select %19, %76, %77 : vector<16x16xi1>, vector<16x16xf32>
    %cst_27 = arith.constant dense<0xFF800000> : vector<16xf32>
    %79 = vector.multi_reduction <maximumf>, %78, %cst_27 [1] : vector<16x16xf32> to vector<16xf32>
    %80 = vector.shape_cast %79 : vector<16xf32> to vector<16x1xf32>
    %81 = vector.broadcast %80 : vector<16x1xf32> to vector<16x16xf32>
    %82 = arith.subf %78, %81 : vector<16x16xf32>
    %83 = math.exp %82 : vector<16x16xf32>
    %cst_28 = arith.constant dense<0.000000e+00> : vector<16xf32>
    %84 = vector.multi_reduction <add>, %83, %cst_28 [1] : vector<16x16xf32> to vector<16xf32>
    %85 = vector.shape_cast %84 : vector<16xf32> to vector<16x1xf32>
    %86 = tpu.reciprocal %85 {approx = true} : vector<16x1xf32> -> vector<16x1xf32>
    %87 = arith.truncf %83 : vector<16x16xf32> to vector<16x16xbf16>
    %88 = vector.extract_strided_slice %14 {offsets = [0, 24], sizes = [16, 8], strides = [1, 1]} : vector<16x32xbf16> to vector<16x8xbf16>
    %cst_29 = arith.constant dense<0.000000e+00> : vector<16x8xf32>
    %89 = tpu.matmul %87, %88, %cst_29 {dimension_numbers = #tpu.dot_dimension_numbers<[1], [0], [0], [1], [0, 0, 1, 1], [], []>} : vector<16x16xbf16>, vector<16x8xbf16>, vector<16x8xf32> -> vector<16x8xf32>
    %90 = vector.broadcast %86 : vector<16x1xf32> to vector<16x8xf32>
    %91 = arith.mulf %89, %90 : vector<16x8xf32>
    %92 = tpu.concatenate %37, %55, %73, %91 in 1 : vector<16x8xf32>, vector<16x8xf32>, vector<16x8xf32>, vector<16x8xf32> -> vector<16x32xf32>
    %93 = arith.truncf %92 : vector<16x32xf32> to vector<16x32xbf16>
    %c0_30 = arith.constant 0 : index
    %c0_31 = arith.constant 0 : index
    %94 = vector.load %arg6[%c0_30, %c0_31] : memref<32x32xbf16, #tpu.memory_space<vmem>>, vector<32x32xbf16>
    %cst_32 = arith.constant dense<0.000000e+00> : vector<16x32xf32>
    %95 = tpu.matmul %93, %94, %cst_32 {dimension_numbers = #tpu.dot_dimension_numbers<[1], [0], [0], [1], [0, 0, 1, 1], [], []>} : vector<16x32xbf16>, vector<32x32xbf16>, vector<16x32xf32> -> vector<16x32xf32>
    %c0_33 = arith.constant 0 : index
    %c0_34 = arith.constant 0 : index
    %96 = vector.load %arg7[%c0_33, %c0_34] : memref<1x32xf32, #tpu.memory_space<vmem>>, vector<1x32xf32>
    %97 = vector.broadcast %96 : vector<1x32xf32> to vector<16x32xf32>
    %98 = arith.addf %95, %97 : vector<16x32xf32>
    %99 = arith.addf %0, %98 : vector<16x32xf32>
    %c0_35 = arith.constant 0 : index
    %c0_36 = arith.constant 0 : index
    %100 = vector.load %arg8[%c0_35, %c0_36] : memref<1x32xf32, #tpu.memory_space<vmem>>, vector<1x32xf32>
    %c0_37 = arith.constant 0 : index
    %c0_38 = arith.constant 0 : index
    %101 = vector.load %arg9[%c0_37, %c0_38] : memref<1x32xf32, #tpu.memory_space<vmem>>, vector<1x32xf32>
    %cst_39 = arith.constant dense<0.000000e+00> : vector<16xf32>
    %102 = vector.multi_reduction <add>, %99, %cst_39 [1] : vector<16x32xf32> to vector<16xf32>
    %103 = vector.shape_cast %102 : vector<16xf32> to vector<16x1xf32>
    %cst_40 = arith.constant 3.200000e+01 : f32
    %104 = vector.broadcast %cst_40 : f32 to vector<16x1xf32>
    %105 = arith.divf %103, %104 : vector<16x1xf32>
    %106 = vector.broadcast %105 : vector<16x1xf32> to vector<16x32xf32>
    %107 = arith.subf %99, %106 : vector<16x32xf32>
    %108 = arith.mulf %107, %107 : vector<16x32xf32>
    %cst_41 = arith.constant dense<0.000000e+00> : vector<16xf32>
    %109 = vector.multi_reduction <add>, %108, %cst_41 [1] : vector<16x32xf32> to vector<16xf32>
    %110 = vector.shape_cast %109 : vector<16xf32> to vector<16x1xf32>
    %cst_42 = arith.constant 3.200000e+01 : f32
    %111 = vector.broadcast %cst_42 : f32 to vector<16x1xf32>
    %112 = arith.divf %110, %111 : vector<16x1xf32>
    %cst_43 = arith.constant 9.99999974E-6 : f32
    %113 = vector.broadcast %cst_43 : f32 to vector<16x1xf32>
    %114 = arith.addf %112, %113 : vector<16x1xf32>
    %115 = math.rsqrt %114 : vector<16x1xf32>
    %116 = vector.broadcast %115 : vector<16x1xf32> to vector<16x32xf32>
    %117 = arith.mulf %107, %116 : vector<16x32xf32>
    %118 = vector.broadcast %100 : vector<1x32xf32> to vector<16x32xf32>
    %119 = arith.mulf %117, %118 : vector<16x32xf32>
    %120 = vector.broadcast %101 : vector<1x32xf32> to vector<16x32xf32>
    %121 = arith.addf %119, %120 : vector<16x32xf32>
    %122 = arith.truncf %121 : vector<16x32xf32> to vector<16x32xbf16>
    %c0_44 = arith.constant 0 : index
    %c0_45 = arith.constant 0 : index
    %123 = vector.load %arg10[%c0_44, %c0_45] : memref<32x64xbf16, #tpu.memory_space<vmem>>, vector<32x64xbf16>
    %cst_46 = arith.constant dense<0.000000e+00> : vector<16x64xf32>
    %124 = tpu.matmul %122, %123, %cst_46 {dimension_numbers = #tpu.dot_dimension_numbers<[1], [0], [0], [1], [0, 0, 1, 1], [], []>} : vector<16x32xbf16>, vector<32x64xbf16>, vector<16x64xf32> -> vector<16x64xf32>
    %c0_47 = arith.constant 0 : index
    %c0_48 = arith.constant 0 : index
    %125 = vector.load %arg11[%c0_47, %c0_48] : memref<1x64xf32, #tpu.memory_space<vmem>>, vector<1x64xf32>
    %126 = vector.broadcast %125 : vector<1x64xf32> to vector<16x64xf32>
    %127 = arith.addf %124, %126 : vector<16x64xf32>
    %cst_49 = arith.constant 0.000000e+00 : f32
    %128 = vector.broadcast %cst_49 : f32 to vector<16x64xf32>
    %129 = arith.maximumf %127, %128 : vector<16x64xf32>
    %130 = arith.truncf %129 : vector<16x64xf32> to vector<16x64xbf16>
    %c0_50 = arith.constant 0 : index
    %c0_51 = arith.constant 0 : index
    %131 = vector.load %arg12[%c0_50, %c0_51] : memref<64x32xbf16, #tpu.memory_space<vmem>>, vector<64x32xbf16>
    %cst_52 = arith.constant dense<0.000000e+00> : vector<16x32xf32>
    %132 = tpu.matmul %130, %131, %cst_52 {dimension_numbers = #tpu.dot_dimension_numbers<[1], [0], [0], [1], [0, 0, 1, 1], [], []>} : vector<16x64xbf16>, vector<64x32xbf16>, vector<16x32xf32> -> vector<16x32xf32>
    %c0_53 = arith.constant 0 : index
    %c0_54 = arith.constant 0 : index
    %133 = vector.load %arg13[%c0_53, %c0_54] : memref<1x32xf32, #tpu.memory_space<vmem>>, vector<1x32xf32>
    %134 = vector.broadcast %133 : vector<1x32xf32> to vector<16x32xf32>
    %135 = arith.addf %132, %134 : vector<16x32xf32>
    %136 = arith.addf %121, %135 : vector<16x32xf32>
    %c0_55 = arith.constant 0 : index
    %c0_56 = arith.constant 0 : index
    %137 = vector.load %arg14[%c0_55, %c0_56] : memref<1x32xf32, #tpu.memory_space<vmem>>, vector<1x32xf32>
    %c0_57 = arith.constant 0 : index
    %c0_58 = arith.constant 0 : index
    %138 = vector.load %arg15[%c0_57, %c0_58] : memref<1x32xf32, #tpu.memory_space<vmem>>, vector<1x32xf32>
    %cst_59 = arith.constant dense<0.000000e+00> : vector<16xf32>
    %139 = vector.multi_reduction <add>, %136, %cst_59 [1] : vector<16x32xf32> to vector<16xf32>
    %140 = vector.shape_cast %139 : vector<16xf32> to vector<16x1xf32>
    %cst_60 = arith.constant 3.200000e+01 : f32
    %141 = vector.broadcast %cst_60 : f32 to vector<16x1xf32>
    %142 = arith.divf %140, %141 : vector<16x1xf32>
    %143 = vector.broadcast %142 : vector<16x1xf32> to vector<16x32xf32>
    %144 = arith.subf %136, %143 : vector<16x32xf32>
    %145 = arith.mulf %144, %144 : vector<16x32xf32>
    %cst_61 = arith.constant dense<0.000000e+00> : vector<16xf32>
    %146 = vector.multi_reduction <add>, %145, %cst_61 [1] : vector<16x32xf32> to vector<16xf32>
    %147 = vector.shape_cast %146 : vector<16xf32> to vector<16x1xf32>
    %cst_62 = arith.constant 3.200000e+01 : f32
    %148 = vector.broadcast %cst_62 : f32 to vector<16x1xf32>
    %149 = arith.divf %147, %148 : vector<16x1xf32>
    %cst_63 = arith.constant 9.99999974E-6 : f32
    %150 = vector.broadcast %cst_63 : f32 to vector<16x1xf32>
    %151 = arith.addf %149, %150 : vector<16x1xf32>
    %152 = math.rsqrt %151 : vector<16x1xf32>
    %153 = vector.broadcast %152 : vector<16x1xf32> to vector<16x32xf32>
    %154 = arith.mulf %144, %153 : vector<16x32xf32>
    %155 = vector.broadcast %137 : vector<1x32xf32> to vector<16x32xf32>
    %156 = arith.mulf %154, %155 : vector<16x32xf32>
    %157 = vector.broadcast %138 : vector<1x32xf32> to vector<16x32xf32>
    %158 = arith.addf %156, %157 : vector<16x32xf32>
    %c0_64 = arith.constant 0 : index
    %c0_65 = arith.constant 0 : index
    %159 = vector.load %arg16[%c0_64, %c0_65] : memref<16x32xf32, #tpu.memory_space<vmem>>, vector<16x32xf32>
    tpu.vector_store %arg16[%c0_64, %c0_65], %158 {strides = array<i32>} : memref<16x32xf32, #tpu.memory_space<vmem>>, vector<16x32xf32>,
    return
  }
  func.func @transform_0(%arg0: i32) -> (i32, i32) {
    %c0_i32 = arith.constant 0 : i32
    %c0_i32_0 = arith.constant 0 : i32
    return %arg0, %c0_i32 : i32, i32
  }
  func.func @transform_1(%arg0: i32) -> (i32, i32) {
    %c0_i32 = arith.constant 0 : i32
    %c0_i32_0 = arith.constant 0 : i32
    %c0_i32_1 = arith.constant 0 : i32
    return %c0_i32, %c0_i32_0 : i32, i32
  }
  func.func @transform_2(%arg0: i32) -> (i32, i32) {
    %c0_i32 = arith.constant 0 : i32
    %c0_i32_0 = arith.constant 0 : i32
    %c0_i32_1 = arith.constant 0 : i32
    return %c0_i32, %c0_i32_0 : i32, i32
  }
  func.func @transform_3(%arg0: i32) -> (i32, i32) {
    %c0_i32 = arith.constant 0 : i32
    %c0_i32_0 = arith.constant 0 : i32
    %c0_i32_1 = arith.constant 0 : i32
    return %c0_i32, %c0_i32_0 : i32, i32
  }
  func.func @transform_4(%arg0: i32) -> (i32, i32) {
    %c0_i32 = arith.constant 0 : i32
    %c0_i32_0 = arith.constant 0 : i32
    %c0_i32_1 = arith.constant 0 : i32
    return %c0_i32, %c0_i32_0 : i32, i32
  }
  func.func @transform_5(%arg0: i32) -> (i32, i32) {
    %c0_i32 = arith.constant 0 : i32
    %c0_i32_0 = arith.constant 0 : i32
    %c0_i32_1 = arith.constant 0 : i32
    return %c0_i32, %c0_i32_0 : i32, i32
  }
  func.func @transform_6(%arg0: i32) -> (i32, i32) {
    %c0_i32 = arith.constant 0 : i32
    %c0_i32_0 = arith.constant 0 : i32
    %c0_i32_1 = arith.constant 0 : i32
    return %c0_i32, %c0_i32_0 : i32, i32
  }
  func.func @transform_7(%arg0: i32) -> (i32, i32) {
    %c0_i32 = arith.constant 0 : i32
    %c0_i32_0 = arith.constant 0 : i32
    %c0_i32_1 = arith.constant 0 : i32
    return %c0_i32, %c0_i32_0 : i32, i32
  }
  func.func @transform_8(%arg0: i32) -> (i32, i32) {
    %c0_i32 = arith.constant 0 : i32
    %c0_i32_0 = arith.constant 0 : i32
    %c0_i32_1 = arith.constant 0 : i32
    return %c0_i32, %c0_i32_0 : i32, i32
  }
  func.func @transform_9(%arg0: i32) -> (i32, i32) {
    %c0_i32 = arith.constant 0 : i32
    %c0_i32_0 = arith.constant 0 : i32
    %c0_i32_1 = arith.constant 0 : i32
    return %c0_i32, %c0_i32_0 : i32, i32
  }
  func.func @transform_10(%arg0: i32) -> (i32, i32) {
    %c0_i32 = arith.constant 0 : i32
    %c0_i32_0 = arith.constant 0 : i32
    %c0_i32_1 = arith.constant 0 : i32
    return %c0_i32, %c0_i32_0 : i32, i32
  }
  func.func @transform_11(%arg0: i32) -> (i32, i32) {
    %c0_i32 = arith.constant 0 : i32
    %c0_i32_0 = arith.constant 0 : i32
    %c0_i32_1 = arith.constant 0 : i32
    return %c0_i32, %c0_i32_0 : i32, i32
  }
  func.func @transform_12(%arg0: i32) -> (i32, i32) {
    %c0_i32 = arith.constant 0 : i32
    %c0_i32_0 = arith.constant 0 : i32
    %c0_i32_1 = arith.constant 0 : i32
    return %c0_i32, %c0_i32_0 : i32, i32
  }
  func.func @transform_13(%arg0: i32) -> (i32, i32) {
    %c0_i32 = arith.constant 0 : i32
    %c0_i32_0 = arith.constant 0 : i32
    %c0_i32_1 = arith.constant 0 : i32
    return %c0_i32, %c0_i32_0 : i32, i32
  }
  func.func @transform_14(%arg0: i32) -> (i32, i32) {
    %c0_i32 = arith.constant 0 : i32
    %c0_i32_0 = arith.constant 0 : i32
    %c0_i32_1 = arith.constant 0 : i32
    return %c0_i32, %c0_i32_0 : i32, i32
  }
  func.func @transform_15(%arg0: i32) -> (i32, i32) {
    %c0_i32 = arith.constant 0 : i32
    %c0_i32_0 = arith.constant 0 : i32
    return %arg0, %c0_i32 : i32, i32
  }
}

</mosaic_0001>

<bundles_post_ra>
// kernel: _lambda_.6
= control target key start
LH: loop header
LB: loop body
LE: loop exit
PB: predicated region body
PF: predicated region fallthrough
CT: control target
= control target key end

     0   :  { %s1238_s25 = smov 0   ;;  %s1315_s0 = inlined_call_operand.vmem [shape: f32[64,1], index: 0, kind: input, shape index: {}]   ;;  %s1316_s1 = inlined_call_operand.vmem [shape: f32[64,4], index: 1, kind: input, shape index: {}]   ;;  %s1317_s2 = inlined_call_operand.vmem [shape: f32[64,8], index: 2, kind: input, shape index: {}]   ;;  %s1318_s3 = inlined_call_operand.vmem [shape: f32[64,8], index: 3, kind: input, shape index: {}]   ;;  %s1319_s4 = inlined_call_operand.vmem [shape: f32[64,8], index: 4, kind: input, shape index: {}]   ;;  %s1320_s5 = inlined_call_operand.vmem [shape: f32[1,8], index: 5, kind: input, shape index: {}]   ;;  %s1321_s6 = inlined_call_operand.vmem [shape: f32[1,8], index: 6, kind: input, shape index: {}]   ;;  %s1322_s7 = inlined_call_operand.vmem [shape: f32[4,8], index: 7, kind: input, shape index: {}]   ;;  %s1323_s8 = inlined_call_operand.vmem [shape: f32[1,8], index: 8, kind: input, shape index: {}]   ;;  %s1324_s9 = inlined_call_operand.vmem [shape: f32[16,16], index: 9, kind: input, shape index: {}]   ;;  %s1325_s10 = inlined_call_operand.vmem [shape: f32[1,16], index: 10, kind: input, shape index: {}]   ;;  %s1326_s11 = inlined_call_operand.vmem [shape: f32[16,16], index: 11, kind: input, shape index: {}]   ;;  %s1327_s12 = inlined_call_operand.vmem [shape: f32[1,16], index: 12, kind: input, shape index: {}]   ;;  %s1328_s13 = inlined_call_operand.vmem [shape: f32[64,40], index: 13, kind: output, shape index: {}]  }
   0x1 LB: > { %s1069_s26 = sadd.s32 4294967295, %s1162_s25   ;;  %p1073_p0 = scmp.ge.s32.totalorder %s1162_s25, 1  ;;  %s1162_s25 = sphi %s1238_s25, %s23_s25  }
   0x2   : > { %p432_p1 = scmp.lt.s32.totalorder %s1162_s25, 5 }
   0x4   : > { %p433_p2 = pnand %p1073_p0, %p432_p1 }
   0x5   : > { %v659_v0 = vld [vmem:[%s1324_s9 + $0x8] sm:$0xff] (!%p433_p2)  ;;  %s1074_s29 = sshll.u32 (!%p433_p2), %s1069_s26, 1  ;;  %v658_v1 = vld [vmem:[%s1324_s9] sm:$0xff] (!%p433_p2)  ;;  %vm579_vm0 = vcmask (!%p433_p2), 1043456   ;;  %vm664_vm1 = vcmask (!%p433_p2), 64512   ;;  %vm572_vm2 = vcmask (!%p433_p2), 31744  }
   0x6   : > { %436 = sbr.rel (%p433_p2) target bundleno = 580 (0x244), region = 72  ;;  %v564_v2 = vld [vmem:[%s1322_s7] sm:$0xf] (!%p433_p2)  ;;  %1120 = vmatprep.subr.mxu1 (!%p433_p2), %v659_v0  ;;  %p497_p3 = scmp.lt.s32.totalorder (!%p433_p2), %s1074_s29, 7  ;;  %v839_v10 = vld [vmem:[%s1326_s11 + $0x8] sm:$0xff] (!%p433_p2)  ;;  %v1164_v12 = vmov (!%p433_p2), 0  }
   0x7   : > { %1121 = vmatpush3.msra.mxu1 (!%p433_p2), %v659_v0  ;;  %1115 = vmatprep.subr.msk.mxu0 (!%p433_p2), %vm579_vm0, %v564_v2  ;;  %v838_v9 = vld [vmem:[%s1326_s11] sm:$0xff] (!%p433_p2)  ;;  %s1165_s21 = smov (!%p433_p2), 8   ;;  %vm847_vm3 = vcmask (!%p433_p2), 130048   ;;  %s1166_s30 = smov (!%p433_p2), 16   ;;  %vm959_vm4 = vcmask (!%p433_p2), 261120   ;;  %vm962_vm5 = vcmask (!%p433_p2), 326656  }
   0x8   : > { %1125 = vmatprep.subr.mxu1 (!%p433_p2), %v658_v1  ;;  %1116 = vmatpush3.msk.msra.mxu0 (!%p433_p2), %vm579_vm0, %v564_v2  ;;  %v1137_v11 = vpack.c.bf16 (!%p433_p2), %v839_v10, %v838_v9  ;;  %v1088_v15 = vld [vmem:[%s1323_s8] ss:$0 sm:$0xff] (!%p433_p2)  ;;  %s1167_s14 = smov (!%p433_p2), 32  }
   0x9   : > { %1155 = vset.pattern.permute.xlu0 (!%p433_p2), %v1164_v12  ;;  %v1096_v20 = vld [vmem:[%s1325_s10] ss:$0 sm:$0xff] (!%p433_p2) }
   0xa   : > { %1138 = vmatprep.subr.bf16.mxu0 (!%p433_p2), %v1137_v11  ;;  %v1097_v27 = vld [vmem:[%s1327_s12] ss:$0 sm:$0xff] (!%p433_p2) }
   0xb   : > { %v1086_v36 = vld [vmem:[%s1320_s5] ss:$0 sm:$0xff] (!%p433_p2) }
   0xc   : > { %v1087_v40 = vld [vmem:[%s1321_s6] ss:$0 sm:$0xff] (!%p433_p2) }
   0xd   : > { %s1330_s29 = smov (!%p497_p3, %s1074_s29), 7 }
   0xe   : > { %s1255_s17 = sshll.u32 %s1330_s29, 3 }
   0xf   : > { %s518_s20 = scalar_lea.vmem %s1318_s3, %s1255_s17  ;;  %s512_s23 = scalar_lea.vmem %s1317_s2, %s1255_s17 }
  0x10   : > { %v662_v3 = vld [vmem:[%s518_s20] sm:$0xff]  ;;  %v663_v4 = vld [vmem:[%s518_s20 + $0x8] sm:$0xff]  ;;  %s506_s27 = scalar_lea.vmem %s1316_s1, %s1255_s17  ;;  %s500_s18 = scalar_lea.vmem %s1315_s0, %s1255_s17 }
  0x11   : > { %v660_v5 = vld [vmem:[%s512_s23] sm:$0xff]  ;;  %1122 = vmatprep.mubr.msk.f32.mxu1 %vm664_vm1, %v662_v3  ;;  %v563_v7 = vld [vmem:[%s506_s27 + $0x8] sm:$0xff]  ;;  %s524_s29 = scalar_lea.vmem %s1319_s4, %s1255_s17  ;;  %s530_s22 = scalar_lea.vmem %s1328_s13, %s1255_s17 }
  0x12   : > { %v562_v6 = vld [vmem:[%s506_s27] sm:$0xff]  ;;  %1123 = vmatmul.mubr.msk.f32.vlgmr.msra.gmra.mrb[0].mxu1 %vm664_vm1, %v663_v4  ;;  %v661_v8 = vld [vmem:[%s512_s23 + $0x8] sm:$0xff] }
  0x13   : > { %1117 = vmatprep.mubr.msk.f32.mxu0 %vm572_vm2, %v562_v6  ;;  %1126 = vmatpush3.msra.mxu1 %v658_v1  ;;  %v532_v13 = vld [vmem:[%s500_s18] sm:$0xff]  ;;  %v533_v14 = vld [vmem:[%s500_s18 + $0x8] sm:$0xff] }
  0x14   : > { %1127 = vmatprep.mubr.msk.f32.mxu1 %vm664_vm1, %v660_v5  ;;  %1118 = vmatmul.mubr.msk.f32.vlgmr.msra.gmra.mrb[0].mxu0 %vm572_vm2, %v563_v7  ;;  %v930_v32 = vld [vmem:[%s524_s29 + $0x8] sm:$0xff]  ;;  %v929_v33 = vld [vmem:[%s524_s29] sm:$0xff] }
  0x15   : > { %1140 = vmatpush3.bf16.msra.mxu0 %v1137_v11  ;;  %537 = vperm.xlu0 %1155, %v532_v13  }
  0x19   : > { %542 = vperm.xlu0 %1155, %v533_v14  }
  0x1a   : > { %1128 = vmatmul.mubr.msk.f32.vlgmr.msra.gmra.mrb[0].mxu1 %vm664_vm1, %v661_v8 }
  0x94   : > { %v538_v34 = vpop.permute.xlu0 %537 }
  0x95   : > { %v551_v38 = vmul.f32 %v1086_v36, %v538_v34 }
  0x97   : > { %v560_v42 = vadd.f32 %v1087_v40, %v551_v38 }
  0x98   : > { %v543_v37 = vpop.permute.xlu0 %542 }
  0x99   : > { %v552_v41 = vmul.f32 %v1086_v36, %v543_v37 }
  0x9b   : > { %v561_v44 = vadd.f32 %v1087_v40, %v552_v41 }
  0xe7   : > { %v1119_v16 = vpop.f32.mrb[0].mxu0 }
  0xe8   : > { %v655_v17 = vadd.f32 %v1119_v16, %v1088_v15  ;;  %v649_v18 = vpop.f32.mrb[1].mxu0 }
  0xe9   : > { %v650_v19 = vadd.f32 %v1088_v15, %v649_v18 }
  0xea   : > { %935 = vrot.lane.b32.xlu1 %v655_v17, %s1165_s21 }
  0xed   : > { %v1129_v21 = vpop.f32.mrb[0].mxu1 }
  0xee   : > { %v835_v22 = vadd.f32 %v1129_v21, %v1096_v20  ;;  %v818_v23 = vpop.f32.mrb[1].mxu1  ;;  %933 = vrot.lane.b32.xlu1 %v650_v19, %s1165_s21 }
  0xef   : > { %v834_v24 = vadd.f32 %v1096_v20, %v818_v23 }
  0xf0   : > { %v837_v26 = vmax.f32 %v835_v22, 0.0 }
  0xf1   : > { %v836_v25 = vmax.f32 %v834_v24, 0.0 }
  0xf3   : > { %1134 = vmatprep.mubr.msk.f32.mxu0 %vm847_vm3, %v836_v25 }
  0xf4   : > { %1135 = vmatmul.mubr.msk.f32.vlgmr.msra.gmra.mrb[2].mxu0 %vm847_vm3, %v837_v26 }
 0x15c   : > { %v936_v35 = vpop.permute.xlu1 %935 }
 0x15d   : > { %v956_v48 = vsel %vm664_vm1, %v561_v44, %v936_v35 }
 0x160   : > { %v934_v39 = vpop.permute.xlu1 %933 }
 0x161   : > { %v955_v46 = vsel %vm664_vm1, %v560_v42, %v934_v39 }
 0x1c7   : > { %v1136_v28 = vpop.f32.mrb[2].mxu0 }
 0x1c8   : > { %v926_v29 = vadd.f32 %v1136_v28, %v1097_v27  ;;  %v920_v30 = vpop.f32.mrb[3].mxu0 }
 0x1c9   : > { %v921_v31 = vadd.f32 %v1097_v27, %v920_v30 }
 0x1ca   : > { %943 = vrot.lane.b32.xlu1 %v926_v29, %s1166_s30 }
 0x1cb   : > { %941 = vrot.lane.b32.xlu0 %v921_v31, %s1166_s30 }
 0x1ce   : > { %951 = vrot.lane.b32.xlu1 %v930_v32, %s1167_s14 }
 0x1cf   : > { %949 = vrot.lane.b32.xlu0 %v929_v33, %s1167_s14 }
 0x23c   : > { %v944_v43 = vpop.permute.xlu1 %943 }
 0x23d   : > { %v942_v45 = vpop.permute.xlu0 %941  ;;  %v958_v51 = vsel %vm847_vm3, %v956_v48, %v944_v43 }
 0x23e   : > { %v957_v49 = vsel %vm847_vm3, %v955_v46, %v942_v45 }
 0x240   : > { %v952_v47 = vpop.permute.xlu1 %951 }
 0x241   : > { %v950_v50 = vpop.permute.xlu0 %949  ;;  %v961_v53 = vsel %vm959_vm4, %v958_v51, %v952_v47 }
 0x242   : > { %v960_v52 = vsel %vm959_vm4, %v957_v49, %v950_v50  ;;  %964 = vst.msk [vmem:[%s530_s22 + $0x8] sm:$0xff] %vm962_vm5, %v961_v53 }
 0x243   : > { %963 = vst.msk [vmem:[%s530_s22] sm:$0xff] %vm962_vm5, %v960_v52 }
 0x244 PF: > { %s23_s25 = sadd.s32 1, %s1162_s25  }
 0x245   : > { %p20_p4 = scmp.ge.s32.totalorder %s23_s25, 6  }
 0x247   :  { %22 = sbr.rel (!%p20_p4) target bundleno = 1 (0x1), region = 114 }

// kernel: _lambda_.8
= control target key start
LH: loop header
LB: loop body
LE: loop exit
PB: predicated region body
PF: predicated region fallthrough
CT: control target
= control target key end

     0   :  { %s1841_s18 = smov 0   ;;  %s2047_s0 = inlined_call_operand.vmem [shape: f32[64,32], index: 0, kind: input, shape index: {}]   ;;  %s2048_s1 = inlined_call_operand.vmem [shape: s32[16,1], index: 1, kind: input, shape index: {}]   ;;  %s2049_s2 = inlined_call_operand.vmem [shape: s32[1,16], index: 2, kind: input, shape index: {}]   ;;  %s2050_s3 = inlined_call_operand.vmem [shape: bf16[32,96], index: 3, kind: input, shape index: {}]   ;;  %s2051_s4 = inlined_call_operand.vmem [shape: f32[1,96], index: 4, kind: input, shape index: {}]   ;;  %s2052_s5 = inlined_call_operand.vmem [shape: bf16[32,32], index: 5, kind: input, shape index: {}]   ;;  %s2053_s6 = inlined_call_operand.vmem [shape: f32[1,32], index: 6, kind: input, shape index: {}]   ;;  %s2054_s7 = inlined_call_operand.vmem [shape: f32[1,32], index: 7, kind: input, shape index: {}]   ;;  %s2055_s8 = inlined_call_operand.vmem [shape: f32[1,32], index: 8, kind: input, shape index: {}]   ;;  %s2056_s9 = inlined_call_operand.vmem [shape: bf16[32,64], index: 9, kind: input, shape index: {}]   ;;  %s2057_s10 = inlined_call_operand.vmem [shape: f32[1,64], index: 10, kind: input, shape index: {}]   ;;  %s2058_s11 = inlined_call_operand.vmem [shape: bf16[64,32], index: 11, kind: input, shape index: {}]   ;;  %s2059_s12 = inlined_call_operand.vmem [shape: f32[1,32], index: 12, kind: input, shape index: {}]   ;;  %s2060_s13 = inlined_call_operand.vmem [shape: f32[1,32], index: 13, kind: input, shape index: {}]   ;;  %s2061_s14 = inlined_call_operand.vmem [shape: f32[1,32], index: 14, kind: input, shape index: {}]   ;;  %s2062_s15 = inlined_call_operand.vmem [shape: f32[64,32], index: 15, kind: output, shape index: {}]  }
   0x1 LB: > { %s1488_s19 = sadd.s32 4294967295, %s1742_s18   ;;  %p1492_p0 = scmp.ge.s32.totalorder %s1742_s18, 1  ;;  %s1742_s18 = sphi %s1841_s18, %s25_s18  }
   0x2   : > { %p438_p1 = scmp.lt.s32.totalorder %s1742_s18, 5 }
   0x4   : > { %p439_p2 = pnand %p1492_p0, %p438_p1 }
   0x5   : > { %v1686_v0 = vld [vmem:[%s2050_s3] sm:$0xff] (!%p439_p2)   ;;  %v1744_v1 = vmov (!%p439_p2), 0.0   ;;  %v1687_v2 = vld [vmem:[%s2050_s3 + $0x8] sm:$0xff] (!%p439_p2)   ;;  %vm1745_vm0 = vmmov (!%p439_p2), 0   ;;  %s1493_s24 = sshll.u32 (!%p439_p2), %s1488_s19, 1  ;;  %vm525_vm1 = vcmask (!%p439_p2), 261120  }
   0x6   : > { %442 = sbr.rel (%p439_p2) target bundleno = 2388 (0x954), region = 80  ;;  %1560 = vmatprep.subr.bf16.mxu0 (!%p439_p2), %v1744_v1  ;;  %1568 = vmatprep.subr.bf16.mxu1 (!%p439_p2), %v1744_v1  ;;  %p487_p3 = scmp.lt.s32.totalorder (!%p439_p2), %s1493_s24, 7  ;;  %v1746_v6 = vmov (!%p439_p2), 0   ;;  %v1497_v7 = vld [vmem:[%s2051_s4] ss:$0 sm:$0xff] (!%p439_p2)  ;;  %v575_v19 = vld [vmem:[%s2048_s1 + $0x8] sm:$0xff] (!%p439_p2) }
   0x7   : > { %1561 = vmatpush3.bf16.msra.mxu0 (!%p439_p2), %v1686_v0  ;;  %1564 = vmatprep.mubr.msk.bf16.mxu0 (!%p439_p2), %vm1745_vm0, %v1744_v1  ;;  %s1747_s16 = smov (!%p439_p2), 96   ;;  %s1748_s17 = smov (!%p439_p2), 120   ;;  %v574_v18 = vld [vmem:[%s2048_s1] sm:$0xff] (!%p439_p2)  ;;  %vm592_vm2 = vcmask (!%p439_p2), 64512   ;;  %vm642_vm4 = vcmask (!%p439_p2), 130048   ;;  %vm1111_vm6 = vcmask (!%p439_p2), 195584  }
   0x8   : > { %1562 = vmatprep.subr.bf16.mxu0 (!%p439_p2), %v1744_v1  ;;  %1570 = vmatprep.mubr.msk.bf16.mxu1 (!%p439_p2), %vm1745_vm0, %v1744_v1  ;;  %s1749_s19 = smov (!%p439_p2), 88   ;;  %s1750_s20 = smov (!%p439_p2), 80   ;;  %v1501_v33 = vld [vmem:[%s2049_s2] ss:$0 sm:$0xff] (!%p439_p2)  ;;  %vm1339_vm7 = vcmask (!%p439_p2), 523264  }
   0x9   : > { %1669 = vset.pattern.permute.xlu1 (!%p439_p2), %v1746_v6  ;;  %1670 = vset.pattern.permute.xlu0 (!%p439_p2), %v1746_v6  ;;  %s1751_s21 = smov (!%p439_p2), 112   ;;  %s1752_s22 = smov (!%p439_p2), 72  }
   0xa   : > { %s1753_s27 = smov (!%p439_p2), 104   ;;  %s1758_s26 = smov (!%p439_p2), 8  }
   0xb   : > { %1563 = vmatpush3.bf16.msra.mxu0 (!%p439_p2), %v1687_v2  ;;  %s1759_s29 = smov (!%p439_p2), 16   ;;  %s1760_s30 = smov (!%p439_p2), 24  }
   0xc   : > { %1574 = vmatprep.subr.bf16.mxu0 (!%p439_p2), %v1744_v1 }
   0xd   : > { %s2064_s24 = smov (!%p487_p3, %s1493_s24), 7 }
   0xe   : > { %s1494_s25 = sshll.u32 %s2064_s24, 3 }
   0xf   : > { %s490_s28 = scalar_lea.vmem %s2047_s0, %s1494_s25 }
  0x10   : > { %v1871_v3 = vld [vmem:[%s490_s28] sm:$0xff]  ;;  %v1873_v4 = vld [vmem:[%s490_s28 + $0x8] sm:$0xff]  ;;  %s1754_s28 = smov 64  }
  0x11   : > { %v501_v5 = vpack.c.bf16 %v1873_v4, %v1871_v3 }
  0x13   : > { %1565 = vmatmul.mubr.msk.bf16.vlgmr.msra.gmra.mrb[0].mxu0 %vm525_vm1, %v501_v5 }
  0x14   : > { %1576 = vmatprep.mubr.msk.bf16.mxu0 %vm1745_vm0, %v1744_v1 }
  0xe6   : > { %v563_v8 = vpop.f32.mrb[0].mxu0 }
  0xe7   : > { %v564_v9 = vadd.f32 %v1497_v7, %v563_v8  ;;  %v1566_v10 = vpop.f32.mrb[1].mxu0 }
  0xe8   : > { %v566_v11 = vpop.f32.mrb[2].mxu0 }
  0xe9   : > { %v567_v12 = vadd.f32 %v1497_v7, %v566_v11  ;;  %v1567_v13 = vpop.f32.mrb[3].mxu0  ;;  %v570_v14 = vmul.f32 0.35355338, %v564_v9 }
  0xeb   : > { %v571_v15 = vmul.f32 0.35355338, %v567_v12  ;;  %v1883_v16 = vpack.c.bf16 %v567_v12, %v564_v9 }
  0xed   : > { %v572_v17 = vpack.c.bf16 %v571_v15, %v570_v14  ;;  %590 = vrot.lane.b32.xlu0 %v1883_v16, %s1747_s16 }
  0xef   : > { %714 = vrot.lane.b32.xlu1 %v572_v17, %s1748_s17 }
  0xf1   : > { %716 = vrot.lane.b32.xlu0 %v1883_v16, %s1749_s19  ;;  %s1755_s19 = smov 48  }
  0xf3   : > { %839 = vrot.lane.b32.xlu1 %v1883_v16, %s1750_s20  ;;  %s1756_s20 = smov 40  }
  0xf5   : > { %837 = vrot.lane.b32.xlu0 %v572_v17, %s1751_s21  ;;  %s1757_s21 = smov 56  }
  0xf7   : > { %962 = vrot.lane.b32.xlu1 %v1883_v16, %s1752_s22 }
  0xf9   : > { %960 = vrot.lane.b32.xlu0 %v572_v17, %s1753_s27 }
  0xfb   : > { %578 = vperm.xlu1 %1669, %v574_v18  }
  0xfd   : > { %581 = vperm.xlu0 %1670, %v575_v19  }
  0xff   : > { %664 = vrot.lane.b32.xlu1 %v1883_v16, %s1754_s28 }
 0x15f   : > { %v591_v20 = vpop.permute.xlu0 %590 }
 0x160   : > { %v597_v21 = vsel %vm592_vm2, %v591_v20, 0 }
 0x161   : > { %1569 = vmatpush3.bf16.xpose.msra.mxu1 %v597_v21  ;;  %v715_v23 = vpop.permute.xlu1 %714 }
 0x162   : > { %1580 = vmatprep.subr.bf16.mxu1 %v1744_v1 }
 0x163   : > { %v717_v22 = vpop.permute.xlu0 %716 }
 0x164   : > { %v722_v24 = vsel %vm592_vm2, %v717_v22, 0 }
 0x165   : > { %v840_v25 = vpop.permute.xlu1 %839 }
 0x166   : > { %v845_v26 = vsel %vm592_vm2, %v840_v25, 0 }
 0x167   : > { %v838_v28 = vpop.permute.xlu0 %837 }
 0x168   : > { %1571 = vmatmul.mubr.msk.bf16.vlgmr.msra.gmra.mrb[0].mxu1 %vm592_vm2, %v572_v17 }
 0x169   : > { %1581 = vmatpush3.bf16.xpose.msra.mxu1 %v722_v24  ;;  %1582 = vmatprep.mubr.msk.bf16.mxu1 %vm1745_vm0, %v1744_v1  ;;  %v963_v27 = vpop.permute.xlu1 %962 }
 0x16a   : > { %1592 = vmatprep.subr.bf16.mxu1 %v1744_v1  ;;  %v968_v29 = vsel %vm592_vm2, %v963_v27, 0 }
 0x16b   : > { %v961_v32 = vpop.permute.xlu0 %960 }
 0x170   : > { %1583 = vmatmul.mubr.msk.bf16.vlgmr.msra.gmra.mrb[4].mxu1 %vm592_vm2, %v715_v23 }
 0x171   : > { %1593 = vmatpush3.bf16.xpose.msra.mxu1 %v845_v26  ;;  %1594 = vmatprep.mubr.msk.bf16.mxu1 %vm1745_vm0, %v1744_v1 }
 0x172   : > { %1604 = vmatprep.subr.bf16.mxu1 %v1744_v1 }
 0x178   : > { %1595 = vmatmul.mubr.msk.bf16.vlgmr.msra.gmra.mrb[8].mxu1 %vm592_vm2, %v838_v28 }
 0x179   : > { %1605 = vmatpush3.bf16.xpose.msra.mxu1 %v968_v29  ;;  %1606 = vmatprep.mubr.msk.bf16.mxu1 %vm1745_vm0, %v1744_v1 }
 0x17a   : > { %v579_v30 = vpop.permute.xlu1 %578  ;;  %1616 = vmatprep.subr.bf16.mxu1 %v1744_v1 }
 0x17b   : > { %vm587_vm3 = vcmp.eq.s32.totalorder %v579_v30, %v1501_v33 }
 0x17c   : > { %v582_v34 = vpop.permute.xlu0 %581 }
 0x17d   : > { %vm588_vm5 = vcmp.eq.s32.totalorder %v582_v34, %v1501_v33 }
 0x17e   : > { %v665_v31 = vpop.permute.xlu1 %664 }
 0x17f   : > { %1575 = vmatpush3.bf16.msra.mxu0 %v665_v31 }
 0x180   : > { %1607 = vmatmul.mubr.msk.bf16.vlgmr.msra.gmra.mrb[12].mxu1 %vm592_vm2, %v961_v32  ;;  %1586 = vmatprep.subr.bf16.mxu0 %v1744_v1 }
 0x181   : > { %1620 = vmatprep.mubr.msk.bf16.mxu1 %vm1745_vm0, %v1744_v1 }
 0x23b   : > { %v633_v35 = vpop.f32.mrb[0].mxu1 }
 0x23c   : > { %v640_v36 = vsel %vm587_vm3, %v633_v35, -1e+30  ;;  %v1572_v37 = vpop.f32.mrb[1].mxu1 }
 0x23d   : > { %v636_v38 = vpop.f32.mrb[2].mxu1  ;;  %v643_v39 = vsel %vm642_vm4, %v640_v36, -inf }
 0x23e   : > { %v641_v40 = vsel %vm588_vm5, %v636_v38, -1e+30  ;;  %644 = vmax.xlane.f32.xlu1 %v643_v39  ;;  %v1573_v41 = vpop.f32.mrb[3].mxu1 }
 0x23f   : > { %v646_v42 = vsel %vm642_vm4, %v641_v40, -inf }
 0x240   : > { %647 = vmax.xlane.f32.xlu0 %v646_v42 }
 0x243   : > { %v758_v43 = vpop.f32.mrb[4].mxu1 }
 0x244   : > { %v765_v44 = vsel %vm587_vm3, %v758_v43, -1e+30  ;;  %v1584_v45 = vpop.f32.mrb[5].mxu1 }
 0x245   : > { %v761_v46 = vpop.f32.mrb[6].mxu1  ;;  %v767_v47 = vsel %vm642_vm4, %v765_v44, -inf }
 0x246   : > { %v766_v48 = vsel %vm588_vm5, %v761_v46, -1e+30  ;;  %768 = vmax.xlane.f32.xlu1 %v767_v47  ;;  %v1585_v49 = vpop.f32.mrb[7].mxu1 }
 0x247   : > { %v770_v50 = vsel %vm642_vm4, %v766_v48, -inf }
 0x248   : > { %771 = vmax.xlane.f32.xlu0 %v770_v50 }
 0x24b   : > { %v881_v51 = vpop.f32.mrb[8].mxu1 }
 0x24c   : > { %v888_v52 = vsel %vm587_vm3, %v881_v51, -1e+30  ;;  %v1596_v53 = vpop.f32.mrb[9].mxu1 }
 0x24d   : > { %v884_v54 = vpop.f32.mrb[10].mxu1  ;;  %v890_v55 = vsel %vm642_vm4, %v888_v52, -inf }
 0x24e   : > { %v889_v56 = vsel %vm588_vm5, %v884_v54, -1e+30  ;;  %891 = vmax.xlane.f32.xlu1 %v890_v55  ;;  %v1597_v57 = vpop.f32.mrb[11].mxu1 }
 0x24f   : > { %v893_v58 = vsel %vm642_vm4, %v889_v56, -inf }
 0x250   : > { %894 = vmax.xlane.f32.xlu0 %v893_v58 }
 0x253   : > { %v1004_v59 = vpop.f32.mrb[12].mxu1 }
 0x254   : > { %v1011_v60 = vsel %vm587_vm3, %v1004_v59, -1e+30  ;;  %v1608_v61 = vpop.f32.mrb[13].mxu1 }
 0x255   : > { %v1007_v62 = vpop.f32.mrb[14].mxu1  ;;  %v1013_v63 = vsel %vm642_vm4, %v1011_v60, -inf }
 0x256   : > { %v1012_v0 = vsel %vm588_vm5, %v1007_v62, -1e+30  ;;  %1014 = vmax.xlane.f32.xlu1 %v1013_v63  ;;  %v1609_v2 = vpop.f32.mrb[15].mxu1 }
 0x257   : > { %v1016_v5 = vsel %vm642_vm4, %v1012_v0, -inf }
 0x258   : > { %1017 = vmax.xlane.f32.xlu0 %v1016_v5 }
 0x267   : > { %911 = vrot.lane.b32.xlu1 %v1883_v16, %s1755_s19 }
 0x26b   : > { %1034 = vrot.lane.b32.xlu1 %v1883_v16, %s1756_s20 }
 0x26e   : > { %788 = vrot.lane.b32.xlu0 %v1883_v16, %s1757_s21  ;;  %s496_s21 = scalar_lea.vmem %s2062_s15, %s1494_s25 }
 0x2cb   : > { %v645_v6 = vpop.xlane.xlu1 %644 }
 0x2cc   : > { %v649_v7 = vsub.f32 %v640_v36, %v645_v6 }
 0x2cd   : > { %v648_v8 = vpop.xlane.xlu0 %647 }
 0x2ce   : > { %v651_v9 = vmul.f32 1.442695, %v649_v7  ;;  %v650_v10 = vsub.f32 %v641_v40, %v648_v8 }
 0x2d0   : > { %v653_v11 = vmul.f32 1.442695, %v650_v10  ;;  %1696 = vpow2.f32 %v651_v9  ;;  %v1688_v9 = vld [vmem:[%s2052_s5] sm:$0xff]  }
 0x2d1   : > { %1617 = vmatpush3.bf16.msra.mxu1 %v1688_v9 }
 0x2d2   : > { %1698 = vpow2.f32 %v653_v11  ;;  %1618 = vmatprep.subr.bf16.mxu1 %v1744_v1 }
 0x2d3   : > { %v769_v12 = vpop.xlane.xlu1 %768 }
 0x2d4   : > { %v773_v13 = vsub.f32 %v765_v44, %v769_v12 }
 0x2d5   : > { %v772_v14 = vpop.xlane.xlu0 %771 }
 0x2d6   : > { %v775_v15 = vmul.f32 1.442695, %v773_v13  ;;  %v774_v17 = vsub.f32 %v766_v48, %v772_v14 }
 0x2d8   : > { %1700 = vpow2.f32 %v775_v15  ;;  %v777_v18 = vmul.f32 1.442695, %v774_v17 }
 0x2da   : > { %1702 = vpow2.f32 %v777_v18  ;;  %v1697_v19 = vpop.eup %1696 }
 0x2db   : > { %v892_v20 = vpop.xlane.xlu1 %891  ;;  %v655_v50 = vsel %vm642_vm4, %v1697_v19, 0.0 }
 0x2dc   : > { %v1699_v21 = vpop.eup %1698  ;;  %v896_v16 = vsub.f32 %v888_v52, %v892_v20 }
 0x2dd   : > { %v895_v22 = vpop.xlane.xlu0 %894  ;;  %v663_v23 = vpack.c.bf16 %v1699_v21, %v1697_v19  ;;  %v658_v51 = vsel %vm642_vm4, %v1699_v21, 0.0  ;;  %v1689_v21 = vld [vmem:[%s2052_s5 + $0x8] sm:$0xff]  }
 0x2de   : > { %v898_v24 = vmul.f32 1.442695, %v896_v16  ;;  %v897_v25 = vsub.f32 %v889_v56, %v895_v22  ;;  %1619 = vmatpush3.bf16.msra.mxu1 %v1689_v21 }
 0x2df   : > { %1577 = vmatmul.mubr.msk.bf16.vlgmr.msra.gmra.mrb[4].mxu0 %vm642_vm4, %v663_v23  ;;  %1632 = vmatprep.subr.bf16.mxu1 %v1744_v1 }
 0x2e0   : > { %1704 = vpow2.f32 %v898_v24  ;;  %v900_v26 = vmul.f32 1.442695, %v897_v25  ;;  %1588 = vmatprep.mubr.msk.bf16.mxu0 %vm1745_vm0, %v1744_v1 }
 0x2e2   : > { %v1701_v27 = vpop.eup %1700  ;;  %1706 = vpow2.f32 %v900_v26 }
 0x2e3   : > { %v1015_v28 = vpop.xlane.xlu1 %1014  ;;  %v779_v29 = vsel %vm642_vm4, %v1701_v27, 0.0 }
 0x2e4   : > { %v1703_v30 = vpop.eup %1702  ;;  %v1019_v31 = vsub.f32 %v1011_v60, %v1015_v28  ;;  %780 = vadd.xlane.f32.xlu0 %v779_v29 }
 0x2e5   : > { %v1018_v32 = vpop.xlane.xlu0 %1017  ;;  %v782_v33 = vsel %vm642_vm4, %v1703_v30, 0.0  ;;  %v787_v40 = vpack.c.bf16 %v1703_v30, %v1701_v27 }
 0x2e6   : > { %v1021_v34 = vmul.f32 1.442695, %v1019_v31  ;;  %v1020_v35 = vsub.f32 %v1012_v0, %v1018_v32  ;;  %783 = vadd.xlane.f32.xlu1 %v782_v33 }
 0x2e7   : > { %v912_v42 = vpop.permute.xlu1 %911 }
 0x2e8   : > { %1708 = vpow2.f32 %v1021_v34  ;;  %v1023_v36 = vmul.f32 1.442695, %v1020_v35 }
 0x2e9   : > { %v789_v37 = vpop.permute.xlu0 %788 }
 0x2ea   : > { %v1705_v38 = vpop.eup %1704  ;;  %1710 = vpow2.f32 %v1023_v36  ;;  %1587 = vmatpush3.bf16.msra.mxu0 %v789_v37 }
 0x2eb   : > { %v902_v39 = vsel %vm642_vm4, %v1705_v38, 0.0  ;;  %1598 = vmatprep.subr.bf16.mxu0 %v1744_v1  ;;  %v1035_v48 = vpop.permute.xlu1 %1034 }
 0x2ec   : > { %v1707_v41 = vpop.eup %1706  ;;  %903 = vadd.xlane.f32.xlu0 %v902_v39 }
 0x2ed   : > { %1589 = vmatmul.mubr.msk.bf16.vlgmr.msra.gmra.mrb[8].mxu0 %vm642_vm4, %v787_v40  ;;  %v905_v43 = vsel %vm642_vm4, %v1707_v41, 0.0  ;;  %v910_v46 = vpack.c.bf16 %v1707_v41, %v1705_v38 }
 0x2ee   : > { %1599 = vmatpush3.bf16.msra.mxu0 %v912_v42  ;;  %1600 = vmatprep.mubr.msk.bf16.mxu0 %vm1745_vm0, %v1744_v1 }
 0x2ef   : > { %1610 = vmatprep.subr.bf16.mxu0 %v1744_v1 }
 0x2f0   : > { %906 = vadd.xlane.f32.xlu0 %v905_v43 }
 0x2f2   : > { %v1709_v44 = vpop.eup %1708 }
 0x2f3   : > { %v1025_v45 = vsel %vm642_vm4, %v1709_v44, 0.0 }
 0x2f4   : > { %v1711_v47 = vpop.eup %1710  ;;  %1026 = vadd.xlane.f32.xlu1 %v1025_v45 }
 0x2f5   : > { %1601 = vmatmul.mubr.msk.bf16.vlgmr.msra.gmra.mrb[12].mxu0 %vm642_vm4, %v910_v46  ;;  %v1028_v49 = vsel %vm642_vm4, %v1711_v47, 0.0  ;;  %v1033_v52 = vpack.c.bf16 %v1711_v47, %v1709_v44 }
 0x2f6   : > { %1611 = vmatpush3.bf16.msra.mxu0 %v1035_v48  ;;  %1029 = vadd.xlane.f32.xlu0 %v1028_v49 }
 0x2f7   : > { %1612 = vmatprep.mubr.msk.bf16.mxu0 %vm1745_vm0, %v1744_v1  ;;  %1624 = vmatprep.subr.bf16.mxu0 %v1744_v1 }
 0x2f8   : > { %656 = vadd.xlane.f32.xlu1 %v655_v50 }
 0x2fa   : > { %659 = vadd.xlane.f32.xlu0 %v658_v51 }
 0x2fd   : > { %1613 = vmatmul.mubr.msk.bf16.vlgmr.msra.gmra.mrb[16].mxu0 %vm642_vm4, %v1033_v52 }
 0x2fe   : > { %1628 = vmatprep.mubr.msk.bf16.mxu0 %vm1745_vm0, %v1744_v1 }
 0x371   : > { %v781_v54 = vpop.xlane.xlu0 %780 }
 0x372   : > { %1712 = vrcp.f32 %v781_v54 }
 0x373   : > { %v784_v57 = vpop.xlane.xlu1 %783 }
 0x374   : > { %1714 = vrcp.f32 %v784_v57 }
 0x379   : > { %v904_v59 = vpop.xlane.xlu0 %903 }
 0x37a   : > { %1716 = vrcp.f32 %v904_v59 }
 0x37c   : > { %v1713_v62 = vpop.eup %1712 }
 0x37d   : > { %v907_v60 = vpop.xlane.xlu0 %906 }
 0x37e   : > { %1718 = vrcp.f32 %v907_v60  ;;  %v1715_v0 = vpop.eup %1714 }
 0x381   : > { %v1027_v8 = vpop.xlane.xlu1 %1026 }
 0x382   : > { %1720 = vrcp.f32 %v1027_v8 }
 0x383   : > { %v1030_v10 = vpop.xlane.xlu0 %1029 }
 0x384   : > { %1722 = vrcp.f32 %v1030_v10  ;;  %v1717_v13 = vpop.eup %1716 }
 0x385   : > { %v657_v31 = vpop.xlane.xlu1 %656 }
 0x386   : > { %1724 = vrcp.f32 %v657_v31 }
 0x387   : > { %v660_v32 = vpop.xlane.xlu0 %659 }
 0x388   : > { %v1719_v15 = vpop.eup %1718  ;;  %1726 = vrcp.f32 %v660_v32  ;;  %v1694_v32 = vld [vmem:[%s2058_s11 + $0x10] sm:$0xff]  }
 0x38c   : > { %v1721_v23 = vpop.eup %1720 }
 0x38e   : > { %v1723_v25 = vpop.eup %1722 }
 0x390   : > { %v1725_v35 = vpop.eup %1724 }
 0x392   : > { %v1727_v38 = vpop.eup %1726 }
 0x3b2   : > { %v1962_v53 = vpop.f32.mrb[4].mxu0 }
 0x3b3   : > { %v1578_v55 = vpop.f32.mrb[5].mxu0  ;;  %v711_v41 = vmul.f32 %v1725_v35, %v1962_v53  ;;  %v1510_v53 = vld [vmem:[%s2053_s6] ss:$0 sm:$0xff] }
 0x3b4   : > { %v1964_v56 = vpop.f32.mrb[6].mxu0 }
 0x3b5   : > { %v1579_v58 = vpop.f32.mrb[7].mxu0  ;;  %v712_v42 = vmul.f32 %v1727_v38, %v1964_v56 }
 0x3c0   : > { %v828_v61 = vpop.f32.mrb[8].mxu0 }
 0x3c1   : > { %v1590_v63 = vpop.f32.mrb[9].mxu0  ;;  %v835_v5 = vmul.f32 %v1713_v62, %v828_v61 }
 0x3c2   : > { %v831_v2 = vpop.f32.mrb[10].mxu0 }
 0x3c3   : > { %v836_v6 = vmul.f32 %v1715_v0, %v831_v2  ;;  %v1591_v7 = vpop.f32.mrb[11].mxu0 }
 0x3c5   : > { %v1671_v11 = vpack.i.bf16 %v836_v6, %v835_v5 }
 0x3c7   : > { %1672 = vrot.lane.b32.xlu1 %v1671_v11, %s1758_s26 }
 0x3c8   : > { %v951_v12 = vpop.f32.mrb[12].mxu0 }
 0x3c9   : > { %v1602_v14 = vpop.f32.mrb[13].mxu0  ;;  %v958_v18 = vmul.f32 %v1717_v13, %v951_v12  ;;  %v1691_v12 = vld [vmem:[%s2056_s9 + $0x8] sm:$0xff]   ;;  %v1692_v13 = vld [vmem:[%s2058_s11] sm:$0xff]  }
 0x3ca   : > { %v954_v17 = vpop.f32.mrb[14].mxu0  ;;  %v1693_v14 = vld [vmem:[%s2058_s11 + $0x8] sm:$0xff]  }
 0x3cb   : > { %v959_v19 = vmul.f32 %v1719_v15, %v954_v17  ;;  %v1603_v20 = vpop.f32.mrb[15].mxu0 }
 0x3cd   : > { %v1676_v16 = vpack.i.bf16 %v959_v19, %v958_v18 }
 0x3cf   : > { %1677 = vrot.lane.b32.xlu0 %v1676_v16, %s1759_s29 }
 0x3d0   : > { %v1074_v22 = vpop.f32.mrb[16].mxu0 }
 0x3d1   : > { %v1614_v24 = vpop.f32.mrb[17].mxu0  ;;  %v1081_v27 = vmul.f32 %v1721_v23, %v1074_v22  ;;  %v1514_v22 = vld [vmem:[%s2054_s7] ss:$0 sm:$0xff] }
 0x3d2   : > { %v1077_v26 = vpop.f32.mrb[18].mxu0 }
 0x3d3   : > { %v1082_v28 = vmul.f32 %v1723_v25, %v1077_v26  ;;  %v1615_v29 = vpop.f32.mrb[19].mxu0 }
 0x3d5   : > { %v1681_v30 = vpack.i.bf16 %v1082_v28, %v1081_v27  ;;  %v1515_v27 = vld [vmem:[%s2055_s8] ss:$0 sm:$0xff] }
 0x3d7   : > { %1682 = vrot.lane.b32.xlu1 %v1681_v30, %s1760_s30 }
 0x439   : > { %v1673_v33 = vpop.permute.xlu1 %1672 }
 0x43a   : > { %v1675_v36 = vunpack.i.h.bf16 %v1673_v33  ;;  %v1674_v37 = vunpack.i.l.bf16 %v1673_v33  ;;  %v1695_v33 = vld [vmem:[%s2058_s11 + $0x18] sm:$0xff]  }
 0x43c   : > { %v1108_v44 = vsel %vm592_vm2, %v712_v42, %v1675_v36  ;;  %v1107_v45 = vsel %vm592_vm2, %v711_v41, %v1674_v37 }
 0x441   : > { %v1678_v34 = vpop.permute.xlu0 %1677 }
 0x442   : > { %v1680_v39 = vunpack.i.h.bf16 %v1678_v34  ;;  %v1679_v40 = vunpack.i.l.bf16 %v1678_v34  ;;  %v1516_v34 = vld [vmem:[%s2057_s10] ss:$0 sm:$0xff] }
 0x444   : > { %v1110_v48 = vsel %vm642_vm4, %v1108_v44, %v1680_v39  ;;  %v1109_v49 = vsel %vm642_vm4, %v1107_v45, %v1679_v40 }
 0x449   : > { %v1683_v43 = vpop.permute.xlu1 %1682 }
 0x44a   : > { %v1685_v46 = vunpack.i.h.bf16 %v1683_v43  ;;  %v1684_v47 = vunpack.i.l.bf16 %v1683_v43 }
 0x44c   : > { %v1113_v50 = vsel %vm1111_vm6, %v1110_v48, %v1685_v46  ;;  %v1112_v51 = vsel %vm1111_vm6, %v1109_v49, %v1684_v47 }
 0x44d   : > { %v1114_v52 = vpack.c.bf16 %v1113_v50, %v1112_v51 }
 0x44f   : > { %1621 = vmatmul.mubr.msk.bf16.vlgmr.msra.gmra.mrb[16].mxu1 %vm525_vm1, %v1114_v52 }
 0x450   : > { %1640 = vmatprep.mubr.msk.bf16.mxu1 %vm1745_vm0, %v1744_v1  ;;  %1633 = vmatpush3.bf16.msra.mxu1 %v1692_v13 }
 0x451   : > { %1634 = vmatprep.subr.bf16.mxu1 %v1744_v1 }
 0x454   : > { %1635 = vmatpush3.bf16.msra.mxu1 %v1693_v14 }
 0x455   : > { %1636 = vmatprep.subr.bf16.mxu1 %v1744_v1 }
 0x458   : > { %1637 = vmatpush3.bf16.msra.mxu1 %v1694_v32 }
 0x459   : > { %1638 = vmatprep.subr.bf16.mxu1 %v1744_v1 }
 0x45c   : > { %1639 = vmatpush3.bf16.msra.mxu1 %v1695_v33 }
 0x522   : > { %v1175_v54 = vpop.f32.mrb[16].mxu1 }
 0x523   : > { %v1176_v55 = vadd.f32 %v1510_v53, %v1175_v54  ;;  %v1622_v56 = vpop.f32.mrb[17].mxu1 }
 0x524   : > { %v1178_v57 = vpop.f32.mrb[18].mxu1 }
 0x525   : > { %v1179_v58 = vadd.f32 %v1510_v53, %v1178_v57  ;;  %v1623_v59 = vpop.f32.mrb[19].mxu1  ;;  %v1182_v60 = vadd.f32 %v1176_v55, %v1871_v3 }
 0x527   : > { %v1186_v61 = vsel %vm525_vm1, %v1182_v60, 0.0  ;;  %v1183_v62 = vadd.f32 %v1179_v58, %v1873_v4  ;;  %v1690_v4 = vld [vmem:[%s2056_s9] sm:$0xff]  }
 0x528   : > { %1187 = vadd.xlane.f32.xlu1 %v1186_v61  ;;  %1625 = vmatpush3.bf16.msra.mxu0 %v1690_v4  ;;  %v1527_v4 = vld [vmem:[%s2061_s14] ss:$0 sm:$0xff] }
 0x529   : > { %v1189_v63 = vsel %vm525_vm1, %v1183_v62, 0.0  ;;  %1626 = vmatprep.subr.bf16.mxu0 %v1744_v1  ;;  %v1520_v1 = vld [vmem:[%s2059_s12] ss:$0 sm:$0xff] }
 0x52a   : > { %1190 = vadd.xlane.f32.xlu0 %v1189_v63 }
 0x52c   : > { %1627 = vmatpush3.bf16.msra.mxu0 %v1691_v12 }
 0x5b5   : > { %v1188_v0 = vpop.xlane.xlu1 %1187 }
 0x5b6   : > { %v1193_v2 = vmul.f32 0.03125, %v1188_v0 }
 0x5b7   : > { %v1191_v5 = vpop.xlane.xlu0 %1190 }
 0x5b8   : > { %v1195_v6 = vsub.f32 %v1182_v60, %v1193_v2  ;;  %v1194_v7 = vmul.f32 0.03125, %v1191_v5 }
 0x5ba   : > { %v1196_v8 = vsub.f32 %v1183_v62, %v1194_v7  ;;  %v1197_v9 = vmul.f32 %v1195_v6, %v1195_v6 }
 0x5bc   : > { %v1199_v10 = vsel %vm525_vm1, %v1197_v9, 0.0  ;;  %v1198_v11 = vmul.f32 %v1196_v8, %v1196_v8 }
 0x5bd   : > { %1200 = vadd.xlane.f32.xlu0 %v1199_v10  ;;  %v1526_v10 = vld [vmem:[%s2060_s13] ss:$0 sm:$0xff] }
 0x5be   : > { %v1202_v3 = vsel %vm525_vm1, %v1198_v11, 0.0 }
 0x5bf   : > { %1203 = vadd.xlane.f32.xlu1 %v1202_v3 }
 0x64a   : > { %v1201_v15 = vpop.xlane.xlu0 %1200 }
 0x64b   : > { %v1205_v17 = vmul.f32 0.03125, %v1201_v15 }
 0x64c   : > { %v1204_v18 = vpop.xlane.xlu1 %1203 }
 0x64d   : > { %v1207_v19 = vadd.f32 1e-05, %v1205_v17  ;;  %v1206_v20 = vmul.f32 0.03125, %v1204_v18 }
 0x64f   : > { %1728 = vrsqrt.f32 %v1207_v19  ;;  %v1208_v21 = vadd.f32 1e-05, %v1206_v20 }
 0x651   : > { %1730 = vrsqrt.f32 %v1208_v21 }
 0x659   : > { %v1729_v16 = vpop.eup %1728 }
 0x65a   : > { %v1211_v23 = vmul.f32 %v1729_v16, %v1195_v6 }
 0x65b   : > { %v1731_v24 = vpop.eup %1730 }
 0x65c   : > { %v1219_v25 = vmul.f32 %v1514_v22, %v1211_v23  ;;  %v1212_v26 = vmul.f32 %v1731_v24, %v1196_v8 }
 0x65e   : > { %v1220_v28 = vmul.f32 %v1514_v22, %v1212_v26  ;;  %v1227_v29 = vadd.f32 %v1515_v27, %v1219_v25 }
 0x660   : > { %v1228_v30 = vadd.f32 %v1515_v27, %v1220_v28 }
 0x662   : > { %v1229_v31 = vpack.c.bf16 %v1228_v30, %v1227_v29 }
 0x664   : > { %1629 = vmatmul.mubr.msk.bf16.vlgmr.msra.gmra.mrb[20].mxu0 %vm525_vm1, %v1229_v31 }
 0x737   : > { %v1290_v35 = vpop.f32.mrb[20].mxu0 }
 0x738   : > { %v1291_v36 = vadd.f32 %v1516_v34, %v1290_v35  ;;  %v1630_v37 = vpop.f32.mrb[21].mxu0 }
 0x739   : > { %v1293_v38 = vpop.f32.mrb[22].mxu0 }
 0x73a   : > { %v1294_v39 = vadd.f32 %v1516_v34, %v1293_v38  ;;  %v1631_v40 = vpop.f32.mrb[23].mxu0  ;;  %v1297_v41 = vmax.f32 %v1291_v36, 0.0 }
 0x73c   : > { %v1298_v42 = vmax.f32 %v1294_v39, 0.0 }
 0x73e   : > { %v1299_v43 = vpack.c.bf16 %v1298_v42, %v1297_v41 }
 0x740   : > { %1641 = vmatmul.mubr.msk.bf16.vlgmr.msra.gmra.mrb[20].mxu1 %vm1339_vm7, %v1299_v43 }
 0x813   : > { %v1377_v44 = vpop.f32.mrb[20].mxu1 }
 0x814   : > { %v1378_v45 = vadd.f32 %v1520_v1, %v1377_v44  ;;  %v1642_v46 = vpop.f32.mrb[21].mxu1 }
 0x815   : > { %v1380_v47 = vpop.f32.mrb[22].mxu1 }
 0x816   : > { %v1381_v48 = vadd.f32 %v1520_v1, %v1380_v47  ;;  %v1643_v49 = vpop.f32.mrb[23].mxu1  ;;  %v1384_v50 = vadd.f32 %v1378_v45, %v1227_v29 }
 0x818   : > { %v1388_v51 = vsel %vm525_vm1, %v1384_v50, 0.0  ;;  %v1385_v52 = vadd.f32 %v1381_v48, %v1228_v30 }
 0x819   : > { %1389 = vadd.xlane.f32.xlu0 %v1388_v51 }
 0x81a   : > { %v1391_v53 = vsel %vm525_vm1, %v1385_v52, 0.0 }
 0x81b   : > { %1392 = vadd.xlane.f32.xlu1 %v1391_v53 }
 0x8a6   : > { %v1390_v54 = vpop.xlane.xlu0 %1389 }
 0x8a7   : > { %v1394_v55 = vmul.f32 0.03125, %v1390_v54 }
 0x8a8   : > { %v1393_v56 = vpop.xlane.xlu1 %1392 }
 0x8a9   : > { %v1396_v57 = vsub.f32 %v1384_v50, %v1394_v55  ;;  %v1395_v58 = vmul.f32 0.03125, %v1393_v56 }
 0x8ab   : > { %v1397_v59 = vsub.f32 %v1385_v52, %v1395_v58  ;;  %v1398_v60 = vmul.f32 %v1396_v57, %v1396_v57 }
 0x8ad   : > { %v1400_v61 = vsel %vm525_vm1, %v1398_v60, 0.0  ;;  %v1399_v62 = vmul.f32 %v1397_v59, %v1397_v59 }
 0x8ae   : > { %1401 = vadd.xlane.f32.xlu0 %v1400_v61 }
 0x8af   : > { %v1403_v63 = vsel %vm525_vm1, %v1399_v62, 0.0 }
 0x8b0   : > { %1404 = vadd.xlane.f32.xlu1 %v1403_v63 }
 0x93b   : > { %v1402_v0 = vpop.xlane.xlu0 %1401 }
 0x93c   : > { %v1406_v2 = vmul.f32 0.03125, %v1402_v0 }
 0x93d   : > { %v1405_v5 = vpop.xlane.xlu1 %1404 }
 0x93e   : > { %v1408_v6 = vadd.f32 1e-05, %v1406_v2  ;;  %v1407_v7 = vmul.f32 0.03125, %v1405_v5 }
 0x940   : > { %1732 = vrsqrt.f32 %v1408_v6  ;;  %v1409_v8 = vadd.f32 1e-05, %v1407_v7 }
 0x942   : > { %1734 = vrsqrt.f32 %v1409_v8 }
 0x94a   : > { %v1733_v9 = vpop.eup %1732 }
 0x94b   : > { %v1412_v11 = vmul.f32 %v1733_v9, %v1396_v57 }
 0x94c   : > { %v1735_v3 = vpop.eup %1734 }
 0x94d   : > { %v1420_v12 = vmul.f32 %v1526_v10, %v1412_v11  ;;  %v1413_v13 = vmul.f32 %v1735_v3, %v1397_v59 }
 0x94f   : > { %v1428_v14 = vadd.f32 %v1527_v4, %v1420_v12  ;;  %v1421_v15 = vmul.f32 %v1526_v10, %v1413_v13 }
 0x951   : > { %1430 = vst.msk [vmem:[%s496_s21] sm:$0xff] %vm525_vm1, %v1428_v14  ;;  %v1429_v17 = vadd.f32 %v1527_v4, %v1421_v15 }
 0x953   : > { %1431 = vst.msk [vmem:[%s496_s21 + $0x8] sm:$0xff] %vm525_vm1, %v1429_v17 }
 0x954 PF: > { %s25_s18 = sadd.s32 1, %s1742_s18  }
 0x955   : > { %p22_p4 = scmp.ge.s32.totalorder %s25_s18, 6  }
 0x957   :  { %24 = sbr.rel (!%p22_p4) target bundleno = 1 (0x1), region = 110 }

// kernel: _lambda_.7
= control target key start
LH: loop header
LB: loop body
LE: loop exit
PB: predicated region body
PF: predicated region fallthrough
CT: control target
= control target key end

     0   :  { %v2651_v0 = vmov 0.0|0.0   ;;  %vm2652_vm0 = vmmov 0   ;;  %v2653_v4 = vmov 0.0   ;;  %vm52_vm1 = vcmask 326656   ;;  %s2654_s12 = smov 64   ;;  %s3097_s1 = inlined_call_operand.vmem [shape: f32[40,96], index: 1, kind: input, shape index: {}]   ;;  %s3098_s3 = inlined_call_operand.vmem [shape: f32[32,96], index: 3, kind: input, shape index: {}]   ;;  %s3099_s0 = inlined_call_operand.vmem [shape: f32[8,8,40], index: 0, kind: input, shape index: {}]   ;;  %s3100_s4 = inlined_call_operand.vmem [shape: f32[1,96], index: 4, kind: input, shape index: {}]   ;;  %s3101_s2 = inlined_call_operand.vmem [shape: f32[1,96], index: 2, kind: input, shape index: {}]   ;;  %s3102_s5 = inlined_call_operand.vmem [shape: f32[32,96], index: 5, kind: input, shape index: {}]   ;;  %s3103_s6 = inlined_call_operand.vmem [shape: f32[1,96], index: 6, kind: input, shape index: {}]   ;;  %s3104_s7 = inlined_call_operand.vmem [shape: f32[32,96], index: 7, kind: input, shape index: {}]   ;;  %s3105_s8 = inlined_call_operand.vmem [shape: f32[1,96], index: 8, kind: input, shape index: {}]   ;;  %s3106_s9 = inlined_call_operand.vmem [shape: f32[8,8,32], index: 9, kind: output, shape index: {}]  }
   0x1   :  { %2446 = vmatprep.subr.bf16.mxu1 %v2651_v0  ;;  %v40_v1 = vld [vmem:[%s3097_s1] sm:$0xff]  ;;  %v41_v2 = vld [vmem:[%s3097_s1 + $0x8] sm:$0xff]  ;;  %2250 = vmatprep.mubr.msk.f32.mxu1 %vm2652_vm0, %v2653_v4  ;;  %v42_v7 = vld [vmem:[%s3097_s1 + $0x10] sm:$0xff]  ;;  %vm182_vm2 = vcmask 785408   ;;  %vm203_vm3 = vcmask 261120  }
   0x2   :  { %v191_v3 = vld [vmem:[%s3098_s3] sm:$0xff]  ;;  %v2438_v5 = vpack.c.bf16 %v41_v2, %v40_v1  ;;  %v192_v6 = vld [vmem:[%s3098_s3 + $0x8] sm:$0xff]  ;;  %v43_v8 = vld [vmem:[%s3097_s1 + $0x18] sm:$0xff] }
   0x3   :  { %v2727_v9 = vpack.c.bf16 %v192_v6, %v191_v3  ;;  %v2442_v10 = vpack.c.bf16 %v43_v8, %v42_v7  ;;  %v193_v11 = vld [vmem:[%s3098_s3 + $0x10] sm:$0xff]  ;;  %v194_v12 = vld [vmem:[%s3098_s3 + $0x18] sm:$0xff]  ;;  %v32_v13 = vld [vmem:[%s3099_s0] sm:$0xff] }
   0x4   :  { %2439 = vmatprep.subr.bf16.mxu0 %v2438_v5  ;;  %v2739_v14 = vpack.c.bf16 %v194_v12, %v193_v11  ;;  %v44_v15 = vld [vmem:[%s3097_s1 + $0x20] sm:$0xff]  ;;  %2230 = vmatprep.mubr.msk.f32.mxu0 %vm52_vm1, %v32_v13  ;;  %v33_v16 = vld [vmem:[%s3099_s0 + $0x8] sm:$0xff]  ;;  %v34_v56 = vld [vmem:[%s3099_s0 + $0x10] sm:$0xff] }
   0x5   :  { %2448 = vmatpush3.bf16.msra.mxu1 %v2727_v9  ;;  %2441 = vmatpush3.bf16.msra.mxu0 %v2438_v5  ;;  %v2767_v17 = vld [vmem:[%s3100_s4] ss:$0 sm:$0xff]  ;;  %v35_v57 = vld [vmem:[%s3099_s0 + $0x18] sm:$0xff] }
   0x6   :  { %2449 = vmatprep.subr.bf16.mxu1 %v2651_v0  ;;  %2443 = vmatprep.subr.bf16.mxu0 %v2442_v10  ;;  %v2773_v21 = vld [vmem:[%s3101_s2] ss:$0 sm:$0xff]  ;;  %s2655_s2 = smov 96  }
   0x9   :  { %2451 = vmatpush3.bf16.msra.mxu1 %v2739_v14  ;;  %2445 = vmatpush3.bf16.msra.mxu0 %v2442_v10 }
   0xa   :  { %2228 = vmatprep.subr.mxu0 %v44_v15  ;;  %2452 = vmatprep.subr.bf16.mxu1 %v2651_v0 }
   0xc   :  { %2251 = vmatmul.mubr.f32.vlgmr.msra.gmra.mrb[0].mxu1 %v2653_v4 }
   0xd   :  { %2229 = vmatpush3.msra.mxu0 %v44_v15  ;;  %2454 = vmatpush3.bf16.msra.mxu1 %v2727_v9 }
   0xe   :  { %2231 = vmatmul.mubr.msk.f32.vlgmr.msra.gmra.mrb[0].mxu0 %vm52_vm1, %v33_v16  ;;  %2455 = vmatprep.subr.bf16.mxu1 %v2651_v0 }
   0xf   :  { %2261 = vmatprep.mubr.msk.f32.mxu1 %vm2652_vm0, %v2653_v4  ;;  %2464 = vmatprep.subr.bf16.mxu0 %v2651_v0 }
  0x10   :  { %2466 = vmatpush3.bf16.msra.mxu0 %v2727_v9  ;;  %2233 = vmatprep.mubr.msk.f32.mxu0 %vm52_vm1, %v34_v56 }
  0x11   :  { %2457 = vmatpush3.bf16.msra.mxu1 %v2739_v14  ;;  %2467 = vmatprep.subr.bf16.mxu0 %v2651_v0 }
  0x12   :  { %2458 = vmatprep.subr.bf16.mxu1 %v2651_v0  ;;  %2234 = vmatmul.mubr.msk.f32.gmra.mrb[2].mxu0 %vm52_vm1, %v35_v57 }
  0x14   :  { %2469 = vmatpush3.bf16.msra.mxu0 %v2739_v14 }
  0x15   :  { %2476 = vmatprep.subr.bf16.mxu0 %v2651_v0 }
  0xdf   :  { %v273_v18 = vpop.f32.mrb[0].mxu1 }
  0xe0   :  { %v274_v19 = vadd.f32 %v2767_v17, %v273_v18  ;;  %v2252_v20 = vpop.f32.mrb[1].mxu1 }
  0xe1   :  { %v2232_v22 = vpop.f32.mrb[0].mxu0 }
  0xe2   :  { %285 = vrot.lane.b32.xlu0 %v274_v19, %s2654_s12  ;;  %v149_v23 = vadd.f32 %v2232_v22, %v2773_v21  ;;  %v143_v24 = vpop.f32.mrb[1].mxu0 }
  0xe3   :  { %v144_v25 = vadd.f32 %v2773_v21, %v143_v24  ;;  %v36_v24 = vld [vmem:[%s3099_s0 + $0x20] sm:$0xff] }
  0xe4   :  { %184 = vst.msk [vmem:[#allocation3 + $0x8] sm:$0xff] %vm182_vm2, %v149_v23  ;;  %2236 = vmatprep.mubr.msk.f32.mxu0 %vm52_vm1, %v36_v24 }
  0xe5   :  { %183 = vst.msk [vmem:[#allocation3] sm:$0xff] %vm182_vm2, %v144_v25  ;;  %v2235_v1 = vpop.f32.mrb[2].mxu0  ;;  %v37_v25 = vld [vmem:[%s3099_s0 + $0x28] sm:$0xff] }
  0xe6   :  { %v159_v2 = vadd.f32 %v2235_v1, %v2773_v21  ;;  %v153_v3 = vpop.f32.mrb[3].mxu0  ;;  %2237 = vmatmul.mubr.msk.f32.gmra.mrb[4].mxu0 %vm52_vm1, %v37_v25 }
  0xe7   :  { %v154_v5 = vadd.f32 %v2773_v21, %v153_v3 }
  0xe8   :  { %186 = vst.msk [vmem:[#allocation3 + $0x18] sm:$0xff] %vm182_vm2, %v159_v2 }
  0xe9   :  { %185 = vst.msk [vmem:[#allocation3 + $0x10] sm:$0xff] %vm182_vm2, %v154_v5 }
  0xeb   :  { %v309_v46 = vld [vmem:[#allocation3 + $0x8] sm:$0xff] }
  0xec   :  { %v196_v26 = vld [vmem:[#allocation3] sm:$0xff] }
  0xed   :  { %v277_v27 = vadd.f32 %v274_v19, %v196_v26 }
  0xef   :  { %v2068_v28 = vmul.f32 -1.442695, %v277_v27  ;;  %v39_v27 = vld [vmem:[%s3099_s0 + $0x38] sm:$0xff] }
  0xf0   :  { %v415_v11 = vld [vmem:[#allocation3 + $0x10] sm:$0xff] }
  0xf1   :  { %2555 = vpow2.f32 %v2068_v28 }
  0xfb   :  { %v2556_v29 = vpop.eup %2555 }
  0xfc   :  { %v281_v30 = vadd.f32 1.0, %v2556_v29 }
  0xfe   :  { %2557 = vrcp.f32 %v281_v30 }
 0x108   :  { %v2558_v31 = vpop.eup %2557 }
 0x109   :  { %v295_v37 = vsub.f32 1.0, %v2558_v31  ;;  %v301_v39 = vmul.f32 0.0, %v2558_v31 }
 0x154   :  { %v286_v32 = vpop.permute.xlu0 %285 }
 0x155   :  { %v288_v33 = vmul.f32 %v2558_v31, %v286_v32 }
 0x157   :  { %290 = vrot.lane.b32.xlu0 %v288_v33, %s2654_s12 }
 0x1c9   :  { %v291_v34 = vpop.permute.xlu0 %290 }
 0x1ca   :  { %v293_v35 = vadd.f32 %v291_v34, %v196_v26  ;;  %v38_v26 = vld [vmem:[%s3099_s0 + $0x30] sm:$0xff]  ;;  %v2238_v34 = vpop.f32.mrb[4].mxu0 }
 0x1cb   :  { %2239 = vmatprep.mubr.msk.f32.mxu0 %vm52_vm1, %v38_v26 }
 0x1cc   :  { %2559 = vtanh.f32 %v293_v35  ;;  %2240 = vmatmul.mubr.msk.f32.gmra.mrb[6].mxu0 %vm52_vm1, %v39_v27  ;;  %v169_v35 = vadd.f32 %v2238_v34, %v2773_v21 }
 0x1cd   :  { %2283 = vmatprep.mubr.msk.f32.mxu0 %vm2652_vm0, %v2653_v4 }
 0x1ce   :  { %188 = vst.msk [vmem:[#allocation3 + $0x28] sm:$0xff] %vm182_vm2, %v169_v35  ;;  %v1058_v35 = vld [vmem:[%s3102_s5] sm:$0xff] }
 0x1d5   :  { %v733_v27 = vld [vmem:[#allocation3 + $0x28] sm:$0xff] }
 0x1d6   :  { %v2560_v36 = vpop.eup %2559 }
 0x1d7   :  { %297 = vrot.lane.b32.xlu1 %v2560_v36, %s2655_s2  ;;  %v163_v36 = vpop.f32.mrb[5].mxu0 }
 0x249   :  { %v298_v38 = vpop.permute.xlu1 %297 }
 0x24a   :  { %v300_v40 = vmul.f32 %v298_v38, %v295_v37  ;;  %v164_v37 = vadd.f32 %v2773_v21, %v163_v36  ;;  %v1059_v36 = vld [vmem:[%s3102_s5 + $0x8] sm:$0xff] }
 0x24c   :  { %v302_v41 = vadd.f32 %v301_v39, %v300_v40  ;;  %187 = vst.msk [vmem:[#allocation3 + $0x20] sm:$0xff] %vm182_vm2, %v164_v37  ;;  %v2494_v37 = vpack.c.bf16 %v1059_v36, %v1058_v35  ;;  %v2974_v35 = vld [vmem:[%s3105_s8] ss:$0 sm:$0xff] }
 0x24e   :  { %304 = vrot.lane.b32.xlu1 %v302_v41, %s2655_s2 }
 0x253   :  { %v627_v2 = vld [vmem:[#allocation3 + $0x20] sm:$0xff] }
 0x29f   :  { %v2241_v38 = vpop.f32.mrb[6].mxu0 }
 0x2a0   :  { %v179_v39 = vadd.f32 %v2241_v38, %v2773_v21  ;;  %v173_v40 = vpop.f32.mrb[7].mxu0 }
 0x2a2   :  { %190 = vst.msk [vmem:[#allocation3 + $0x38] sm:$0xff] %vm182_vm2, %v179_v39 }
 0x2c0   :  { %v305_v42 = vpop.permute.xlu1 %304 }
 0x2c1   :  { %307 = vst.msk [vmem:[#allocation2] sm:$0xff] %vm203_vm3, %v305_v42  ;;  %2262 = vmatmul.mubr.msk.f32.vlgmr.msra.gmra.mrb[2].mxu1 %vm203_vm3, %v305_v42 }
 0x2c2   :  { %2460 = vmatpush3.bf16.msra.mxu1 %v2727_v9  ;;  %2272 = vmatprep.mubr.msk.f32.mxu1 %vm2652_vm0, %v2653_v4 }
 0x2c3   :  { %2461 = vmatprep.subr.bf16.mxu1 %v2651_v0 }
 0x2c6   :  { %2463 = vmatpush3.bf16.msra.mxu1 %v2739_v14 }
 0x2c7   :  { %2470 = vmatprep.subr.bf16.mxu1 %v2651_v0 }
 0x394   :  { %v378_v43 = vpop.f32.mrb[2].mxu1 }
 0x395   :  { %v379_v44 = vadd.f32 %v2767_v17, %v378_v43  ;;  %v2263_v45 = vpop.f32.mrb[3].mxu1 }
 0x396   :  { %v521_v45 = vld [vmem:[#allocation3 + $0x18] sm:$0xff] }
 0x397   :  { %390 = vrot.lane.b32.xlu0 %v379_v44, %s2654_s12  ;;  %v382_v47 = vadd.f32 %v379_v44, %v309_v46 }
 0x399   :  { %v2070_v48 = vmul.f32 -1.442695, %v382_v47 }
 0x39b   :  { %2561 = vpow2.f32 %v2070_v48 }
 0x3a5   :  { %v2562_v49 = vpop.eup %2561 }
 0x3a6   :  { %v386_v50 = vadd.f32 1.0, %v2562_v49 }
 0x3a8   :  { %2563 = vrcp.f32 %v386_v50 }
 0x3b2   :  { %v2564_v51 = vpop.eup %2563 }
 0x3b3   :  { %v400_v59 = vsub.f32 1.0, %v2564_v51  ;;  %v406_v61 = vmul.f32 %v2564_v51, %v302_v41  ;;  %v174_v41 = vadd.f32 %v2773_v21, %v173_v40 }
 0x3b5   :  { %189 = vst.msk [vmem:[#allocation3 + $0x30] sm:$0xff] %vm182_vm2, %v174_v41 }
 0x409   :  { %v391_v52 = vpop.permute.xlu0 %390 }
 0x40a   :  { %v393_v53 = vmul.f32 %v2564_v51, %v391_v52 }
 0x40c   :  { %395 = vrot.lane.b32.xlu1 %v393_v53, %s2654_s12 }
 0x47e   :  { %v396_v54 = vpop.permute.xlu1 %395 }
 0x47f   :  { %v398_v55 = vadd.f32 %v396_v54, %v309_v46 }
 0x481   :  { %2565 = vtanh.f32 %v398_v55 }
 0x48b   :  { %v2566_v58 = vpop.eup %2565 }
 0x48c   :  { %402 = vrot.lane.b32.xlu0 %v2566_v58, %s2655_s2 }
 0x4fe   :  { %v403_v60 = vpop.permute.xlu0 %402 }
 0x4ff   :  { %v405_v62 = vmul.f32 %v403_v60, %v400_v59 }
 0x501   :  { %v407_v63 = vadd.f32 %v406_v61, %v405_v62 }
 0x503   :  { %409 = vrot.lane.b32.xlu1 %v407_v63, %s2655_s2 }
 0x575   :  { %v410_v6 = vpop.permute.xlu1 %409 }
 0x576   :  { %413 = vst.msk [vmem:[#allocation2 + $0x8] sm:$0xff] %vm203_vm3, %v410_v6  ;;  %2273 = vmatmul.mubr.msk.f32.vlgmr.msra.gmra.mrb[4].mxu1 %vm203_vm3, %v410_v6 }
 0x577   :  { %2472 = vmatpush3.bf16.msra.mxu1 %v2727_v9  ;;  %2294 = vmatprep.mubr.msk.f32.mxu1 %vm2652_vm0, %v2653_v4 }
 0x578   :  { %2473 = vmatprep.subr.bf16.mxu1 %v2651_v0 }
 0x57b   :  { %2475 = vmatpush3.bf16.msra.mxu1 %v2739_v14 }
 0x57c   :  { %2482 = vmatprep.subr.bf16.mxu1 %v2651_v0 }
 0x649   :  { %v484_v7 = vpop.f32.mrb[4].mxu1 }
 0x64a   :  { %v485_v8 = vadd.f32 %v2767_v17, %v484_v7  ;;  %v2274_v10 = vpop.f32.mrb[5].mxu1 }
 0x64c   :  { %496 = vrot.lane.b32.xlu0 %v485_v8, %s2654_s12  ;;  %v488_v12 = vadd.f32 %v485_v8, %v415_v11 }
 0x64e   :  { %v2072_v13 = vmul.f32 -1.442695, %v488_v12 }
 0x650   :  { %2567 = vpow2.f32 %v2072_v13 }
 0x65a   :  { %v2568_v15 = vpop.eup %2567 }
 0x65b   :  { %v492_v16 = vadd.f32 1.0, %v2568_v15 }
 0x65d   :  { %2569 = vrcp.f32 %v492_v16 }
 0x667   :  { %v2570_v18 = vpop.eup %2569 }
 0x668   :  { %v506_v29 = vsub.f32 1.0, %v2570_v18  ;;  %v512_v31 = vmul.f32 %v2570_v18, %v407_v63 }
 0x6be   :  { %v497_v19 = vpop.permute.xlu0 %496 }
 0x6bf   :  { %v499_v20 = vmul.f32 %v2570_v18, %v497_v19 }
 0x6c1   :  { %501 = vrot.lane.b32.xlu1 %v499_v20, %s2654_s12 }
 0x733   :  { %v502_v22 = vpop.permute.xlu1 %501 }
 0x734   :  { %v504_v23 = vadd.f32 %v502_v22, %v415_v11 }
 0x736   :  { %2571 = vtanh.f32 %v504_v23 }
 0x740   :  { %v2572_v28 = vpop.eup %2571 }
 0x741   :  { %508 = vrot.lane.b32.xlu0 %v2572_v28, %s2655_s2 }
 0x7b3   :  { %v509_v30 = vpop.permute.xlu0 %508 }
 0x7b4   :  { %v511_v32 = vmul.f32 %v509_v30, %v506_v29 }
 0x7b6   :  { %v513_v33 = vadd.f32 %v512_v31, %v511_v32 }
 0x7b8   :  { %515 = vrot.lane.b32.xlu1 %v513_v33, %s2655_s2 }
 0x82a   :  { %v516_v42 = vpop.permute.xlu1 %515 }
 0x82b   :  { %519 = vst.msk [vmem:[#allocation2 + $0x10] sm:$0xff] %vm203_vm3, %v516_v42  ;;  %2284 = vmatmul.mubr.msk.f32.vlgmr.msra.gmra.mrb[8].mxu0 %vm203_vm3, %v516_v42 }
 0x82c   :  { %2478 = vmatpush3.bf16.msra.mxu0 %v2727_v9  ;;  %2305 = vmatprep.mubr.msk.f32.mxu0 %vm2652_vm0, %v2653_v4 }
 0x82d   :  { %2479 = vmatprep.subr.bf16.mxu0 %v2651_v0 }
 0x830   :  { %2481 = vmatpush3.bf16.msra.mxu0 %v2739_v14 }
 0x831   :  { %2488 = vmatprep.subr.bf16.mxu0 %v2651_v0 }
 0x8fe   :  { %v590_v21 = vpop.f32.mrb[8].mxu0 }
 0x8ff   :  { %v591_v43 = vadd.f32 %v2767_v17, %v590_v21  ;;  %v2285_v44 = vpop.f32.mrb[9].mxu0 }
 0x900   :  { %v1061_v44 = vld [vmem:[%s3102_s5 + $0x18] sm:$0xff] }
 0x901   :  { %602 = vrot.lane.b32.xlu0 %v591_v43, %s2654_s12  ;;  %v594_v46 = vadd.f32 %v591_v43, %v521_v45  ;;  %v1060_v43 = vld [vmem:[%s3102_s5 + $0x10] sm:$0xff] }
 0x903   :  { %v2074_v47 = vmul.f32 -1.442695, %v594_v46 }
 0x905   :  { %2573 = vpow2.f32 %v2074_v47  ;;  %v1050_v47 = vld [vmem:[#allocation2] sm:$0xff] }
 0x90f   :  { %v2574_v48 = vpop.eup %2573 }
 0x910   :  { %v598_v49 = vadd.f32 1.0, %v2574_v48  ;;  %v1051_v48 = vld [vmem:[#allocation2 + $0x8] sm:$0xff] }
 0x912   :  { %2575 = vrcp.f32 %v598_v49  ;;  %v1052_v49 = vld [vmem:[#allocation2 + $0x10] sm:$0xff] }
 0x91c   :  { %v2576_v50 = vpop.eup %2575 }
 0x91d   :  { %v612_v56 = vsub.f32 1.0, %v2576_v50  ;;  %v618_v58 = vmul.f32 %v2576_v50, %v513_v33 }
 0x973   :  { %v603_v51 = vpop.permute.xlu0 %602 }
 0x974   :  { %v605_v52 = vmul.f32 %v2576_v50, %v603_v51 }
 0x976   :  { %607 = vrot.lane.b32.xlu1 %v605_v52, %s2654_s12 }
 0x9e8   :  { %v608_v53 = vpop.permute.xlu1 %607 }
 0x9e9   :  { %v610_v54 = vadd.f32 %v608_v53, %v521_v45  ;;  %v2498_v45 = vpack.c.bf16 %v1061_v44, %v1060_v43 }
 0x9eb   :  { %2577 = vtanh.f32 %v610_v54 }
 0x9f5   :  { %v2578_v55 = vpop.eup %2577 }
 0x9f6   :  { %614 = vrot.lane.b32.xlu0 %v2578_v55, %s2655_s2 }
 0xa68   :  { %v615_v57 = vpop.permute.xlu0 %614 }
 0xa69   :  { %v617_v59 = vmul.f32 %v615_v57, %v612_v56  ;;  %v2914_v56 = vld [vmem:[%s3103_s6] ss:$0 sm:$0xff] }
 0xa6b   :  { %v619_v60 = vadd.f32 %v618_v58, %v617_v59 }
 0xa6d   :  { %621 = vrot.lane.b32.xlu1 %v619_v60, %s2655_s2 }
 0xadf   :  { %v622_v61 = vpop.permute.xlu1 %621 }
 0xae0   :  { %625 = vst.msk [vmem:[#allocation2 + $0x18] sm:$0xff] %vm203_vm3, %v622_v61  ;;  %2295 = vmatmul.mubr.msk.f32.vlgmr.msra.gmra.mrb[6].mxu1 %vm203_vm3, %v622_v61 }
 0xae1   :  { %2484 = vmatpush3.bf16.msra.mxu1 %v2727_v9  ;;  %2316 = vmatprep.mubr.msk.f32.mxu1 %vm2652_vm0, %v2653_v4 }
 0xae2   :  { %2485 = vmatprep.subr.bf16.mxu1 %v2651_v0 }
 0xae5   :  { %2487 = vmatpush3.bf16.msra.mxu1 %v2739_v14 }
 0xae6   :  { %2495 = vmatprep.subr.bf16.mxu1 %v2494_v37 }
 0xae7   :  { %v1053_v50 = vld [vmem:[#allocation2 + $0x18] sm:$0xff] }
 0xbb3   :  { %v696_v62 = vpop.f32.mrb[6].mxu1 }
 0xbb4   :  { %v697_v63 = vadd.f32 %v2767_v17, %v696_v62  ;;  %v2296_v1 = vpop.f32.mrb[7].mxu1 }
 0xbb6   :  { %708 = vrot.lane.b32.xlu0 %v697_v63, %s2654_s12  ;;  %v700_v3 = vadd.f32 %v697_v63, %v627_v2 }
 0xbb8   :  { %v2076_v5 = vmul.f32 -1.442695, %v700_v3 }
 0xbba   :  { %2579 = vpow2.f32 %v2076_v5 }
 0xbc4   :  { %v2580_v6 = vpop.eup %2579 }
 0xbc5   :  { %v704_v7 = vadd.f32 1.0, %v2580_v6 }
 0xbc7   :  { %2581 = vrcp.f32 %v704_v7  ;;  %v839_v7 = vld [vmem:[#allocation3 + $0x30] sm:$0xff] }
 0xbd1   :  { %v2582_v8 = vpop.eup %2581 }
 0xbd2   :  { %v718_v16 = vsub.f32 1.0, %v2582_v8  ;;  %v724_v19 = vmul.f32 %v2582_v8, %v619_v60 }
 0xc28   :  { %v709_v10 = vpop.permute.xlu0 %708 }
 0xc29   :  { %v711_v11 = vmul.f32 %v2582_v8, %v709_v10 }
 0xc2b   :  { %713 = vrot.lane.b32.xlu1 %v711_v11, %s2654_s12 }
 0xc9d   :  { %v714_v12 = vpop.permute.xlu1 %713 }
 0xc9e   :  { %v716_v13 = vadd.f32 %v714_v12, %v627_v2 }
 0xca0   :  { %2583 = vtanh.f32 %v716_v13 }
 0xcaa   :  { %v2584_v15 = vpop.eup %2583 }
 0xcab   :  { %720 = vrot.lane.b32.xlu0 %v2584_v15, %s2655_s2 }
 0xd1d   :  { %v721_v18 = vpop.permute.xlu0 %720 }
 0xd1e   :  { %v723_v20 = vmul.f32 %v721_v18, %v718_v16 }
 0xd20   :  { %v725_v22 = vadd.f32 %v724_v19, %v723_v20 }
 0xd22   :  { %727 = vrot.lane.b32.xlu1 %v725_v22, %s2655_s2 }
 0xd94   :  { %v728_v23 = vpop.permute.xlu1 %727 }
 0xd95   :  { %731 = vst.msk [vmem:[#allocation2 + $0x20] sm:$0xff] %vm203_vm3, %v728_v23  ;;  %2306 = vmatmul.mubr.msk.f32.vlgmr.msra.gmra.mrb[10].mxu0 %vm203_vm3, %v728_v23  ;;  %v1207_v23 = vld [vmem:[%s3104_s7 + $0x8] sm:$0xff] }
 0xd96   :  { %2490 = vmatpush3.bf16.msra.mxu0 %v2727_v9  ;;  %2327 = vmatprep.mubr.msk.f32.mxu0 %vm2652_vm0, %v2653_v4 }
 0xd97   :  { %2491 = vmatprep.subr.bf16.mxu0 %v2651_v0 }
 0xd9a   :  { %2493 = vmatpush3.bf16.msra.mxu0 %v2739_v14 }
 0xd9b   :  { %2502 = vmatprep.subr.bf16.mxu0 %v2651_v0 }
 0xd9c   :  { %v1054_v51 = vld [vmem:[#allocation2 + $0x20] sm:$0xff] }
 0xe68   :  { %v802_v24 = vpop.f32.mrb[10].mxu0 }
 0xe69   :  { %v803_v25 = vadd.f32 %v2767_v17, %v802_v24  ;;  %v2307_v26 = vpop.f32.mrb[11].mxu0 }
 0xe6a   :  { %v1209_v26 = vld [vmem:[%s3104_s7 + $0x18] sm:$0xff] }
 0xe6b   :  { %814 = vrot.lane.b32.xlu0 %v803_v25, %s2654_s12  ;;  %v806_v28 = vadd.f32 %v803_v25, %v733_v27  ;;  %v1208_v25 = vld [vmem:[%s3104_s7 + $0x10] sm:$0xff] }
 0xe6d   :  { %v2078_v29 = vmul.f32 -1.442695, %v806_v28 }
 0xe6f   :  { %2585 = vpow2.f32 %v2078_v29 }
 0xe79   :  { %v2586_v9 = vpop.eup %2585 }
 0xe7a   :  { %v810_v30 = vadd.f32 1.0, %v2586_v9 }
 0xe7c   :  { %2587 = vrcp.f32 %v810_v30 }
 0xe86   :  { %v2588_v31 = vpop.eup %2587 }
 0xe87   :  { %v824_v39 = vsub.f32 1.0, %v2588_v31  ;;  %v830_v41 = vmul.f32 %v2588_v31, %v725_v22  ;;  %v1206_v22 = vld [vmem:[%s3104_s7] sm:$0xff] }
 0xe88   :  { %v2936_v24 = vpack.c.bf16 %v1207_v23, %v1206_v22 }
 0xedd   :  { %v815_v32 = vpop.permute.xlu0 %814 }
 0xede   :  { %v817_v33 = vmul.f32 %v2588_v31, %v815_v32 }
 0xee0   :  { %819 = vrot.lane.b32.xlu1 %v817_v33, %s2654_s12 }
 0xf52   :  { %v820_v14 = vpop.permute.xlu1 %819 }
 0xf53   :  { %v822_v34 = vadd.f32 %v820_v14, %v733_v27  ;;  %v2946_v27 = vpack.c.bf16 %v1209_v26, %v1208_v25 }
 0xf55   :  { %2589 = vtanh.f32 %v822_v34 }
 0xf5f   :  { %v2590_v38 = vpop.eup %2589 }
 0xf60   :  { %826 = vrot.lane.b32.xlu0 %v2590_v38, %s2655_s2 }
 0xfd2   :  { %v827_v40 = vpop.permute.xlu0 %826 }
 0xfd3   :  { %v829_v42 = vmul.f32 %v827_v40, %v824_v39 }
 0xfd5   :  { %v2890_v21 = vadd.f32 %v830_v41, %v829_v42 }
 0xfd7   :  { %833 = vrot.lane.b32.xlu1 %v2890_v21, %s2655_s2 }
0x1049   :  { %v834_v46 = vpop.permute.xlu1 %833 }
0x104a   :  { %837 = vst.msk [vmem:[#allocation2 + $0x28] sm:$0xff] %vm203_vm3, %v834_v46  ;;  %2317 = vmatmul.mubr.msk.f32.vlgmr.msra.gmra.mrb[8].mxu1 %vm203_vm3, %v834_v46 }
0x104b   :  { %2497 = vmatpush3.bf16.msra.mxu1 %v2494_v37  ;;  %2338 = vmatprep.mubr.msk.f32.mxu1 %vm203_vm3, %v1050_v47 }
0x104c   :  { %2499 = vmatprep.subr.bf16.mxu1 %v2498_v45 }
0x104f   :  { %2501 = vmatpush3.bf16.msra.mxu1 %v2498_v45 }
0x1050   :  { %2514 = vmatprep.subr.bf16.mxu1 %v2651_v0 }
0x1051   :  { %v1055_v52 = vld [vmem:[#allocation2 + $0x28] sm:$0xff] }
0x1052   :  { %2339 = vmatmul.mubr.msk.f32.vlgmr.msra.gmra.mrb[10].mxu1 %vm203_vm3, %v1051_v48 }
0x1053   :  { %2341 = vmatprep.mubr.msk.f32.mxu1 %vm203_vm3, %v1052_v49  ;;  %2516 = vmatpush3.bf16.msra.mxu1 %v2936_v24 }
0x1054   :  { %2517 = vmatprep.subr.bf16.mxu1 %v2651_v0 }
0x1056   :  { %2342 = vmatmul.mubr.msk.f32.gmra.mrb[12].mxu1 %vm203_vm3, %v1053_v50  ;;  %v945_v50 = vld [vmem:[#allocation3 + $0x38] sm:$0xff] }
0x1057   :  { %2344 = vmatprep.mubr.msk.f32.mxu1 %vm203_vm3, %v1054_v51  ;;  %2519 = vmatpush3.bf16.msra.mxu1 %v2946_v27 }
0x1058   :  { %2526 = vmatprep.subr.bf16.mxu1 %v2651_v0 }
0x105a   :  { %2345 = vmatmul.mubr.msk.f32.gmra.mrb[14].mxu1 %vm203_vm3, %v1055_v52 }
0x111d   :  { %v908_v53 = vpop.f32.mrb[8].mxu1 }
0x111e   :  { %v909_v54 = vadd.f32 %v2767_v17, %v908_v53  ;;  %v2318_v55 = vpop.f32.mrb[9].mxu1 }
0x1120   :  { %920 = vrot.lane.b32.xlu0 %v909_v54, %s2654_s12  ;;  %v912_v8 = vadd.f32 %v909_v54, %v839_v7 }
0x1122   :  { %v2080_v10 = vmul.f32 -1.442695, %v912_v8 }
0x1124   :  { %2591 = vpow2.f32 %v2080_v10 }
0x1125   :  { %v2340_v57 = vpop.f32.mrb[10].mxu1 }
0x1126   :  { %v1165_v58 = vadd.f32 %v2340_v57, %v2914_v56  ;;  %v1159_v59 = vpop.f32.mrb[11].mxu1 }
0x1127   :  { %v1160_v60 = vadd.f32 %v2914_v56, %v1159_v59 }
0x1128   :  { %1199 = vst.msk [vmem:[#allocation3 + $0x8] sm:$0xff] %vm182_vm2, %v1165_v58 }
0x1129   :  { %1198 = vst.msk [vmem:[#allocation3] sm:$0xff] %vm182_vm2, %v1160_v60  ;;  %v2343_v61 = vpop.f32.mrb[12].mxu1 }
0x112a   :  { %v1175_v62 = vadd.f32 %v2343_v61, %v2914_v56  ;;  %v1169_v63 = vpop.f32.mrb[13].mxu1 }
0x112b   :  { %v1170_v1 = vadd.f32 %v2914_v56, %v1169_v63 }
0x112c   :  { %1201 = vst.msk [vmem:[#allocation3 + $0x18] sm:$0xff] %vm182_vm2, %v1175_v62 }
0x112d   :  { %1200 = vst.msk [vmem:[#allocation3 + $0x10] sm:$0xff] %vm182_vm2, %v1170_v1  ;;  %v2346_v2 = vpop.f32.mrb[14].mxu1 }
0x112e   :  { %v1185_v3 = vadd.f32 %v2346_v2, %v2914_v56  ;;  %v1179_v5 = vpop.f32.mrb[15].mxu1  ;;  %v2592_v11 = vpop.eup %2591 }
0x112f   :  { %v1180_v6 = vadd.f32 %v2914_v56, %v1179_v5  ;;  %v916_v12 = vadd.f32 1.0, %v2592_v11 }
0x1130   :  { %1203 = vst.msk [vmem:[#allocation3 + $0x28] sm:$0xff] %vm182_vm2, %v1185_v3  ;;  %v1211_v39 = vld [vmem:[#allocation3] sm:$0xff] }
0x1131   :  { %1202 = vst.msk [vmem:[#allocation3 + $0x20] sm:$0xff] %vm182_vm2, %v1180_v6  ;;  %2593 = vrcp.f32 %v916_v12 }
0x113b   :  { %v2594_v13 = vpop.eup %2593 }
0x113c   :  { %v930_v28 = vsub.f32 1.0, %v2594_v13  ;;  %v936_v9 = vmul.f32 %v2594_v13, %v2890_v21 }
0x1192   :  { %v921_v15 = vpop.permute.xlu0 %920 }
0x1193   :  { %v923_v16 = vmul.f32 %v2594_v13, %v921_v15 }
0x1195   :  { %925 = vrot.lane.b32.xlu1 %v923_v16, %s2654_s12 }
0x1207   :  { %v926_v18 = vpop.permute.xlu1 %925 }
0x1208   :  { %v928_v19 = vadd.f32 %v926_v18, %v839_v7  ;;  %v1319_v18 = vld [vmem:[#allocation3 + $0x8] sm:$0xff] }
0x120a   :  { %2595 = vtanh.f32 %v928_v19 }
0x1214   :  { %v2596_v20 = vpop.eup %2595 }
0x1215   :  { %932 = vrot.lane.b32.xlu0 %v2596_v20, %s2655_s2 }
0x1287   :  { %v933_v29 = vpop.permute.xlu0 %932 }
0x1288   :  { %v935_v30 = vmul.f32 %v933_v29, %v930_v28 }
0x128a   :  { %v2951_v31 = vadd.f32 %v936_v9, %v935_v30 }
0x128c   :  { %939 = vrot.lane.b32.xlu1 %v2951_v31, %s2655_s2 }
0x12fe   :  { %v940_v32 = vpop.permute.xlu1 %939 }
0x12ff   :  { %943 = vst.msk [vmem:[#allocation2 + $0x30] sm:$0xff] %vm203_vm3, %v940_v32  ;;  %2328 = vmatmul.mubr.msk.f32.vlgmr.msra.gmra.mrb[12].mxu0 %vm203_vm3, %v940_v32 }
0x1300   :  { %2504 = vmatpush3.bf16.msra.mxu0 %v2936_v24  ;;  %2358 = vmatprep.mubr.msk.f32.mxu0 %vm2652_vm0, %v2653_v4 }
0x1301   :  { %2505 = vmatprep.subr.bf16.mxu0 %v2651_v0 }
0x1304   :  { %2507 = vmatpush3.bf16.msra.mxu0 %v2946_v27 }
0x1305   :  { %2508 = vmatprep.subr.bf16.mxu0 %v2651_v0 }
0x1306   :  { %v1056_v33 = vld [vmem:[#allocation2 + $0x30] sm:$0xff] }
0x1307   :  { %2359 = vmatmul.mubr.f32.vlgmr.msra.gmra.mrb[14].mxu0 %v2653_v4  ;;  %2347 = vmatprep.mubr.msk.f32.mxu1 %vm203_vm3, %v1056_v33 }
0x1308   :  { %2510 = vmatpush3.bf16.msra.mxu0 %v2936_v24  ;;  %2369 = vmatprep.mubr.msk.f32.mxu0 %vm2652_vm0, %v2653_v4 }
0x1309   :  { %2511 = vmatprep.subr.bf16.mxu0 %v2651_v0 }
0x130c   :  { %2513 = vmatpush3.bf16.msra.mxu0 %v2946_v27 }
0x130d   :  { %2520 = vmatprep.subr.bf16.mxu0 %v2651_v0 }
0x13d2   :  { %v1014_v14 = vpop.f32.mrb[12].mxu0 }
0x13d3   :  { %v2329_v34 = vpop.f32.mrb[13].mxu0  ;;  %v1015_v49 = vadd.f32 %v2767_v17, %v1014_v14 }
0x13d5   :  { %v1018_v51 = vadd.f32 %v1015_v49, %v945_v50 }
0x13d7   :  { %v2082_v52 = vmul.f32 -1.442695, %v1018_v51 }
0x13da   :  { %v1284_v36 = vpop.f32.mrb[14].mxu0 }
0x13db   :  { %v1285_v37 = vadd.f32 %v2974_v35, %v1284_v36  ;;  %v2360_v38 = vpop.f32.mrb[15].mxu0 }
0x13dd   :  { %1296 = vrot.lane.b32.xlu0 %v1285_v37, %s2654_s12  ;;  %v1288_v40 = vadd.f32 %v1285_v37, %v1211_v39 }
0x13df   :  { %v2093_v41 = vmul.f32 -1.442695, %v1288_v40 }
0x13e1   :  { %2597 = vpow2.f32 %v2093_v41 }
0x13eb   :  { %v2598_v42 = vpop.eup %2597 }
0x13ec   :  { %v1292_v21 = vadd.f32 1.0, %v2598_v42 }
0x13ee   :  { %2599 = vrcp.f32 %v1292_v21  ;;  %v1424_v21 = vld [vmem:[#allocation3 + $0x10] sm:$0xff] }
0x13f8   :  { %v2600_v43 = vpop.eup %2599 }
0x13f9   :  { %v1306_v55 = vsub.f32 1.0, %v2600_v43  ;;  %v1312_v58 = vmul.f32 0.0, %v2600_v43 }
0x144f   :  { %v1297_v44 = vpop.permute.xlu0 %1296 }
0x1450   :  { %v1299_v45 = vmul.f32 %v2600_v43, %v1297_v44 }
0x1452   :  { %1301 = vrot.lane.b32.xlu1 %v1299_v45, %s2654_s12 }
0x14c4   :  { %v1302_v46 = vpop.permute.xlu1 %1301 }
0x14c5   :  { %v1304_v47 = vadd.f32 %v1302_v46, %v1211_v39 }
0x14c7   :  { %2601 = vtanh.f32 %v1304_v47 }
0x14c8   :  { %2603 = vpow2.f32 %v2082_v52 }
0x14d1   :  { %v2602_v48 = vpop.eup %2601 }
0x14d2   :  { %1308 = vrot.lane.b32.xlu0 %v2602_v48, %s2655_s2  ;;  %v2604_v53 = vpop.eup %2603 }
0x14d3   :  { %v1022_v54 = vadd.f32 1.0, %v2604_v53 }
0x14d5   :  { %2605 = vrcp.f32 %v1022_v54 }
0x14d6   :  { %1026 = vrot.lane.b32.xlu0 %v1015_v49, %s2654_s12 }
0x14df   :  { %v2606_v61 = vpop.eup %2605 }
0x14e0   :  { %v1036_v5 = vsub.f32 1.0, %v2606_v61  ;;  %v1042_v7 = vmul.f32 %v2606_v61, %v2951_v31 }
0x1544   :  { %v1309_v57 = vpop.permute.xlu0 %1308 }
0x1545   :  { %v1311_v59 = vmul.f32 %v1309_v57, %v1306_v55 }
0x1547   :  { %v1313_v60 = vadd.f32 %v1312_v58, %v1311_v59 }
0x1548   :  { %v1027_v62 = vpop.permute.xlu0 %1026 }
0x1549   :  { %v1029_v63 = vmul.f32 %v2606_v61, %v1027_v62  ;;  %1315 = vrot.lane.b32.xlu1 %v1313_v60, %s2655_s2 }
0x154b   :  { %1031 = vrot.lane.b32.xlu0 %v1029_v63, %s2654_s12  ;;  %v1529_v63 = vld [vmem:[#allocation3 + $0x18] sm:$0xff] }
0x15bb   :  { %v1316_v17 = vpop.permute.xlu1 %1315 }
0x15bc   :  { %1318 = vst.msk [vmem:[%s3106_s9] sm:$0xff] %vm203_vm3, %v1316_v17  ;;  %2370 = vmatmul.mubr.msk.f32.vlgmr.msra.gmra.mrb[16].mxu0 %vm203_vm3, %v1316_v17 }
0x15bd   :  { %v1032_v1 = vpop.permute.xlu0 %1031  ;;  %2522 = vmatpush3.bf16.msra.mxu0 %v2936_v24  ;;  %2391 = vmatprep.mubr.msk.f32.mxu0 %vm2652_vm0, %v2653_v4 }
0x15be   :  { %v1034_v2 = vadd.f32 %v1032_v1, %v945_v50  ;;  %2523 = vmatprep.subr.bf16.mxu0 %v2651_v0 }
0x15c0   :  { %2607 = vtanh.f32 %v1034_v2 }
0x15c1   :  { %2525 = vmatpush3.bf16.msra.mxu0 %v2946_v27 }
0x15c2   :  { %2532 = vmatprep.subr.bf16.mxu0 %v2651_v0 }
0x15ca   :  { %v2608_v3 = vpop.eup %2607 }
0x15cb   :  { %1038 = vrot.lane.b32.xlu0 %v2608_v3, %s2655_s2 }
0x163d   :  { %v1039_v6 = vpop.permute.xlu0 %1038 }
0x163e   :  { %v1041_v8 = vmul.f32 %v1039_v6, %v1036_v5 }
0x1640   :  { %v1043_v10 = vadd.f32 %v1042_v7, %v1041_v8 }
0x1642   :  { %1045 = vrot.lane.b32.xlu0 %v1043_v10, %s2655_s2 }
0x168f   :  { %v1388_v11 = vpop.f32.mrb[16].mxu0 }
0x1690   :  { %v1389_v12 = vadd.f32 %v2974_v35, %v1388_v11  ;;  %v2371_v13 = vpop.f32.mrb[17].mxu0 }
0x1692   :  { %1400 = vrot.lane.b32.xlu1 %v1389_v12, %s2654_s12  ;;  %v1392_v19 = vadd.f32 %v1389_v12, %v1319_v18 }
0x1694   :  { %v2095_v20 = vmul.f32 -1.442695, %v1392_v19 }
0x1696   :  { %2609 = vpow2.f32 %v2095_v20 }
0x16a0   :  { %v2610_v22 = vpop.eup %2609 }
0x16a1   :  { %v1396_v23 = vadd.f32 1.0, %v2610_v22 }
0x16a3   :  { %2611 = vrcp.f32 %v1396_v23 }
0x16ad   :  { %v2612_v25 = vpop.eup %2611 }
0x16ae   :  { %v1410_v34 = vsub.f32 1.0, %v2612_v25  ;;  %v1416_v37 = vmul.f32 %v2612_v25, %v1313_v60 }
0x16b4   :  { %v1046_v15 = vpop.permute.xlu0 %1045 }
0x16b5   :  { %1049 = vst.msk [vmem:[#allocation2 + $0x38] sm:$0xff] %vm203_vm3, %v1046_v15 }
0x16bc   :  { %v1057_v16 = vld [vmem:[#allocation2 + $0x38] sm:$0xff] }
0x16bd   :  { %2348 = vmatmul.mubr.msk.f32.gmra.mrb[16].mxu1 %vm203_vm3, %v1057_v16 }
0x16be   :  { %2380 = vmatprep.mubr.msk.f32.mxu1 %vm2652_vm0, %v2653_v4 }
0x1704   :  { %v1401_v26 = vpop.permute.xlu1 %1400 }
0x1705   :  { %v1403_v28 = vmul.f32 %v2612_v25, %v1401_v26  ;;  %v1634_v25 = vld [vmem:[#allocation3 + $0x20] sm:$0xff] }
0x1707   :  { %1405 = vrot.lane.b32.xlu1 %v1403_v28, %s2654_s12 }
0x1779   :  { %v1406_v29 = vpop.permute.xlu1 %1405 }
0x177a   :  { %v1408_v9 = vadd.f32 %v1406_v29, %v1319_v18 }
0x177c   :  { %2613 = vtanh.f32 %v1408_v9 }
0x1786   :  { %v2614_v30 = vpop.eup %2613 }
0x1787   :  { %1412 = vrot.lane.b32.xlu1 %v2614_v30, %s2655_s2 }
0x1790   :  { %v2349_v31 = vpop.f32.mrb[16].mxu1 }
0x1791   :  { %v1195_v32 = vadd.f32 %v2349_v31, %v2914_v56  ;;  %v1189_v33 = vpop.f32.mrb[17].mxu1 }
0x1792   :  { %v1190_v14 = vadd.f32 %v2914_v56, %v1189_v33 }
0x1793   :  { %1205 = vst.msk [vmem:[#allocation3 + $0x38] sm:$0xff] %vm182_vm2, %v1195_v32 }
0x1794   :  { %1204 = vst.msk [vmem:[#allocation3 + $0x30] sm:$0xff] %vm182_vm2, %v1190_v14 }
0x17f9   :  { %v1413_v36 = vpop.permute.xlu1 %1412 }
0x17fa   :  { %v1415_v38 = vmul.f32 %v1413_v36, %v1410_v34 }
0x17fc   :  { %v1417_v39 = vadd.f32 %v1416_v37, %v1415_v38 }
0x17fe   :  { %1419 = vrot.lane.b32.xlu1 %v1417_v39, %s2655_s2 }
0x1870   :  { %v1420_v40 = vpop.permute.xlu1 %1419 }
0x1871   :  { %2096 = vst.msk [vmem:[%s3106_s9 + $0x8] sm:$0xff] %vm203_vm3, %v1420_v40  ;;  %2381 = vmatmul.mubr.msk.f32.vlgmr.msra.gmra.mrb[18].mxu1 %vm203_vm3, %v1420_v40 }
0x1872   :  { %2528 = vmatpush3.bf16.msra.mxu1 %v2936_v24  ;;  %2402 = vmatprep.mubr.msk.f32.mxu1 %vm2652_vm0, %v2653_v4 }
0x1873   :  { %2529 = vmatprep.subr.bf16.mxu1 %v2651_v0 }
0x1876   :  { %2531 = vmatpush3.bf16.msra.mxu1 %v2946_v27 }
0x1877   :  { %2538 = vmatprep.subr.bf16.mxu1 %v2651_v0 }
0x1944   :  { %v1493_v56 = vpop.f32.mrb[18].mxu1 }
0x1945   :  { %v1494_v41 = vadd.f32 %v2974_v35, %v1493_v56  ;;  %v2382_v42 = vpop.f32.mrb[19].mxu1 }
0x1947   :  { %1505 = vrot.lane.b32.xlu0 %v1494_v41, %s2654_s12  ;;  %v1497_v43 = vadd.f32 %v1494_v41, %v1424_v21 }
0x1949   :  { %v2098_v44 = vmul.f32 -1.442695, %v1497_v43  ;;  %v1739_v43 = vld [vmem:[#allocation3 + $0x28] sm:$0xff] }
0x194b   :  { %2615 = vpow2.f32 %v2098_v44 }
0x1955   :  { %v2616_v45 = vpop.eup %2615 }
0x1956   :  { %v1501_v46 = vadd.f32 1.0, %v2616_v45 }
0x1958   :  { %2617 = vrcp.f32 %v1501_v46 }
0x1962   :  { %v2618_v47 = vpop.eup %2617 }
0x1963   :  { %v1515_v53 = vsub.f32 1.0, %v2618_v47  ;;  %v1521_v55 = vmul.f32 %v2618_v47, %v1417_v39 }
0x19b9   :  { %v1506_v48 = vpop.permute.xlu0 %1505 }
0x19ba   :  { %v1508_v49 = vmul.f32 %v2618_v47, %v1506_v48 }
0x19bc   :  { %1510 = vrot.lane.b32.xlu1 %v1508_v49, %s2654_s12 }
0x1a2e   :  { %v1511_v50 = vpop.permute.xlu1 %1510 }
0x1a2f   :  { %v1513_v51 = vadd.f32 %v1511_v50, %v1424_v21 }
0x1a31   :  { %2619 = vtanh.f32 %v1513_v51 }
0x1a3b   :  { %v2620_v52 = vpop.eup %2619 }
0x1a3c   :  { %1517 = vrot.lane.b32.xlu0 %v2620_v52, %s2655_s2 }
0x1aae   :  { %v1518_v54 = vpop.permute.xlu0 %1517 }
0x1aaf   :  { %v1520_v57 = vmul.f32 %v1518_v54, %v1515_v53 }
0x1ab1   :  { %v1522_v58 = vadd.f32 %v1521_v55, %v1520_v57 }
0x1ab3   :  { %1524 = vrot.lane.b32.xlu1 %v1522_v58, %s2655_s2 }
0x1b25   :  { %v1525_v59 = vpop.permute.xlu1 %1524 }
0x1b26   :  { %2099 = vst.msk [vmem:[%s3106_s9 + $0x10] sm:$0xff] %vm203_vm3, %v1525_v59  ;;  %2392 = vmatmul.mubr.msk.f32.vlgmr.msra.gmra.mrb[18].mxu0 %vm203_vm3, %v1525_v59 }
0x1b27   :  { %2534 = vmatpush3.bf16.msra.mxu0 %v2936_v24  ;;  %2413 = vmatprep.mubr.msk.f32.mxu0 %vm2652_vm0, %v2653_v4 }
0x1b28   :  { %2535 = vmatprep.subr.bf16.mxu0 %v2651_v0 }
0x1b2b   :  { %2537 = vmatpush3.bf16.msra.mxu0 %v2946_v27 }
0x1b2c   :  { %2544 = vmatprep.subr.bf16.mxu0 %v2651_v0 }
0x1bf9   :  { %v1598_v60 = vpop.f32.mrb[18].mxu0 }
0x1bfa   :  { %v1599_v61 = vadd.f32 %v2974_v35, %v1598_v60  ;;  %v2393_v62 = vpop.f32.mrb[19].mxu0  ;;  %v1844_v60 = vld [vmem:[#allocation3 + $0x30] sm:$0xff] }
0x1bfc   :  { %1610 = vrot.lane.b32.xlu0 %v1599_v61, %s2654_s12  ;;  %v1602_v17 = vadd.f32 %v1599_v61, %v1529_v63 }
0x1bfe   :  { %v2101_v1 = vmul.f32 -1.442695, %v1602_v17 }
0x1c00   :  { %2621 = vpow2.f32 %v2101_v1 }
0x1c0a   :  { %v2622_v2 = vpop.eup %2621 }
0x1c0b   :  { %v1606_v3 = vadd.f32 1.0, %v2622_v2 }
0x1c0d   :  { %2623 = vrcp.f32 %v1606_v3 }
0x1c17   :  { %v2624_v5 = vpop.eup %2623 }
0x1c18   :  { %v1620_v12 = vsub.f32 1.0, %v2624_v5  ;;  %v1626_v15 = vmul.f32 %v2624_v5, %v1522_v58 }
0x1c6e   :  { %v1611_v6 = vpop.permute.xlu0 %1610 }
0x1c6f   :  { %v1613_v7 = vmul.f32 %v2624_v5, %v1611_v6 }
0x1c71   :  { %1615 = vrot.lane.b32.xlu1 %v1613_v7, %s2654_s12 }
0x1ce3   :  { %v1616_v8 = vpop.permute.xlu1 %1615 }
0x1ce4   :  { %v1618_v10 = vadd.f32 %v1616_v8, %v1529_v63 }
0x1ce6   :  { %2625 = vtanh.f32 %v1618_v10 }
0x1cf0   :  { %v2626_v11 = vpop.eup %2625 }
0x1cf1   :  { %1622 = vrot.lane.b32.xlu0 %v2626_v11, %s2655_s2 }
0x1d63   :  { %v1623_v13 = vpop.permute.xlu0 %1622 }
0x1d64   :  { %v1625_v16 = vmul.f32 %v1623_v13, %v1620_v12 }
0x1d66   :  { %v1627_v18 = vadd.f32 %v1626_v15, %v1625_v16 }
0x1d68   :  { %1629 = vrot.lane.b32.xlu1 %v1627_v18, %s2655_s2 }
0x1dda   :  { %v1630_v19 = vpop.permute.xlu1 %1629 }
0x1ddb   :  { %2102 = vst.msk [vmem:[%s3106_s9 + $0x18] sm:$0xff] %vm203_vm3, %v1630_v19  ;;  %2403 = vmatmul.mubr.msk.f32.vlgmr.msra.gmra.mrb[20].mxu1 %vm203_vm3, %v1630_v19 }
0x1ddc   :  { %2540 = vmatpush3.bf16.msra.mxu1 %v2936_v24  ;;  %2424 = vmatprep.mubr.msk.f32.mxu1 %vm2652_vm0, %v2653_v4 }
0x1ddd   :  { %2541 = vmatprep.subr.bf16.mxu1 %v2651_v0 }
0x1de0   :  { %2543 = vmatpush3.bf16.msra.mxu1 %v2946_v27 }
0x1eae   :  { %v1703_v20 = vpop.f32.mrb[20].mxu1 }
0x1eaf   :  { %v1704_v22 = vadd.f32 %v2974_v35, %v1703_v20  ;;  %v2404_v23 = vpop.f32.mrb[21].mxu1  ;;  %v1949_v20 = vld [vmem:[#allocation3 + $0x38] sm:$0xff] }
0x1eb1   :  { %1715 = vrot.lane.b32.xlu0 %v1704_v22, %s2654_s12  ;;  %v1707_v26 = vadd.f32 %v1704_v22, %v1634_v25 }
0x1eb3   :  { %v2104_v28 = vmul.f32 -1.442695, %v1707_v26 }
0x1eb5   :  { %2627 = vpow2.f32 %v2104_v28 }
0x1ebf   :  { %v2628_v29 = vpop.eup %2627 }
0x1ec0   :  { %v1711_v9 = vadd.f32 1.0, %v2628_v29 }
0x1ec2   :  { %2629 = vrcp.f32 %v1711_v9 }
0x1ecc   :  { %v2630_v30 = vpop.eup %2629 }
0x1ecd   :  { %v1725_v36 = vsub.f32 1.0, %v2630_v30  ;;  %v1731_v38 = vmul.f32 %v2630_v30, %v1627_v18 }
0x1f23   :  { %v1716_v31 = vpop.permute.xlu0 %1715 }
0x1f24   :  { %v1718_v32 = vmul.f32 %v2630_v30, %v1716_v31 }
0x1f26   :  { %1720 = vrot.lane.b32.xlu1 %v1718_v32, %s2654_s12 }
0x1f98   :  { %v1721_v33 = vpop.permute.xlu1 %1720 }
0x1f99   :  { %v1723_v14 = vadd.f32 %v1721_v33, %v1634_v25 }
0x1f9b   :  { %2631 = vtanh.f32 %v1723_v14 }
0x1fa5   :  { %v2632_v34 = vpop.eup %2631 }
0x1fa6   :  { %1727 = vrot.lane.b32.xlu0 %v2632_v34, %s2655_s2 }
0x2018   :  { %v1728_v37 = vpop.permute.xlu0 %1727 }
0x2019   :  { %v1730_v39 = vmul.f32 %v1728_v37, %v1725_v36 }
0x201b   :  { %v1732_v40 = vadd.f32 %v1731_v38, %v1730_v39 }
0x201d   :  { %1734 = vrot.lane.b32.xlu1 %v1732_v40, %s2655_s2 }
0x208f   :  { %v1735_v56 = vpop.permute.xlu1 %1734 }
0x2090   :  { %2105 = vst.msk [vmem:[%s3106_s9 + $0x20] sm:$0xff] %vm203_vm3, %v1735_v56  ;;  %2414 = vmatmul.mubr.msk.f32.vlgmr.msra.gmra.mrb[20].mxu0 %vm203_vm3, %v1735_v56 }
0x2091   :  { %2546 = vmatpush3.bf16.msra.mxu0 %v2936_v24  ;;  %2435 = vmatprep.mubr.msk.f32.mxu0 %vm2652_vm0, %v2653_v4 }
0x2092   :  { %2547 = vmatprep.subr.bf16.mxu0 %v2651_v0 }
0x2095   :  { %2549 = vmatpush3.bf16.msra.mxu0 %v2946_v27 }
0x2163   :  { %v1808_v41 = vpop.f32.mrb[20].mxu0 }
0x2164   :  { %v1809_v42 = vadd.f32 %v2974_v35, %v1808_v41  ;;  %v2415_v21 = vpop.f32.mrb[21].mxu0 }
0x2166   :  { %1820 = vrot.lane.b32.xlu0 %v1809_v42, %s2654_s12  ;;  %v1812_v44 = vadd.f32 %v1809_v42, %v1739_v43 }
0x2168   :  { %v2107_v45 = vmul.f32 -1.442695, %v1812_v44 }
0x216a   :  { %2633 = vpow2.f32 %v2107_v45 }
0x2174   :  { %v2634_v46 = vpop.eup %2633 }
0x2175   :  { %v1816_v47 = vadd.f32 1.0, %v2634_v46 }
0x2177   :  { %2635 = vrcp.f32 %v1816_v47 }
0x2181   :  { %v2636_v24 = vpop.eup %2635 }
0x2182   :  { %v1830_v50 = vsub.f32 1.0, %v2636_v24  ;;  %v1836_v52 = vmul.f32 %v2636_v24, %v1732_v40 }
0x21d8   :  { %v1821_v48 = vpop.permute.xlu0 %1820 }
0x21d9   :  { %v1823_v4 = vmul.f32 %v2636_v24, %v1821_v48 }
0x21db   :  { %1825 = vrot.lane.b32.xlu1 %v1823_v4, %s2654_s12 }
0x224d   :  { %v1826_v0 = vpop.permute.xlu1 %1825 }
0x224e   :  { %v1828_v27 = vadd.f32 %v1826_v0, %v1739_v43 }
0x2250   :  { %2637 = vtanh.f32 %v1828_v27 }
0x225a   :  { %v2638_v49 = vpop.eup %2637 }
0x225b   :  { %1832 = vrot.lane.b32.xlu0 %v2638_v49, %s2655_s2 }
0x22cd   :  { %v1833_v51 = vpop.permute.xlu0 %1832 }
0x22ce   :  { %v1835_v53 = vmul.f32 %v1833_v51, %v1830_v50 }
0x22d0   :  { %v1837_v54 = vadd.f32 %v1836_v52, %v1835_v53 }
0x22d2   :  { %1839 = vrot.lane.b32.xlu1 %v1837_v54, %s2655_s2 }
0x2344   :  { %v1840_v55 = vpop.permute.xlu1 %1839 }
0x2345   :  { %2108 = vst.msk [vmem:[%s3106_s9 + $0x28] sm:$0xff] %vm203_vm3, %v1840_v55  ;;  %2425 = vmatmul.mubr.msk.f32.vlgmr.msra.gmra.mrb[22].mxu1 %vm203_vm3, %v1840_v55 }
0x2418   :  { %v1913_v57 = vpop.f32.mrb[22].mxu1 }
0x2419   :  { %v1914_v58 = vadd.f32 %v2974_v35, %v1913_v57  ;;  %v2426_v59 = vpop.f32.mrb[23].mxu1 }
0x241b   :  { %1925 = vrot.lane.b32.xlu0 %v1914_v58, %s2654_s12  ;;  %v1917_v61 = vadd.f32 %v1914_v58, %v1844_v60 }
0x241d   :  { %v2110_v62 = vmul.f32 -1.442695, %v1917_v61 }
0x241f   :  { %2639 = vpow2.f32 %v2110_v62 }
0x2429   :  { %v2640_v63 = vpop.eup %2639 }
0x242a   :  { %v1921_v17 = vadd.f32 1.0, %v2640_v63 }
0x242c   :  { %2641 = vrcp.f32 %v1921_v17 }
0x2436   :  { %v2642_v1 = vpop.eup %2641 }
0x2437   :  { %v1935_v8 = vsub.f32 1.0, %v2642_v1  ;;  %v1941_v11 = vmul.f32 %v2642_v1, %v1837_v54 }
0x248d   :  { %v1926_v2 = vpop.permute.xlu0 %1925 }
0x248e   :  { %v1928_v3 = vmul.f32 %v2642_v1, %v1926_v2 }
0x2490   :  { %1930 = vrot.lane.b32.xlu1 %v1928_v3, %s2654_s12 }
0x2502   :  { %v1931_v5 = vpop.permute.xlu1 %1930 }
0x2503   :  { %v1933_v6 = vadd.f32 %v1931_v5, %v1844_v60 }
0x2505   :  { %2643 = vtanh.f32 %v1933_v6 }
0x250f   :  { %v2644_v7 = vpop.eup %2643 }
0x2510   :  { %1937 = vrot.lane.b32.xlu0 %v2644_v7, %s2655_s2 }
0x2582   :  { %v1938_v10 = vpop.permute.xlu0 %1937 }
0x2583   :  { %v1940_v12 = vmul.f32 %v1938_v10, %v1935_v8 }
0x2585   :  { %v1942_v13 = vadd.f32 %v1941_v11, %v1940_v12 }
0x2587   :  { %1944 = vrot.lane.b32.xlu1 %v1942_v13, %s2655_s2 }
0x25f9   :  { %v1945_v15 = vpop.permute.xlu1 %1944 }
0x25fa   :  { %2111 = vst.msk [vmem:[%s3106_s9 + $0x30] sm:$0xff] %vm203_vm3, %v1945_v15  ;;  %2436 = vmatmul.mubr.msk.f32.vlgmr.msra.gmra.mrb[22].mxu0 %vm203_vm3, %v1945_v15 }
0x26cd   :  { %v2018_v16 = vpop.f32.mrb[22].mxu0 }
0x26ce   :  { %v2019_v18 = vadd.f32 %v2974_v35, %v2018_v16  ;;  %v2437_v19 = vpop.f32.mrb[23].mxu0 }
0x26d0   :  { %2030 = vrot.lane.b32.xlu0 %v2019_v18, %s2654_s12  ;;  %v2022_v22 = vadd.f32 %v2019_v18, %v1949_v20 }
0x26d2   :  { %v2113_v23 = vmul.f32 -1.442695, %v2022_v22 }
0x26d4   :  { %2645 = vpow2.f32 %v2113_v23 }
0x26de   :  { %v2646_v25 = vpop.eup %2645 }
0x26df   :  { %v2026_v26 = vadd.f32 1.0, %v2646_v25 }
0x26e1   :  { %2647 = vrcp.f32 %v2026_v26 }
0x26eb   :  { %v2648_v28 = vpop.eup %2647 }
0x26ec   :  { %v2040_v35 = vsub.f32 1.0, %v2648_v28  ;;  %v2046_v14 = vmul.f32 %v2648_v28, %v1942_v13 }
0x2742   :  { %v2031_v29 = vpop.permute.xlu0 %2030 }
0x2743   :  { %v2033_v9 = vmul.f32 %v2648_v28, %v2031_v29 }
0x2745   :  { %2035 = vrot.lane.b32.xlu1 %v2033_v9, %s2654_s12 }
0x27b7   :  { %v2036_v30 = vpop.permute.xlu1 %2035 }
0x27b8   :  { %v2038_v31 = vadd.f32 %v2036_v30, %v1949_v20 }
0x27ba   :  { %2649 = vtanh.f32 %v2038_v31 }
0x27c4   :  { %v2650_v32 = vpop.eup %2649 }
0x27c5   :  { %2042 = vrot.lane.b32.xlu0 %v2650_v32, %s2655_s2 }
0x2837   :  { %v2043_v33 = vpop.permute.xlu0 %2042 }
0x2838   :  { %v2045_v34 = vmul.f32 %v2043_v33, %v2040_v35 }
0x283a   :  { %v2047_v36 = vadd.f32 %v2046_v14, %v2045_v34 }
0x283c   :  { %2049 = vrot.lane.b32.xlu1 %v2047_v36, %s2655_s2 }
0x28ae   :  { %v2050_v37 = vpop.permute.xlu1 %2049 }
0x28af   :  { %2114 = vst.msk [vmem:[%s3106_s9 + $0x38] sm:$0xff] %vm203_vm3, %v2050_v37 }

</bundles_post_ra>
